<compile_context>
chip_gen: v5e
topology: v5e:2x2
jax: 0.10.0
libtpu: 0.0.40
codegen_flags: <defaults>
</compile_context>

<pallas_src>
import functools

import numpy as np

import jax
import jax.numpy as jnp
from jax.experimental import pallas as pl
from jax.experimental.pallas import tpu as pltpu


# ----------------------------------------------------------------------------
# Fused STN3d kernel: Bt batch elements (M = Bt*N rows) per grid step.
# ----------------------------------------------------------------------------
def stn3d_kernel(x_ref, keep_ref, seg_ref, emat_ref, fmask_ref,
                 w1_ref, b1_ref, w2_ref, b2_ref, w3_ref, b3_ref,
                 w4_ref, b4_ref, w5_ref, b5_ref, w6_ref, b6_ref,
                 fw1_ref, fb1_ref, fw2_ref, fb2_ref, fw3_ref, fb3_ref,
                 o_ref, *, M):
    keep_prev = keep_ref[:, 0:1]        # (M,1): 0 on the first row of each batch element
    keep_next = keep_ref[:, 1:2]        # (M,1): 0 on the last  row of each batch element

    def conv_k3_relu(h, w_ref, b_ref):
        # w_ref: (3, Cin, Cout). Tap 0 multiplies point n-1, tap 1 point n, tap 2 point n+1
        # (zero padding at segment boundaries is realized by the keep_* masks).
        y = jnp.dot(h, w_ref[1], preferred_element_type=jnp.float32) + b_ref[...]
        h_prev = pltpu.roll(h, 1, 0) * keep_prev          # row m <- h[m-1]
        y = y + jnp.dot(h_prev, w_ref[0], preferred_element_type=jnp.float32)
        h_next = pltpu.roll(h, M - 1, 0) * keep_next      # row m <- h[m+1]
        y = y + jnp.dot(h_next, w_ref[2], preferred_element_type=jnp.float32)
        return jnp.maximum(y, 0.0)

    h = x_ref[...]                          # (M, d)
    h = conv_k3_relu(h, w1_ref, b1_ref)     # (M, 64)   -- conv1 now on the MXU
    h = conv_k3_relu(h, w2_ref, b2_ref)     # (M, 128)
    h = conv_k3_relu(h, w3_ref, b3_ref)     # (M, 256)
    h = conv_k3_relu(h, w4_ref, b4_ref)     # (M, 128)
    h = conv_k3_relu(h, w5_ref, b5_ref)     # (M, 64)
    h = conv_k3_relu(h, w6_ref, b6_ref)     # (M, d)

    # torch .view(B,-1) flatten + fc1, all on the MXU (no in-kernel reshape):
    z = jnp.dot(h, emat_ref[...], preferred_element_type=jnp.float32)      # (M, N*d)
    zm = z * fmask_ref[...]                                                 # keep own point's lanes
    flat = jnp.dot(seg_ref[...], zm, preferred_element_type=jnp.float32)   # (Bt, N*d) point-major

    y = jnp.maximum(jnp.dot(flat, fw1_ref[...], preferred_element_type=jnp.float32)
                    + fb1_ref[...], 0.0)                                    # (Bt, 512)
    y = jnp.maximum(jnp.dot(y, fw2_ref[...], preferred_element_type=jnp.float32)
                    + fb2_ref[...], 0.0)                                    # (Bt, 256)
    y = jnp.dot(y, fw3_ref[...], preferred_element_type=jnp.float32) + fb3_ref[...]  # (Bt, 4)

    lane = jax.lax.broadcasted_iota(jnp.int32, y.shape, 1)
    iden = jnp.where((lane == 0) | (lane == 3), 1.0, 0.0)   # [1, 0, 0, 1]
    o_ref[...] = y + iden


# ----------------------------------------------------------------------------
# Wrapper
# ----------------------------------------------------------------------------
_PARAM_ORDER = ("conv1_w", "conv1_b", "conv2_w", "conv2_b", "conv3_w", "conv3_b",
                "conv4_w", "conv4_b", "conv5_w", "conv5_b", "conv6_w", "conv6_b",
                "fc1_w", "fc1_b", "fc2_w", "fc2_b", "fc3_w", "fc3_b")


def _const_spec(arr):
    zeros = (0,) * arr.ndim
    return pl.BlockSpec(arr.shape, lambda g, _z=zeros: _z)


@functools.partial(jax.jit, static_argnames=("block_batch",))
def stn3d_forward(x, params, *, block_batch=8):
    """x: (B, d, N) NCW input (as in the PyTorch module) -> trans (B, 2, 2)."""
    B, d, N = x.shape
    Bt = max(1, min(block_batch, B))           # batch elements folded per grid step
    Bp = -(-B // Bt) * Bt                      # pad batch to a multiple of Bt
    nblk = Bp // Bt
    M = Bt * N                                 # matmul M dim (128 at the demo sizes)

    x_nc = jnp.swapaxes(x, 1, 2).astype(jnp.float32)        # (B, N, d)
    if Bp != B:
        x_nc = jnp.concatenate([x_nc, jnp.zeros((Bp - B, N, d), jnp.float32)], 0)
    x_flat = x_nc.reshape(Bp * N, d)                         # rows = (batch, point)

    # --- static index-math tables (host-built; no in-kernel int div/mod) ---
    m_idx = np.arange(M)
    pos = m_idx % N
    keep = np.stack([pos != 0, pos != N - 1], axis=1).astype(np.float32)        # (M, 2)
    seg = (m_idx[None, :] // N == np.arange(Bt)[:, None]).astype(np.float32)    # (Bt, M)
    K = N * d
    k_idx = np.arange(K)
    emat = (k_idx[None, :] % d == np.arange(d)[:, None]).astype(np.float32)     # (d, K)
    fmask = (k_idx[None, :] // d == pos[:, None]).astype(np.float32)            # (M, K)

    # fc1 rows permuted from torch channel-major (c*N + n) to point-major (n*d + c).
    perm = (k_idx % d) * N + (k_idx // d)
    fw1_pm = params["fc1_w"][perm, :]

    wlist = [fw1_pm if name == "fc1_w" else params[name] for name in _PARAM_ORDER]
    aux = [jnp.asarray(keep), jnp.asarray(seg), jnp.asarray(emat), jnp.asarray(fmask)]

    in_specs = ([pl.BlockSpec((M, d), lambda g: (g, 0))]
                + [_const_spec(a) for a in aux]
                + [_const_spec(w) for w in wlist])

    out = pl.pallas_call(
        functools.partial(stn3d_kernel, M=M),
        out_shape=jax.ShapeDtypeStruct((Bp, 4), jnp.float32),
        grid=(nblk,),
        in_specs=in_specs,
        out_specs=pl.BlockSpec((Bt, 4), lambda g: (g, 0)),
        compiler_params=pltpu.CompilerParams(dimension_semantics=("parallel",)),
    )(x_flat, *aux, *wlist)
    return out[:B].reshape(B, 2, 2)


# ----------------------------------------------------------------------------
# Parameter init (deterministic, synthetic; weights stored in kernel layout)
#   conv i: (3, Cin, Cout)  (tap j, input channel, output channel)
#           == torch Conv1d weight (Cout, Cin, 3) transposed to (3, Cin, Cout)
#   fc i  : (Din, Dout) == torch Linear weight transposed;  biases (1, Dout)
# ----------------------------------------------------------------------------
def init_params(key, d=2, N=16):
    chans = [d, 64, 128, 256, 128, 64, d]
    ks = jax.random.split(key, 18)
    p, ki = {}, 0
    for i in range(6):
        cin, cout = chans[i], chans[i + 1]
        p[f"conv{i+1}_w"] = (jax.random.normal(ks[ki], (3, cin, cout), jnp.float32)
                             / np.sqrt(3.0 * cin)); ki += 1
        p[f"conv{i+1}_b"] = 0.1 * jax.random.normal(ks[ki], (1, cout), jnp.float32); ki += 1
    for i, (din, dout) in enumerate(((d * N, 512), (512, 256), (256, 4))):
        p[f"fc{i+1}_w"] = (jax.random.normal(ks[ki], (din, dout), jnp.float32)
                           / np.sqrt(float(din))); ki += 1
        p[f"fc{i+1}_b"] = 0.1 * jax.random.normal(ks[ki], (1, dout), jnp.float32); ki += 1
    return p


# ----------------------------------------------------------------------------
# Pure-JAX reference (correctness check only)
# ----------------------------------------------------------------------------
def _ref_forward(x, p):
    B, d, N = x.shape
    h = jnp.swapaxes(x, 1, 2)                                # (B, N, d)
    for i in range(6):
        w, b = p[f"conv{i+1}_w"], p[f"conv{i+1}_b"]          # (3, Cin, Cout), (1, Cout)
        hp = jnp.pad(h, ((0, 0), (1, 1), (0, 0)))
        h = jnp.maximum(
            jnp.einsum("bnc,co->bno", hp[:, 0:N],     w[0], precision="highest")
            + jnp.einsum("bnc,co->bno", hp[:, 1:N + 1], w[1], precision="highest")
            + jnp.einsum("bnc,co->bno", hp[:, 2:N + 2], w[2], precision="highest")
            + b, 0.0)
    flat = jnp.swapaxes(h, 1, 2).reshape(B, d * N)           # torch channel-major .view(B,-1)
    y = jnp.maximum(jnp.dot(flat, p["fc1_w"], precision="highest") + p["fc1_b"], 0.0)
    y = jnp.maximum(jnp.dot(y, p["fc2_w"], precision="highest") + p["fc2_b"], 0.0)
    y = jnp.dot(y, p["fc3_w"], precision="highest") + p["fc3_b"]
    y = y + jnp.array([1.0, 0.0, 0.0, 1.0], jnp.float32)[None, :]
    return y.reshape(B, 2, 2)


# ----------------------------------------------------------------------------
if __name__ == "__main__":
    B, d, N = 16, 2, 16          # Bt=8 -> M=128 rows/step, grid=(2,) "parallel"
    key = jax.random.PRNGKey(0)
    k_x, k_p = jax.random.split(key)
    x = jax.random.normal(k_x, (B, d, N), jnp.float32)
    params = init_params(k_p, d=d, N=N)

    trans = stn3d_forward(x, params)
    jax.block_until_ready(trans)

    trans_ref = _ref_forward(x, params)
    assert trans.shape == (B, 2, 2)
    err = float(jnp.max(jnp.abs(trans - trans_ref)))
    assert jnp.allclose(trans, trans_ref, atol=1e-3, rtol=1e-3), f"max abs err {err}"

    print("KERNEL_OK")
</pallas_src>

<mosaic_0001>
module attributes {stable_mosaic.version = 11 : i64} {
  func.func @stn3d_kernel(%arg0: i32, %arg1: memref<128x2xf32, #tpu.memory_space<vmem>>, %arg2: memref<128x2xf32, #tpu.memory_space<vmem>>, %arg3: memref<8x128xf32, #tpu.memory_space<vmem>>, %arg4: memref<2x32xf32, #tpu.memory_space<vmem>>, %arg5: memref<128x32xf32, #tpu.memory_space<vmem>>, %arg6: memref<3x2x64xf32, #tpu.memory_space<vmem>>, %arg7: memref<1x64xf32, #tpu.memory_space<vmem>>, %arg8: memref<3x64x128xf32, #tpu.memory_space<vmem>>, %arg9: memref<1x128xf32, #tpu.memory_space<vmem>>, %arg10: memref<3x128x256xf32, #tpu.memory_space<vmem>>, %arg11: memref<1x256xf32, #tpu.memory_space<vmem>>, %arg12: memref<3x256x128xf32, #tpu.memory_space<vmem>>, %arg13: memref<1x128xf32, #tpu.memory_space<vmem>>, %arg14: memref<3x128x64xf32, #tpu.memory_space<vmem>>, %arg15: memref<1x64xf32, #tpu.memory_space<vmem>>, %arg16: memref<3x64x2xf32, #tpu.memory_space<vmem>>, %arg17: memref<1x2xf32, #tpu.memory_space<vmem>>, %arg18: memref<32x512xf32, #tpu.memory_space<vmem>>, %arg19: memref<1x512xf32, #tpu.memory_space<vmem>>, %arg20: memref<512x256xf32, #tpu.memory_space<vmem>>, %arg21: memref<1x256xf32, #tpu.memory_space<vmem>>, %arg22: memref<256x4xf32, #tpu.memory_space<vmem>>, %arg23: memref<1x4xf32, #tpu.memory_space<vmem>>, %arg24: memref<8x4xf32, #tpu.memory_space<vmem>>) attributes {dimension_semantics = [#tpu.dimension_semantics<parallel>], iteration_bounds = array<i64: 2>, scalar_prefetch = 0 : i64, scratch_operands = 0 : i64, tpu.core_type = #tpu.core_type<tc>, window_params = [{transform_indices = @transform_0, window_bounds = array<i64: 128, 2>}, {pipeline_mode = #tpu.pipeline_mode<synchronous>, transform_indices = @transform_1, window_bounds = array<i64: 128, 2>}, {pipeline_mode = #tpu.pipeline_mode<synchronous>, transform_indices = @transform_2, window_bounds = array<i64: 8, 128>}, {pipeline_mode = #tpu.pipeline_mode<synchronous>, transform_indices = @transform_3, window_bounds = array<i64: 2, 32>}, {pipeline_mode = #tpu.pipeline_mode<synchronous>, transform_indices = @transform_4, window_bounds = array<i64: 128, 32>}, {pipeline_mode = #tpu.pipeline_mode<synchronous>, transform_indices = @transform_5, window_bounds = array<i64: 3, 2, 64>}, {pipeline_mode = #tpu.pipeline_mode<synchronous>, transform_indices = @transform_6, window_bounds = array<i64: 1, 64>}, {pipeline_mode = #tpu.pipeline_mode<synchronous>, transform_indices = @transform_7, window_bounds = array<i64: 3, 64, 128>}, {pipeline_mode = #tpu.pipeline_mode<synchronous>, transform_indices = @transform_8, window_bounds = array<i64: 1, 128>}, {pipeline_mode = #tpu.pipeline_mode<synchronous>, transform_indices = @transform_9, window_bounds = array<i64: 3, 128, 256>}, {pipeline_mode = #tpu.pipeline_mode<synchronous>, transform_indices = @transform_10, window_bounds = array<i64: 1, 256>}, {pipeline_mode = #tpu.pipeline_mode<synchronous>, transform_indices = @transform_11, window_bounds = array<i64: 3, 256, 128>}, {pipeline_mode = #tpu.pipeline_mode<synchronous>, transform_indices = @transform_12, window_bounds = array<i64: 1, 128>}, {pipeline_mode = #tpu.pipeline_mode<synchronous>, transform_indices = @transform_13, window_bounds = array<i64: 3, 128, 64>}, {pipeline_mode = #tpu.pipeline_mode<synchronous>, transform_indices = @transform_14, window_bounds = array<i64: 1, 64>}, {pipeline_mode = #tpu.pipeline_mode<synchronous>, transform_indices = @transform_15, window_bounds = array<i64: 3, 64, 2>}, {pipeline_mode = #tpu.pipeline_mode<synchronous>, transform_indices = @transform_16, window_bounds = array<i64: 1, 2>}, {pipeline_mode = #tpu.pipeline_mode<synchronous>, transform_indices = @transform_17, window_bounds = array<i64: 32, 512>}, {pipeline_mode = #tpu.pipeline_mode<synchronous>, transform_indices = @transform_18, window_bounds = array<i64: 1, 512>}, {pipeline_mode = #tpu.pipeline_mode<synchronous>, transform_indices = @transform_19, window_bounds = array<i64: 512, 256>}, {pipeline_mode = #tpu.pipeline_mode<synchronous>, transform_indices = @transform_20, window_bounds = array<i64: 1, 256>}, {pipeline_mode = #tpu.pipeline_mode<synchronous>, transform_indices = @transform_21, window_bounds = array<i64: 256, 4>}, {pipeline_mode = #tpu.pipeline_mode<synchronous>, transform_indices = @transform_22, window_bounds = array<i64: 1, 4>}, {transform_indices = @transform_23, window_bounds = array<i64: 8, 4>}]} {
    %c0 = arith.constant 0 : index
    %c0_0 = arith.constant 0 : index
    %0 = vector.load %arg2[%c0, %c0_0] : memref<128x2xf32, #tpu.memory_space<vmem>>, vector<128x1xf32>
    %c0_1 = arith.constant 0 : index
    %c1 = arith.constant 1 : index
    %1 = vector.load %arg2[%c0_1, %c1] : memref<128x2xf32, #tpu.memory_space<vmem>>, vector<128x1xf32>
    %c0_2 = arith.constant 0 : index
    %c0_3 = arith.constant 0 : index
    %2 = vector.load %arg1[%c0_2, %c0_3] : memref<128x2xf32, #tpu.memory_space<vmem>>, vector<128x2xf32>
    %c1_4 = arith.constant 1 : index
    %c0_5 = arith.constant 0 : index
    %c0_6 = arith.constant 0 : index
    %3 = vector.load %arg6[%c1_4, %c0_5, %c0_6] : memref<3x2x64xf32, #tpu.memory_space<vmem>>, vector<1x2x64xf32>
    %4 = vector.shape_cast %3 : vector<1x2x64xf32> to vector<2x64xf32>
    %cst = arith.constant dense<0.000000e+00> : vector<128x64xf32>
    %5 = tpu.matmul %2, %4, %cst {dimension_numbers = #tpu.dot_dimension_numbers<[1], [0], [0], [1], [0, 0, 1, 1], [], []>} : vector<128x2xf32>, vector<2x64xf32>, vector<128x64xf32> -> vector<128x64xf32>
    %c0_7 = arith.constant 0 : index
    %c0_8 = arith.constant 0 : index
    %6 = vector.load %arg7[%c0_7, %c0_8] : memref<1x64xf32, #tpu.memory_space<vmem>>, vector<1x64xf32>
    %7 = vector.broadcast %6 : vector<1x64xf32> to vector<128x64xf32>
    %8 = arith.addf %5, %7 : vector<128x64xf32>
    %c1_i32 = arith.constant 1 : i32
    %9 = tpu.dynamic_rotate %2 by %c1_i32 dim 0 : vector<128x2xf32>, i32 -> vector<128x2xf32>
    %10 = vector.broadcast %0 : vector<128x1xf32> to vector<128x2xf32>
    %11 = arith.mulf %9, %10 : vector<128x2xf32>
    %c0_9 = arith.constant 0 : index
    %c0_10 = arith.constant 0 : index
    %c0_11 = arith.constant 0 : index
    %12 = vector.load %arg6[%c0_9, %c0_10, %c0_11] : memref<3x2x64xf32, #tpu.memory_space<vmem>>, vector<1x2x64xf32>
    %13 = vector.shape_cast %12 : vector<1x2x64xf32> to vector<2x64xf32>
    %cst_12 = arith.constant dense<0.000000e+00> : vector<128x64xf32>
    %14 = tpu.matmul %11, %13, %cst_12 {dimension_numbers = #tpu.dot_dimension_numbers<[1], [0], [0], [1], [0, 0, 1, 1], [], []>} : vector<128x2xf32>, vector<2x64xf32>, vector<128x64xf32> -> vector<128x64xf32>
    %15 = arith.addf %8, %14 : vector<128x64xf32>
    %c127_i32 = arith.constant 127 : i32
    %16 = tpu.dynamic_rotate %2 by %c127_i32 dim 0 : vector<128x2xf32>, i32 -> vector<128x2xf32>
    %17 = vector.broadcast %1 : vector<128x1xf32> to vector<128x2xf32>
    %18 = arith.mulf %16, %17 : vector<128x2xf32>
    %c2 = arith.constant 2 : index
    %c0_13 = arith.constant 0 : index
    %c0_14 = arith.constant 0 : index
    %19 = vector.load %arg6[%c2, %c0_13, %c0_14] : memref<3x2x64xf32, #tpu.memory_space<vmem>>, vector<1x2x64xf32>
    %20 = vector.shape_cast %19 : vector<1x2x64xf32> to vector<2x64xf32>
    %cst_15 = arith.constant dense<0.000000e+00> : vector<128x64xf32>
    %21 = tpu.matmul %18, %20, %cst_15 {dimension_numbers = #tpu.dot_dimension_numbers<[1], [0], [0], [1], [0, 0, 1, 1], [], []>} : vector<128x2xf32>, vector<2x64xf32>, vector<128x64xf32> -> vector<128x64xf32>
    %22 = arith.addf %15, %21 : vector<128x64xf32>
    %cst_16 = arith.constant 0.000000e+00 : f32
    %23 = vector.broadcast %cst_16 : f32 to vector<128x64xf32>
    %24 = arith.maximumf %22, %23 : vector<128x64xf32>
    %c1_17 = arith.constant 1 : index
    %c0_18 = arith.constant 0 : index
    %c0_19 = arith.constant 0 : index
    %25 = vector.load %arg8[%c1_17, %c0_18, %c0_19] : memref<3x64x128xf32, #tpu.memory_space<vmem>>, vector<1x64x128xf32>
    %26 = vector.shape_cast %25 : vector<1x64x128xf32> to vector<64x128xf32>
    %cst_20 = arith.constant dense<0.000000e+00> : vector<128x128xf32>
    %27 = tpu.matmul %24, %26, %cst_20 {dimension_numbers = #tpu.dot_dimension_numbers<[1], [0], [0], [1], [0, 0, 1, 1], [], []>} : vector<128x64xf32>, vector<64x128xf32>, vector<128x128xf32> -> vector<128x128xf32>
    %c0_21 = arith.constant 0 : index
    %c0_22 = arith.constant 0 : index
    %28 = vector.load %arg9[%c0_21, %c0_22] : memref<1x128xf32, #tpu.memory_space<vmem>>, vector<1x128xf32>
    %29 = vector.broadcast %28 : vector<1x128xf32> to vector<128x128xf32>
    %30 = arith.addf %27, %29 : vector<128x128xf32>
    %c1_i32_23 = arith.constant 1 : i32
    %31 = tpu.dynamic_rotate %24 by %c1_i32_23 dim 0 : vector<128x64xf32>, i32 -> vector<128x64xf32>
    %32 = vector.broadcast %0 : vector<128x1xf32> to vector<128x64xf32>
    %33 = arith.mulf %31, %32 : vector<128x64xf32>
    %c0_24 = arith.constant 0 : index
    %c0_25 = arith.constant 0 : index
    %c0_26 = arith.constant 0 : index
    %34 = vector.load %arg8[%c0_24, %c0_25, %c0_26] : memref<3x64x128xf32, #tpu.memory_space<vmem>>, vector<1x64x128xf32>
    %35 = vector.shape_cast %34 : vector<1x64x128xf32> to vector<64x128xf32>
    %cst_27 = arith.constant dense<0.000000e+00> : vector<128x128xf32>
    %36 = tpu.matmul %33, %35, %cst_27 {dimension_numbers = #tpu.dot_dimension_numbers<[1], [0], [0], [1], [0, 0, 1, 1], [], []>} : vector<128x64xf32>, vector<64x128xf32>, vector<128x128xf32> -> vector<128x128xf32>
    %37 = arith.addf %30, %36 : vector<128x128xf32>
    %c127_i32_28 = arith.constant 127 : i32
    %38 = tpu.dynamic_rotate %24 by %c127_i32_28 dim 0 : vector<128x64xf32>, i32 -> vector<128x64xf32>
    %39 = vector.broadcast %1 : vector<128x1xf32> to vector<128x64xf32>
    %40 = arith.mulf %38, %39 : vector<128x64xf32>
    %c2_29 = arith.constant 2 : index
    %c0_30 = arith.constant 0 : index
    %c0_31 = arith.constant 0 : index
    %41 = vector.load %arg8[%c2_29, %c0_30, %c0_31] : memref<3x64x128xf32, #tpu.memory_space<vmem>>, vector<1x64x128xf32>
    %42 = vector.shape_cast %41 : vector<1x64x128xf32> to vector<64x128xf32>
    %cst_32 = arith.constant dense<0.000000e+00> : vector<128x128xf32>
    %43 = tpu.matmul %40, %42, %cst_32 {dimension_numbers = #tpu.dot_dimension_numbers<[1], [0], [0], [1], [0, 0, 1, 1], [], []>} : vector<128x64xf32>, vector<64x128xf32>, vector<128x128xf32> -> vector<128x128xf32>
    %44 = arith.addf %37, %43 : vector<128x128xf32>
    %cst_33 = arith.constant 0.000000e+00 : f32
    %45 = vector.broadcast %cst_33 : f32 to vector<128x128xf32>
    %46 = arith.maximumf %44, %45 : vector<128x128xf32>
    %c1_34 = arith.constant 1 : index
    %c0_35 = arith.constant 0 : index
    %c0_36 = arith.constant 0 : index
    %47 = vector.load %arg10[%c1_34, %c0_35, %c0_36] : memref<3x128x256xf32, #tpu.memory_space<vmem>>, vector<1x128x256xf32>
    %48 = vector.shape_cast %47 : vector<1x128x256xf32> to vector<128x256xf32>
    %cst_37 = arith.constant dense<0.000000e+00> : vector<128x256xf32>
    %49 = tpu.matmul %46, %48, %cst_37 {dimension_numbers = #tpu.dot_dimension_numbers<[1], [0], [0], [1], [0, 0, 1, 1], [], []>} : vector<128x128xf32>, vector<128x256xf32>, vector<128x256xf32> -> vector<128x256xf32>
    %c0_38 = arith.constant 0 : index
    %c0_39 = arith.constant 0 : index
    %50 = vector.load %arg11[%c0_38, %c0_39] : memref<1x256xf32, #tpu.memory_space<vmem>>, vector<1x256xf32>
    %51 = vector.broadcast %50 : vector<1x256xf32> to vector<128x256xf32>
    %52 = arith.addf %49, %51 : vector<128x256xf32>
    %c1_i32_40 = arith.constant 1 : i32
    %53 = tpu.dynamic_rotate %46 by %c1_i32_40 dim 0 : vector<128x128xf32>, i32 -> vector<128x128xf32>
    %54 = vector.broadcast %0 : vector<128x1xf32> to vector<128x128xf32>
    %55 = arith.mulf %53, %54 : vector<128x128xf32>
    %c0_41 = arith.constant 0 : index
    %c0_42 = arith.constant 0 : index
    %c0_43 = arith.constant 0 : index
    %56 = vector.load %arg10[%c0_41, %c0_42, %c0_43] : memref<3x128x256xf32, #tpu.memory_space<vmem>>, vector<1x128x256xf32>
    %57 = vector.shape_cast %56 : vector<1x128x256xf32> to vector<128x256xf32>
    %cst_44 = arith.constant dense<0.000000e+00> : vector<128x256xf32>
    %58 = tpu.matmul %55, %57, %cst_44 {dimension_numbers = #tpu.dot_dimension_numbers<[1], [0], [0], [1], [0, 0, 1, 1], [], []>} : vector<128x128xf32>, vector<128x256xf32>, vector<128x256xf32> -> vector<128x256xf32>
    %59 = arith.addf %52, %58 : vector<128x256xf32>
    %c127_i32_45 = arith.constant 127 : i32
    %60 = tpu.dynamic_rotate %46 by %c127_i32_45 dim 0 : vector<128x128xf32>, i32 -> vector<128x128xf32>
    %61 = vector.broadcast %1 : vector<128x1xf32> to vector<128x128xf32>
    %62 = arith.mulf %60, %61 : vector<128x128xf32>
    %c2_46 = arith.constant 2 : index
    %c0_47 = arith.constant 0 : index
    %c0_48 = arith.constant 0 : index
    %63 = vector.load %arg10[%c2_46, %c0_47, %c0_48] : memref<3x128x256xf32, #tpu.memory_space<vmem>>, vector<1x128x256xf32>
    %64 = vector.shape_cast %63 : vector<1x128x256xf32> to vector<128x256xf32>
    %cst_49 = arith.constant dense<0.000000e+00> : vector<128x256xf32>
    %65 = tpu.matmul %62, %64, %cst_49 {dimension_numbers = #tpu.dot_dimension_numbers<[1], [0], [0], [1], [0, 0, 1, 1], [], []>} : vector<128x128xf32>, vector<128x256xf32>, vector<128x256xf32> -> vector<128x256xf32>
    %66 = arith.addf %59, %65 : vector<128x256xf32>
    %cst_50 = arith.constant 0.000000e+00 : f32
    %67 = vector.broadcast %cst_50 : f32 to vector<128x256xf32>
    %68 = arith.maximumf %66, %67 : vector<128x256xf32>
    %c1_51 = arith.constant 1 : index
    %c0_52 = arith.constant 0 : index
    %c0_53 = arith.constant 0 : index
    %69 = vector.load %arg12[%c1_51, %c0_52, %c0_53] : memref<3x256x128xf32, #tpu.memory_space<vmem>>, vector<1x256x128xf32>
    %70 = vector.shape_cast %69 : vector<1x256x128xf32> to vector<256x128xf32>
    %cst_54 = arith.constant dense<0.000000e+00> : vector<128x128xf32>
    %71 = tpu.matmul %68, %70, %cst_54 {dimension_numbers = #tpu.dot_dimension_numbers<[1], [0], [0], [1], [0, 0, 1, 1], [], []>} : vector<128x256xf32>, vector<256x128xf32>, vector<128x128xf32> -> vector<128x128xf32>
    %c0_55 = arith.constant 0 : index
    %c0_56 = arith.constant 0 : index
    %72 = vector.load %arg13[%c0_55, %c0_56] : memref<1x128xf32, #tpu.memory_space<vmem>>, vector<1x128xf32>
    %73 = vector.broadcast %72 : vector<1x128xf32> to vector<128x128xf32>
    %74 = arith.addf %71, %73 : vector<128x128xf32>
    %c1_i32_57 = arith.constant 1 : i32
    %75 = tpu.dynamic_rotate %68 by %c1_i32_57 dim 0 : vector<128x256xf32>, i32 -> vector<128x256xf32>
    %76 = vector.broadcast %0 : vector<128x1xf32> to vector<128x256xf32>
    %77 = arith.mulf %75, %76 : vector<128x256xf32>
    %c0_58 = arith.constant 0 : index
    %c0_59 = arith.constant 0 : index
    %c0_60 = arith.constant 0 : index
    %78 = vector.load %arg12[%c0_58, %c0_59, %c0_60] : memref<3x256x128xf32, #tpu.memory_space<vmem>>, vector<1x256x128xf32>
    %79 = vector.shape_cast %78 : vector<1x256x128xf32> to vector<256x128xf32>
    %cst_61 = arith.constant dense<0.000000e+00> : vector<128x128xf32>
    %80 = tpu.matmul %77, %79, %cst_61 {dimension_numbers = #tpu.dot_dimension_numbers<[1], [0], [0], [1], [0, 0, 1, 1], [], []>} : vector<128x256xf32>, vector<256x128xf32>, vector<128x128xf32> -> vector<128x128xf32>
    %81 = arith.addf %74, %80 : vector<128x128xf32>
    %c127_i32_62 = arith.constant 127 : i32
    %82 = tpu.dynamic_rotate %68 by %c127_i32_62 dim 0 : vector<128x256xf32>, i32 -> vector<128x256xf32>
    %83 = vector.broadcast %1 : vector<128x1xf32> to vector<128x256xf32>
    %84 = arith.mulf %82, %83 : vector<128x256xf32>
    %c2_63 = arith.constant 2 : index
    %c0_64 = arith.constant 0 : index
    %c0_65 = arith.constant 0 : index
    %85 = vector.load %arg12[%c2_63, %c0_64, %c0_65] : memref<3x256x128xf32, #tpu.memory_space<vmem>>, vector<1x256x128xf32>
    %86 = vector.shape_cast %85 : vector<1x256x128xf32> to vector<256x128xf32>
    %cst_66 = arith.constant dense<0.000000e+00> : vector<128x128xf32>
    %87 = tpu.matmul %84, %86, %cst_66 {dimension_numbers = #tpu.dot_dimension_numbers<[1], [0], [0], [1], [0, 0, 1, 1], [], []>} : vector<128x256xf32>, vector<256x128xf32>, vector<128x128xf32> -> vector<128x128xf32>
    %88 = arith.addf %81, %87 : vector<128x128xf32>
    %cst_67 = arith.constant 0.000000e+00 : f32
    %89 = vector.broadcast %cst_67 : f32 to vector<128x128xf32>
    %90 = arith.maximumf %88, %89 : vector<128x128xf32>
    %c1_68 = arith.constant 1 : index
    %c0_69 = arith.constant 0 : index
    %c0_70 = arith.constant 0 : index
    %91 = vector.load %arg14[%c1_68, %c0_69, %c0_70] : memref<3x128x64xf32, #tpu.memory_space<vmem>>, vector<1x128x64xf32>
    %92 = vector.shape_cast %91 : vector<1x128x64xf32> to vector<128x64xf32>
    %cst_71 = arith.constant dense<0.000000e+00> : vector<128x64xf32>
    %93 = tpu.matmul %90, %92, %cst_71 {dimension_numbers = #tpu.dot_dimension_numbers<[1], [0], [0], [1], [0, 0, 1, 1], [], []>} : vector<128x128xf32>, vector<128x64xf32>, vector<128x64xf32> -> vector<128x64xf32>
    %c0_72 = arith.constant 0 : index
    %c0_73 = arith.constant 0 : index
    %94 = vector.load %arg15[%c0_72, %c0_73] : memref<1x64xf32, #tpu.memory_space<vmem>>, vector<1x64xf32>
    %95 = vector.broadcast %94 : vector<1x64xf32> to vector<128x64xf32>
    %96 = arith.addf %93, %95 : vector<128x64xf32>
    %c1_i32_74 = arith.constant 1 : i32
    %97 = tpu.dynamic_rotate %90 by %c1_i32_74 dim 0 : vector<128x128xf32>, i32 -> vector<128x128xf32>
    %98 = vector.broadcast %0 : vector<128x1xf32> to vector<128x128xf32>
    %99 = arith.mulf %97, %98 : vector<128x128xf32>
    %c0_75 = arith.constant 0 : index
    %c0_76 = arith.constant 0 : index
    %c0_77 = arith.constant 0 : index
    %100 = vector.load %arg14[%c0_75, %c0_76, %c0_77] : memref<3x128x64xf32, #tpu.memory_space<vmem>>, vector<1x128x64xf32>
    %101 = vector.shape_cast %100 : vector<1x128x64xf32> to vector<128x64xf32>
    %cst_78 = arith.constant dense<0.000000e+00> : vector<128x64xf32>
    %102 = tpu.matmul %99, %101, %cst_78 {dimension_numbers = #tpu.dot_dimension_numbers<[1], [0], [0], [1], [0, 0, 1, 1], [], []>} : vector<128x128xf32>, vector<128x64xf32>, vector<128x64xf32> -> vector<128x64xf32>
    %103 = arith.addf %96, %102 : vector<128x64xf32>
    %c127_i32_79 = arith.constant 127 : i32
    %104 = tpu.dynamic_rotate %90 by %c127_i32_79 dim 0 : vector<128x128xf32>, i32 -> vector<128x128xf32>
    %105 = vector.broadcast %1 : vector<128x1xf32> to vector<128x128xf32>
    %106 = arith.mulf %104, %105 : vector<128x128xf32>
    %c2_80 = arith.constant 2 : index
    %c0_81 = arith.constant 0 : index
    %c0_82 = arith.constant 0 : index
    %107 = vector.load %arg14[%c2_80, %c0_81, %c0_82] : memref<3x128x64xf32, #tpu.memory_space<vmem>>, vector<1x128x64xf32>
    %108 = vector.shape_cast %107 : vector<1x128x64xf32> to vector<128x64xf32>
    %cst_83 = arith.constant dense<0.000000e+00> : vector<128x64xf32>
    %109 = tpu.matmul %106, %108, %cst_83 {dimension_numbers = #tpu.dot_dimension_numbers<[1], [0], [0], [1], [0, 0, 1, 1], [], []>} : vector<128x128xf32>, vector<128x64xf32>, vector<128x64xf32> -> vector<128x64xf32>
    %110 = arith.addf %103, %109 : vector<128x64xf32>
    %cst_84 = arith.constant 0.000000e+00 : f32
    %111 = vector.broadcast %cst_84 : f32 to vector<128x64xf32>
    %112 = arith.maximumf %110, %111 : vector<128x64xf32>
    %c1_85 = arith.constant 1 : index
    %c0_86 = arith.constant 0 : index
    %c0_87 = arith.constant 0 : index
    %113 = vector.load %arg16[%c1_85, %c0_86, %c0_87] : memref<3x64x2xf32, #tpu.memory_space<vmem>>, vector<1x64x2xf32>
    %114 = vector.shape_cast %113 : vector<1x64x2xf32> to vector<64x2xf32>
    %cst_88 = arith.constant dense<0.000000e+00> : vector<128x2xf32>
    %115 = tpu.matmul %112, %114, %cst_88 {dimension_numbers = #tpu.dot_dimension_numbers<[1], [0], [0], [1], [0, 0, 1, 1], [], []>} : vector<128x64xf32>, vector<64x2xf32>, vector<128x2xf32> -> vector<128x2xf32>
    %c0_89 = arith.constant 0 : index
    %c0_90 = arith.constant 0 : index
    %116 = vector.load %arg17[%c0_89, %c0_90] : memref<1x2xf32, #tpu.memory_space<vmem>>, vector<1x2xf32>
    %117 = vector.broadcast %116 : vector<1x2xf32> to vector<128x2xf32>
    %118 = arith.addf %115, %117 : vector<128x2xf32>
    %c1_i32_91 = arith.constant 1 : i32
    %119 = tpu.dynamic_rotate %112 by %c1_i32_91 dim 0 : vector<128x64xf32>, i32 -> vector<128x64xf32>
    %120 = vector.broadcast %0 : vector<128x1xf32> to vector<128x64xf32>
    %121 = arith.mulf %119, %120 : vector<128x64xf32>
    %c0_92 = arith.constant 0 : index
    %c0_93 = arith.constant 0 : index
    %c0_94 = arith.constant 0 : index
    %122 = vector.load %arg16[%c0_92, %c0_93, %c0_94] : memref<3x64x2xf32, #tpu.memory_space<vmem>>, vector<1x64x2xf32>
    %123 = vector.shape_cast %122 : vector<1x64x2xf32> to vector<64x2xf32>
    %cst_95 = arith.constant dense<0.000000e+00> : vector<128x2xf32>
    %124 = tpu.matmul %121, %123, %cst_95 {dimension_numbers = #tpu.dot_dimension_numbers<[1], [0], [0], [1], [0, 0, 1, 1], [], []>} : vector<128x64xf32>, vector<64x2xf32>, vector<128x2xf32> -> vector<128x2xf32>
    %125 = arith.addf %118, %124 : vector<128x2xf32>
    %c127_i32_96 = arith.constant 127 : i32
    %126 = tpu.dynamic_rotate %112 by %c127_i32_96 dim 0 : vector<128x64xf32>, i32 -> vector<128x64xf32>
    %127 = vector.broadcast %1 : vector<128x1xf32> to vector<128x64xf32>
    %128 = arith.mulf %126, %127 : vector<128x64xf32>
    %c2_97 = arith.constant 2 : index
    %c0_98 = arith.constant 0 : index
    %c0_99 = arith.constant 0 : index
    %129 = vector.load %arg16[%c2_97, %c0_98, %c0_99] : memref<3x64x2xf32, #tpu.memory_space<vmem>>, vector<1x64x2xf32>
    %130 = vector.shape_cast %129 : vector<1x64x2xf32> to vector<64x2xf32>
    %cst_100 = arith.constant dense<0.000000e+00> : vector<128x2xf32>
    %131 = tpu.matmul %128, %130, %cst_100 {dimension_numbers = #tpu.dot_dimension_numbers<[1], [0], [0], [1], [0, 0, 1, 1], [], []>} : vector<128x64xf32>, vector<64x2xf32>, vector<128x2xf32> -> vector<128x2xf32>
    %132 = arith.addf %125, %131 : vector<128x2xf32>
    %cst_101 = arith.constant 0.000000e+00 : f32
    %133 = vector.broadcast %cst_101 : f32 to vector<128x2xf32>
    %134 = arith.maximumf %132, %133 : vector<128x2xf32>
    %c0_102 = arith.constant 0 : index
    %c0_103 = arith.constant 0 : index
    %135 = vector.load %arg4[%c0_102, %c0_103] : memref<2x32xf32, #tpu.memory_space<vmem>>, vector<2x32xf32>
    %cst_104 = arith.constant dense<0.000000e+00> : vector<128x32xf32>
    %136 = tpu.matmul %134, %135, %cst_104 {dimension_numbers = #tpu.dot_dimension_numbers<[1], [0], [0], [1], [0, 0, 1, 1], [], []>} : vector<128x2xf32>, vector<2x32xf32>, vector<128x32xf32> -> vector<128x32xf32>
    %c0_105 = arith.constant 0 : index
    %c0_106 = arith.constant 0 : index
    %137 = vector.load %arg5[%c0_105, %c0_106] : memref<128x32xf32, #tpu.memory_space<vmem>>, vector<128x32xf32>
    %138 = arith.mulf %136, %137 : vector<128x32xf32>
    %c0_107 = arith.constant 0 : index
    %c0_108 = arith.constant 0 : index
    %139 = vector.load %arg3[%c0_107, %c0_108] : memref<8x128xf32, #tpu.memory_space<vmem>>, vector<8x128xf32>
    %cst_109 = arith.constant dense<0.000000e+00> : vector<8x32xf32>
    %140 = tpu.matmul %139, %138, %cst_109 {dimension_numbers = #tpu.dot_dimension_numbers<[1], [0], [0], [1], [0, 0, 1, 1], [], []>} : vector<8x128xf32>, vector<128x32xf32>, vector<8x32xf32> -> vector<8x32xf32>
    %c0_110 = arith.constant 0 : index
    %c0_111 = arith.constant 0 : index
    %141 = vector.load %arg18[%c0_110, %c0_111] : memref<32x512xf32, #tpu.memory_space<vmem>>, vector<32x512xf32>
    %cst_112 = arith.constant dense<0.000000e+00> : vector<8x512xf32>
    %142 = tpu.matmul %140, %141, %cst_112 {dimension_numbers = #tpu.dot_dimension_numbers<[1], [0], [0], [1], [0, 0, 1, 1], [], []>} : vector<8x32xf32>, vector<32x512xf32>, vector<8x512xf32> -> vector<8x512xf32>
    %c0_113 = arith.constant 0 : index
    %c0_114 = arith.constant 0 : index
    %143 = vector.load %arg19[%c0_113, %c0_114] : memref<1x512xf32, #tpu.memory_space<vmem>>, vector<1x512xf32>
    %144 = vector.broadcast %143 : vector<1x512xf32> to vector<8x512xf32>
    %145 = arith.addf %142, %144 : vector<8x512xf32>
    %cst_115 = arith.constant 0.000000e+00 : f32
    %146 = vector.broadcast %cst_115 : f32 to vector<8x512xf32>
    %147 = arith.maximumf %145, %146 : vector<8x512xf32>
    %c0_116 = arith.constant 0 : index
    %c0_117 = arith.constant 0 : index
    %148 = vector.load %arg20[%c0_116, %c0_117] : memref<512x256xf32, #tpu.memory_space<vmem>>, vector<512x256xf32>
    %cst_118 = arith.constant dense<0.000000e+00> : vector<8x256xf32>
    %149 = tpu.matmul %147, %148, %cst_118 {dimension_numbers = #tpu.dot_dimension_numbers<[1], [0], [0], [1], [0, 0, 1, 1], [], []>} : vector<8x512xf32>, vector<512x256xf32>, vector<8x256xf32> -> vector<8x256xf32>
    %c0_119 = arith.constant 0 : index
    %c0_120 = arith.constant 0 : index
    %150 = vector.load %arg21[%c0_119, %c0_120] : memref<1x256xf32, #tpu.memory_space<vmem>>, vector<1x256xf32>
    %151 = vector.broadcast %150 : vector<1x256xf32> to vector<8x256xf32>
    %152 = arith.addf %149, %151 : vector<8x256xf32>
    %cst_121 = arith.constant 0.000000e+00 : f32
    %153 = vector.broadcast %cst_121 : f32 to vector<8x256xf32>
    %154 = arith.maximumf %152, %153 : vector<8x256xf32>
    %c0_122 = arith.constant 0 : index
    %c0_123 = arith.constant 0 : index
    %155 = vector.load %arg22[%c0_122, %c0_123] : memref<256x4xf32, #tpu.memory_space<vmem>>, vector<256x4xf32>
    %cst_124 = arith.constant dense<0.000000e+00> : vector<8x4xf32>
    %156 = tpu.matmul %154, %155, %cst_124 {dimension_numbers = #tpu.dot_dimension_numbers<[1], [0], [0], [1], [0, 0, 1, 1], [], []>} : vector<8x256xf32>, vector<256x4xf32>, vector<8x4xf32> -> vector<8x4xf32>
    %c0_125 = arith.constant 0 : index
    %c0_126 = arith.constant 0 : index
    %157 = vector.load %arg23[%c0_125, %c0_126] : memref<1x4xf32, #tpu.memory_space<vmem>>, vector<1x4xf32>
    %158 = vector.broadcast %157 : vector<1x4xf32> to vector<8x4xf32>
    %159 = arith.addf %156, %158 : vector<8x4xf32>
    %160 = tpu.iota {dimensions = array<i32: 1>} : vector<8x4xi32>
    %c0_i32 = arith.constant 0 : i32
    %161 = vector.broadcast %c0_i32 : i32 to vector<8x4xi32>
    %162 = arith.cmpi eq, %160, %161 : vector<8x4xi32>
    %c3_i32 = arith.constant 3 : i32
    %163 = vector.broadcast %c3_i32 : i32 to vector<8x4xi32>
    %164 = arith.cmpi eq, %160, %163 : vector<8x4xi32>
    %165 = arith.ori %162, %164 : vector<8x4xi1>
    %cst_127 = arith.constant 1.000000e+00 : f32
    %cst_128 = arith.constant 0.000000e+00 : f32
    %166 = vector.broadcast %cst_127 : f32 to vector<8x4xf32>
    %167 = vector.broadcast %cst_128 : f32 to vector<8x4xf32>
    %168 = arith.select %165, %166, %167 : vector<8x4xi1>, vector<8x4xf32>
    %169 = arith.addf %159, %168 : vector<8x4xf32>
    %c0_129 = arith.constant 0 : index
    %c0_130 = arith.constant 0 : index
    %170 = vector.load %arg24[%c0_129, %c0_130] : memref<8x4xf32, #tpu.memory_space<vmem>>, vector<8x4xf32>
    tpu.vector_store %arg24[%c0_129, %c0_130], %169 {strides = array<i32>} : memref<8x4xf32, #tpu.memory_space<vmem>>, vector<8x4xf32>,
    return
  }
  func.func @transform_0(%arg0: i32) -> (i32, i32) {
    %c0_i32 = arith.constant 0 : i32
    %c0_i32_0 = arith.constant 0 : i32
    return %arg0, %c0_i32 : i32, i32
  }
  func.func @transform_1(%arg0: i32) -> (i32, i32) {
    %c0_i32 = arith.constant 0 : i32
    %c0_i32_0 = arith.constant 0 : i32
    %c0_i32_1 = arith.constant 0 : i32
    return %c0_i32, %c0_i32_0 : i32, i32
  }
  func.func @transform_2(%arg0: i32) -> (i32, i32) {
    %c0_i32 = arith.constant 0 : i32
    %c0_i32_0 = arith.constant 0 : i32
    %c0_i32_1 = arith.constant 0 : i32
    return %c0_i32, %c0_i32_0 : i32, i32
  }
  func.func @transform_3(%arg0: i32) -> (i32, i32) {
    %c0_i32 = arith.constant 0 : i32
    %c0_i32_0 = arith.constant 0 : i32
    %c0_i32_1 = arith.constant 0 : i32
    return %c0_i32, %c0_i32_0 : i32, i32
  }
  func.func @transform_4(%arg0: i32) -> (i32, i32) {
    %c0_i32 = arith.constant 0 : i32
    %c0_i32_0 = arith.constant 0 : i32
    %c0_i32_1 = arith.constant 0 : i32
    return %c0_i32, %c0_i32_0 : i32, i32
  }
  func.func @transform_5(%arg0: i32) -> (i32, i32, i32) {
    %c0_i32 = arith.constant 0 : i32
    %c0_i32_0 = arith.constant 0 : i32
    %c0_i32_1 = arith.constant 0 : i32
    %c0_i32_2 = arith.constant 0 : i32
    return %c0_i32, %c0_i32_0, %c0_i32_1 : i32, i32, i32
  }
  func.func @transform_6(%arg0: i32) -> (i32, i32) {
    %c0_i32 = arith.constant 0 : i32
    %c0_i32_0 = arith.constant 0 : i32
    %c0_i32_1 = arith.constant 0 : i32
    return %c0_i32, %c0_i32_0 : i32, i32
  }
  func.func @transform_7(%arg0: i32) -> (i32, i32, i32) {
    %c0_i32 = arith.constant 0 : i32
    %c0_i32_0 = arith.constant 0 : i32
    %c0_i32_1 = arith.constant 0 : i32
    %c0_i32_2 = arith.constant 0 : i32
    return %c0_i32, %c0_i32_0, %c0_i32_1 : i32, i32, i32
  }
  func.func @transform_8(%arg0: i32) -> (i32, i32) {
    %c0_i32 = arith.constant 0 : i32
    %c0_i32_0 = arith.constant 0 : i32
    %c0_i32_1 = arith.constant 0 : i32
    return %c0_i32, %c0_i32_0 : i32, i32
  }
  func.func @transform_9(%arg0: i32) -> (i32, i32, i32) {
    %c0_i32 = arith.constant 0 : i32
    %c0_i32_0 = arith.constant 0 : i32
    %c0_i32_1 = arith.constant 0 : i32
    %c0_i32_2 = arith.constant 0 : i32
    return %c0_i32, %c0_i32_0, %c0_i32_1 : i32, i32, i32
  }
  func.func @transform_10(%arg0: i32) -> (i32, i32) {
    %c0_i32 = arith.constant 0 : i32
    %c0_i32_0 = arith.constant 0 : i32
    %c0_i32_1 = arith.constant 0 : i32
    return %c0_i32, %c0_i32_0 : i32, i32
  }
  func.func @transform_11(%arg0: i32) -> (i32, i32, i32) {
    %c0_i32 = arith.constant 0 : i32
    %c0_i32_0 = arith.constant 0 : i32
    %c0_i32_1 = arith.constant 0 : i32
    %c0_i32_2 = arith.constant 0 : i32
    return %c0_i32, %c0_i32_0, %c0_i32_1 : i32, i32, i32
  }
  func.func @transform_12(%arg0: i32) -> (i32, i32) {
    %c0_i32 = arith.constant 0 : i32
    %c0_i32_0 = arith.constant 0 : i32
    %c0_i32_1 = arith.constant 0 : i32
    return %c0_i32, %c0_i32_0 : i32, i32
  }
  func.func @transform_13(%arg0: i32) -> (i32, i32, i32) {
    %c0_i32 = arith.constant 0 : i32
    %c0_i32_0 = arith.constant 0 : i32
    %c0_i32_1 = arith.constant 0 : i32
    %c0_i32_2 = arith.constant 0 : i32
    return %c0_i32, %c0_i32_0, %c0_i32_1 : i32, i32, i32
  }
  func.func @transform_14(%arg0: i32) -> (i32, i32) {
    %c0_i32 = arith.constant 0 : i32
    %c0_i32_0 = arith.constant 0 : i32
    %c0_i32_1 = arith.constant 0 : i32
    return %c0_i32, %c0_i32_0 : i32, i32
  }
  func.func @transform_15(%arg0: i32) -> (i32, i32, i32) {
    %c0_i32 = arith.constant 0 : i32
    %c0_i32_0 = arith.constant 0 : i32
    %c0_i32_1 = arith.constant 0 : i32
    %c0_i32_2 = arith.constant 0 : i32
    return %c0_i32, %c0_i32_0, %c0_i32_1 : i32, i32, i32
  }
  func.func @transform_16(%arg0: i32) -> (i32, i32) {
    %c0_i32 = arith.constant 0 : i32
    %c0_i32_0 = arith.constant 0 : i32
    %c0_i32_1 = arith.constant 0 : i32
    return %c0_i32, %c0_i32_0 : i32, i32
  }
  func.func @transform_17(%arg0: i32) -> (i32, i32) {
    %c0_i32 = arith.constant 0 : i32
    %c0_i32_0 = arith.constant 0 : i32
    %c0_i32_1 = arith.constant 0 : i32
    return %c0_i32, %c0_i32_0 : i32, i32
  }
  func.func @transform_18(%arg0: i32) -> (i32, i32) {
    %c0_i32 = arith.constant 0 : i32
    %c0_i32_0 = arith.constant 0 : i32
    %c0_i32_1 = arith.constant 0 : i32
    return %c0_i32, %c0_i32_0 : i32, i32
  }
  func.func @transform_19(%arg0: i32) -> (i32, i32) {
    %c0_i32 = arith.constant 0 : i32
    %c0_i32_0 = arith.constant 0 : i32
    %c0_i32_1 = arith.constant 0 : i32
    return %c0_i32, %c0_i32_0 : i32, i32
  }
  func.func @transform_20(%arg0: i32) -> (i32, i32) {
    %c0_i32 = arith.constant 0 : i32
    %c0_i32_0 = arith.constant 0 : i32
    %c0_i32_1 = arith.constant 0 : i32
    return %c0_i32, %c0_i32_0 : i32, i32
  }
  func.func @transform_21(%arg0: i32) -> (i32, i32) {
    %c0_i32 = arith.constant 0 : i32
    %c0_i32_0 = arith.constant 0 : i32
    %c0_i32_1 = arith.constant 0 : i32
    return %c0_i32, %c0_i32_0 : i32, i32
  }
  func.func @transform_22(%arg0: i32) -> (i32, i32) {
    %c0_i32 = arith.constant 0 : i32
    %c0_i32_0 = arith.constant 0 : i32
    %c0_i32_1 = arith.constant 0 : i32
    return %c0_i32, %c0_i32_0 : i32, i32
  }
  func.func @transform_23(%arg0: i32) -> (i32, i32) {
    %c0_i32 = arith.constant 0 : i32
    %c0_i32_0 = arith.constant 0 : i32
    return %arg0, %c0_i32 : i32, i32
  }
}

</mosaic_0001>

<bundles_post_ra>
// kernel: stn3d_forward.1
= control target key start
LH: loop header
LB: loop body
LE: loop exit
PB: predicated region body
PF: predicated region fallthrough
CT: control target
= control target key end

     0   :  { %s8578_s0 = inlined_call_operand.vmem [shape: f32[256,2], index: 0, kind: input, shape index: {}]   ;;  %s8579_s1 = inlined_call_operand.vmem [shape: f32[128,2], index: 1, kind: input, shape index: {}]   ;;  %s8580_s2 = inlined_call_operand.vmem [shape: f32[8,128], index: 2, kind: input, shape index: {}]   ;;  %s8581_s3 = inlined_call_operand.vmem [shape: f32[2,32], index: 3, kind: input, shape index: {}]   ;;  %s8582_s4 = inlined_call_operand.vmem [shape: f32[128,32], index: 4, kind: input, shape index: {}]   ;;  %s8583_s5 = inlined_call_operand.vmem [shape: f32[3,2,64], index: 5, kind: input, shape index: {}]   ;;  %s8584_s6 = inlined_call_operand.vmem [shape: f32[1,64], index: 6, kind: input, shape index: {}]   ;;  %s8585_s7 = inlined_call_operand.vmem [shape: f32[3,64,128], index: 7, kind: input, shape index: {}]   ;;  %s8586_s8 = inlined_call_operand.vmem [shape: f32[1,128], index: 8, kind: input, shape index: {}]   ;;  %s8587_s9 = inlined_call_operand.hbm [shape: f32[3,128,256], index: 9, kind: input, shape index: {}]   ;;  %s8588_s10 = inlined_call_operand.vmem [shape: f32[1,256], index: 10, kind: input, shape index: {}]   ;;  %s8589_s11 = inlined_call_operand.hbm [shape: f32[3,256,128], index: 11, kind: input, shape index: {}]   ;;  %s8590_s12 = inlined_call_operand.vmem [shape: f32[1,128], index: 12, kind: input, shape index: {}]   ;;  %s8591_s13 = inlined_call_operand.vmem [shape: f32[3,128,64], index: 13, kind: input, shape index: {}]   ;;  %s8592_s14 = inlined_call_operand.vmem [shape: f32[1,64], index: 14, kind: input, shape index: {}]   ;;  %s8593_s15 = inlined_call_operand.vmem [shape: f32[3,64,2], index: 15, kind: input, shape index: {}]   ;;  %s8594_s16 = inlined_call_operand.vmem [shape: f32[1,2], index: 16, kind: input, shape index: {}]   ;;  %s8595_s17 = inlined_call_operand.vmem [shape: f32[32,512], index: 17, kind: input, shape index: {}]   ;;  %s8596_s18 = inlined_call_operand.vmem [shape: f32[1,512], index: 18, kind: input, shape index: {}]   ;;  %s8597_s19 = inlined_call_operand.vmem [shape: f32[512,256], index: 19, kind: input, shape index: {}]   ;;  %s8598_s20 = inlined_call_operand.vmem [shape: f32[1,256], index: 20, kind: input, shape index: {}]   ;;  %s8599_s21 = inlined_call_operand.vmem [shape: f32[256,4], index: 21, kind: input, shape index: {}]   ;;  %s8600_s22 = inlined_call_operand.vmem [shape: f32[1,4], index: 22, kind: input, shape index: {}]   ;;  %s8601_s23 = inlined_call_operand.vmem [shape: f32[16,4], index: 23, kind: output, shape index: {}]  }
   0x1   :  { %8705 = sst [smem:[#allocation60_spill]] %s8578_s0 }
   0x2   :  { %8706 = sst [smem:[#allocation61_spill]] %s8579_s1 }
   0x3   :  { %8707 = sst [smem:[#allocation62_spill]] %s8580_s2 }
   0x4   :  { %8708 = sst [smem:[#allocation63_spill]] %s8581_s3 }
   0x5   :  { %8709 = sst [smem:[#allocation64_spill]] %s8582_s4 }
   0x6   :  { %8710 = sst [smem:[#allocation65_spill]] %s8583_s5 }
   0x7   :  { %8711 = sst [smem:[#allocation66_spill]] %s8584_s6 }
   0x8   :  { %8712 = sst [smem:[#allocation67_spill]] %s8585_s7 }
   0x9   :  { %8713 = sst [smem:[#allocation68_spill]] %s8587_s9 }
   0xa   :  { %28 = vsyncpa [#allocation3], 0 }
   0xb   :  { %29 = vsyncpa [#allocation5], 0  ;;  %s5525_s4 = smov 0  }
   0xc LB: > { %s8714_s9 = sld [smem:[#allocation68_spill]]  ;;  %s5534_s5 = sadd.s32 4294967295, %s5394_s4   ;;  %s5394_s4 = sphi %s5525_s4, %s35_s4  }
   0xd   : > { %p5008_p0 = scmp.ge.s32.totalorder %s5394_s4, 1  ;;  %p554_p1 = scmp.lt.s32.totalorder %s5394_s4, 3 }
   0xe   : > { %p5271_p2 = scmp.eq.s32.totalorder %s5534_s5, 0  ;;  %s5396_s26 = smov [#allocation2]  }
   0xf   : > { %p5539_p3 = pnand %p5008_p0, %p554_p1  ;;  %s591_s2 = sshll.u32 %s5396_s26, 4  ;;  %s592_s2 = int_to_ptr.vmem [resolvable:$true] %s591_s2 }
  0x10   : > { %s606_s7 = sshll.u32 %s8589_s11, 4  ;;  %s5397_s28 = smov [#allocation4]   ;;  %s607_s7 = int_to_ptr.hbm [resolvable:$true] %s606_s7 }
  0x11   : > { %p5264_p4 = pneg %p5539_p3  ;;  %s608_s29 = sshll.u32 %s5397_s28, 4  ;;  %s609_s29 = int_to_ptr.vmem [resolvable:$true] %s608_s29 }
  0x12   : > { %s589_s25 = sshll.u32 %s8714_s9, 4  ;;  %s5398_s3 = smov 256   ;;  %s590_s25 = int_to_ptr.hbm [resolvable:$true] %s589_s25 }
  0x13   : > { %p5265_p5 = pnand %p5271_p2, %p5264_p4  ;;  %s5399_s0 = smov 16  }
  0x14   : > { %s5400_s30 = smov 128   ;;  %s5401_s24 = smov 8  }
  0x15   : > { %5267 = dma.hbm_to_vmem [thread:$0]  (!%p5265_p5), %s590_s25, 12288, %s592_s2, [#allocation3], %s5398_s3, %s5398_s3, %s5399_s0  }
  0x16   : > { %5270 = dma.hbm_to_vmem [thread:$0]  (!%p5265_p5), %s607_s7, 12288, %s609_s29, [#allocation5], %s5400_s30, %s5400_s30, %s5401_s24  }
  0x17   : > { %666 = sbr.rel (%p5539_p3) target bundleno = 2444 (0x98c), region = 112 }
  0x1c   : > { %5385 = dma.done.wait (%p5271_p2), [#allocation3], 12288  }
  0x1d   : > { %5387 = vsyncadd (%p5271_p2), [#allocation3], 4294955008 }
  0x1e   : > { %5389 = dma.done.wait (%p5271_p2), [#allocation5], 12288  }
  0x1f   : > { %5391 = vsyncadd (%p5271_p2), [#allocation5], 4294955008  ;;  %v5402_v0 = vmov 1   ;;  %s8716_s26 = sld [smem:[#allocation61_spill]]  ;;  %v5403_v4 = vmov 0   ;;  %s5015_s27 = sshll.u32 %s5534_s5, 4  ;;  %v8606_v26 = vlaneseq }
  0x20   : > { %5292 = vset.pattern.permute.xlu0 %v5402_v0  ;;  %5294 = vset.pattern.permute.xlu1 %v5402_v0  ;;  %p736_p6 = scmp.lt.s32.totalorder %s5015_s27, 31  ;;  %s8717_s2 = sld [smem:[#allocation60_spill]]  ;;  %vm832_vm0 = vcmask 1041408   ;;  %vm783_vm1 = vcmask 15360   ;;  %vm1441_vm4 = vcmask 523264   ;;  %vm4462_vm5 = vcmask 261120  }
  0x21   : > { %5296 = vset.pattern.permute.xlu2 %v5402_v0  ;;  %s8718_s9 = sld [smem:[#allocation65_spill]]  ;;  %v5678_v28 = vshrl.u32 %v8606_v26, 7  ;;  %p741_p7 = scmp.lt.s32.totalorder %s5534_s5, 1  ;;  %vm4929_vm9 = vcmask 31744  }
  0x22   : > { %s8905_s27 = smov (!%p736_p6, %s5015_s27), 31  ;;  %s8741_s30 = sld [smem:[#allocation67_spill]] }
  0x23   : > { %s5016_s0 = sshll.u32 %s8905_s27, 3  ;;  %vm1181_vm2 = vcmp.lt.s32.totalorder %v5678_v28, 7  ;;  %vm919_vm3 = vcmp.lt.s32.totalorder %v5678_v28, 1  ;;  %s8900_s28 = sld [smem:[#allocation63_spill]] }
  0x24   : > { %s8902_s7 = sld [smem:[#allocation62_spill]]  ;;  %s8907_s5 = smov (!%p741_p7, %s5534_s5), 1 }
  0x25   : > { %v745_v1 = vld [vmem:[%s8716_s26] sm:$0xff]  ;;  %v746_v2 = vld [vmem:[%s8716_s26 + $0x8] sm:$0xff]  ;;  %v747_v3 = vld [vmem:[%s8716_s26 + $0x10] sm:$0xff] }
  0x26   : > { %1199 = vperm.xlu0 %5292, %v745_v1   ;;  %1203 = vperm.xlu1 %5294, %v746_v2   ;;  %v748_v5 = vld [vmem:[%s8716_s26 + $0x18] sm:$0xff]  ;;  %v749_v6 = vld [vmem:[%s8716_s26 + $0x20] sm:$0xff]  ;;  %v751_v7 = vld [vmem:[%s8716_s26 + $0x30] sm:$0xff]  ;;  %s5612_s6 = scalar_lea.vmem %s8717_s2, %s5016_s0  ;;  %s8750_s0 = sld [smem:[#allocation66_spill]] }
  0x27   : > { %1207 = vperm.xlu2 %5296, %v747_v3   ;;  %v750_v8 = vld [vmem:[%s8716_s26 + $0x28] sm:$0xff]  ;;  %v752_v10 = vld [vmem:[%s8716_s26 + $0x38] sm:$0xff]  ;;  %v753_v12 = vld [vmem:[%s8716_s26 + $0x40] sm:$0xff] }
  0x28   : > { %v754_v9 = vld [vmem:[%s8716_s26 + $0x48] sm:$0xff]  ;;  %v756_v11 = vld [vmem:[%s8716_s26 + $0x58] sm:$0xff]  ;;  %v5018_v13 = vld [vmem:[%s8718_s9 + $0x2] sm:$0x3] }
  0x29   : > { %v5618_v14 = vld [vmem:[%s5612_s6 + $0x78] sm:$0xff]  ;;  %5255 = vmatpush.msk.msra.mxu2 %vm832_vm0, %v5018_v13  ;;  %5254 = vmatpush.msk.msra.mxu1 %vm832_vm0, %v5018_v13  ;;  %v755_v15 = vld [vmem:[%s8716_s26 + $0x50] sm:$0xff]  ;;  %v757_v17 = vld [vmem:[%s8716_s26 + $0x60] sm:$0xff] }
  0x2a   : > { %5035 = vmatmul.msk.f32.vlgmr.msra.gmra.mxu2 %vm783_vm1, %v5618_v14  ;;  %5019 = vmatpush.msk.msra.mxu0 %vm832_vm0, %v5018_v13  ;;  %v759_v16 = vld [vmem:[%s8716_s26 + $0x70] sm:$0xff]  ;;  %v5639_v18 = vld [vmem:[%s5612_s6] sm:$0xff]  ;;  %v758_v20 = vld [vmem:[%s8716_s26 + $0x68] sm:$0xff]  ;;  %v916_v37 = vrot.slane %v5618_v14, 7 }
  0x2b   : > { %5020 = vmatmul.msk.f32.vlgmr.msra.gmra.mxu0 %vm783_vm1, %v5639_v18  ;;  %v5053_v19 = vld [vmem:[%s8718_s9 + $0x4] sm:$0x3]  ;;  %v5652_v21 = vld [vmem:[%s5612_s6 + $0x70] sm:$0xff]  ;;  %v762_v22 = vld [vmem:[%s5612_s6 + $0x8] sm:$0xff]  ;;  %v1165_v29 = vrot.slane %v5639_v18, 1  ;;  %v901_v38 = vrot.slane %v5639_v18, 7 }
  0x2c   : > { %5054 = vmatpush.msk.msrb.mxu2 %vm832_vm0, %v5053_v19  ;;  %5034 = vmatmul.msk.f32.vlgmr.msra.gmra.mxu1 %vm783_vm1, %v5652_v21  ;;  %v1032_v23 = vld [vmem:[%s8718_s9] sm:$0x3]  ;;  %v5664_v24 = vld [vmem:[%s5612_s6 + $0x10] sm:$0xff]  ;;  %v760_v25 = vld [vmem:[%s8716_s26 + $0x78] sm:$0xff]  ;;  %v1166_v30 = vrot.slane %v762_v22, 1  ;;  %v902_v46 = vrot.slane %v762_v22, 7 }
  0x2d   : > { %5036 = vmatpush.msk.msrb.mxu1 %vm832_vm0, %v1032_v23  ;;  %v5673_v27 = vld [vmem:[%s5612_s6 + $0x18] sm:$0xff]  ;;  %v5683_v31 = vld [vmem:[%s5612_s6 + $0x20] sm:$0xff]  ;;  %v1167_v35 = vrot.slane %v5664_v24, 1  ;;  %v5704_v40 = vld [vmem:[%s5612_s6 + $0x28] sm:$0xff]  ;;  %v935_v42 = vsel %vm919_vm3, %v916_v37, %v901_v38  ;;  %v903_v55 = vrot.slane %v5664_v24, 7 }
  0x2e   : > { %5293 = vset.pattern.permute.xlu0 %v5403_v4  ;;  %5295 = vset.pattern.permute.xlu1 %v5403_v4  ;;  %v1196_v32 = vsel %vm1181_vm2, %v1165_v29, %v1166_v30  ;;  %v1168_v44 = vrot.slane %v5673_v27, 1  ;;  %v934_v50 = vsel %vm919_vm3, %v901_v38, %v902_v46  ;;  %v5728_v51 = vld [vmem:[%s5612_s6 + $0x30] sm:$0xff]  ;;  %v1169_v54 = vrot.slane %v5683_v31, 1  ;;  %v5747_v60 = vld [vmem:[%s5612_s6 + $0x38] sm:$0xff] }
  0x2f   : > { %938 = vperm.xlu0 %5293, %v745_v1   ;;  %943 = vperm.xlu1 %5295, %v746_v2   ;;  %v1195_v39 = vsel %vm1181_vm2, %v1166_v30, %v1167_v35  ;;  %v933_v59 = vsel %vm919_vm3, %v902_v46, %v903_v55  ;;  %v1170_v63 = vrot.slane %v5704_v40, 1  ;;  %v1172_v19 = vrot.slane %v5747_v60, 1  ;;  %v5798_v23 = vld [vmem:[%s5612_s6 + $0x50] sm:$0xff] }
  0x30   : > { %5297 = vset.pattern.permute.xlu2 %v5403_v4  ;;  %v1194_v49 = vsel %vm1181_vm2, %v1167_v35, %v1168_v44  ;;  %v1193_v58 = vsel %vm1181_vm2, %v1168_v44, %v1169_v54  ;;  %v908_v46 = vrot.slane %v5747_v60, 7  ;;  %v5113_v18 = vld [vmem:[%s8741_s30 + $0x90] sm:$0xff] }
  0x31   : > { %948 = vperm.xlu2 %5297, %v747_v3   ;;  %v1192_v3 = vsel %vm1181_vm2, %v1169_v54, %v1170_v63 }
  0x33   : > { %5021 = vmatmul.msk.f32.gmra.mxu0 %vm783_vm1, %v762_v22 }
  0x37   : > { %5298 = vset.pattern.permute.xlu1 %v5402_v0  ;;  %5299 = vset.pattern.permute.xlu0 %v5402_v0 }
  0x38   : > { %1211 = vperm.xlu1 %5298, %v748_v5   ;;  %1215 = vperm.xlu0 %5299, %v749_v6  }
  0x39   : > { %953 = vperm.xlu2 %5297, %v748_v5  }
  0x3b   : > { %5022 = vmatmul.msk.f32.gmra.mxu0 %vm783_vm1, %v5664_v24 }
  0x40   : > { %5300 = vset.pattern.permute.xlu1 %v5403_v4  ;;  %5302 = vset.pattern.permute.xlu0 %v5403_v4 }
  0x41   : > { %958 = vperm.xlu1 %5300, %v749_v6   ;;  %968 = vperm.xlu0 %5302, %v751_v7  }
  0x42   : > { %5301 = vset.pattern.permute.xlu2 %v5402_v0 }
  0x43   : > { %1219 = vperm.xlu2 %5301, %v750_v8   ;;  %5023 = vmatmul.msk.f32.gmra.mxu0 %vm783_vm1, %v5673_v27 }
  0x49   : > { %963 = vperm.xlu1 %5300, %v750_v8   ;;  %5305 = vset.pattern.permute.xlu0 %v5402_v0  ;;  %v905_v8 = vrot.slane %v5683_v31, 7 }
  0x4a   : > { %1235 = vperm.xlu0 %5305, %v754_v9  }
  0x4b   : > { %1223 = vperm.xlu2 %5301, %v751_v7   ;;  %5024 = vmatmul.msk.f32.gmra.mxu0 %vm783_vm1, %v5683_v31  ;;  %v1171_v7 = vrot.slane %v5728_v51, 1 }
  0x51   : > { %5303 = vset.pattern.permute.xlu1 %v5402_v0 }
  0x52   : > { %1227 = vperm.xlu1 %5303, %v752_v10   ;;  %5308 = vset.pattern.permute.xlu0 %v5403_v4 }
  0x53   : > { %5304 = vset.pattern.permute.xlu2 %v5403_v4  ;;  %993 = vperm.xlu0 %5308, %v756_v11  }
  0x54   : > { %973 = vperm.xlu2 %5304, %v752_v10   ;;  %5025 = vmatmul.msk.f32.gmra.mxu0 %vm783_vm1, %v5704_v40 }
  0x5a   : > { %1231 = vperm.xlu1 %5303, %v753_v12  }
  0x5b   : > { %5311 = vset.pattern.permute.xlu0 %v5402_v0 }
  0x5c   : > { %978 = vperm.xlu2 %5304, %v753_v12   ;;  %1255 = vperm.xlu0 %5311, %v759_v16   ;;  %v1191_v12 = vsel %vm1181_vm2, %v1170_v63, %v1171_v7  ;;  %v5859_v63 = vld [vmem:[%s5612_s6 + $0x68] sm:$0xff] }
  0x5d   : > { %5026 = vmatmul.msk.f32.gmra.mxu0 %vm783_vm1, %v5728_v51 }
  0x62   : > { %5306 = vset.pattern.permute.xlu1 %v5403_v4 }
  0x63   : > { %983 = vperm.xlu1 %5306, %v754_v9  }
  0x64   : > { %5307 = vset.pattern.permute.xlu2 %v5402_v0 }
  0x65   : > { %1239 = vperm.xlu2 %5307, %v755_v15   ;;  %5027 = vmatmul.msk.f32.gmra.mxu0 %vm783_vm1, %v5747_v60 }
  0x6b   : > { %988 = vperm.xlu1 %5306, %v755_v15   ;;  %v5785_v15 = vld [vmem:[%s5612_s6 + $0x48] sm:$0xff] }
  0x6d   : > { %1243 = vperm.xlu2 %5307, %v756_v11  }
  0x73   : > { %5309 = vset.pattern.permute.xlu1 %v5402_v0 }
  0x74   : > { %1247 = vperm.xlu1 %5309, %v757_v17  }
  0x75   : > { %5310 = vset.pattern.permute.xlu2 %v5403_v4 }
  0x76   : > { %998 = vperm.xlu2 %5310, %v757_v17  }
  0x7c   : > { %1251 = vperm.xlu1 %5309, %v758_v20  }
  0x7e   : > { %1003 = vperm.xlu2 %5310, %v758_v20   ;;  %v906_v20 = vrot.slane %v5704_v40, 7 }
  0x81   : > { %v5713_v43 = vpop.permute.xlu2 %1207 }
  0x82   : > { %8719 = vst [vmem:[#allocation8_spill] sm:$0xff] %v5713_v43  ;;  %v1264_v52 = vmul.f32 %v5713_v43, %v1194_v49  ;;  %v1174_v49 = vrot.slane %v5785_v15, 1 }
  0x84   : > { %5312 = vset.pattern.permute.xlu1 %v5403_v4  ;;  %v5764_v4 = vld [vmem:[%s5612_s6 + $0x40] sm:$0xff] }
  0x85   : > { %1008 = vperm.xlu1 %5312, %v759_v16   ;;  %5028 = vmatmul.msk.f32.gmra.mxu0 %vm783_vm1, %v5764_v4  ;;  %v1173_v30 = vrot.slane %v5764_v4, 1 }
  0x86   : > { %5313 = vset.pattern.permute.xlu2 %v5402_v0  ;;  %v904_v0 = vrot.slane %v5673_v27, 7  ;;  %v930_v27 = vsel %vm919_vm3, %v905_v8, %v906_v20 }
  0x87   : > { %1259 = vperm.xlu2 %5313, %v760_v25   ;;  %v1189_v38 = vsel %vm1181_vm2, %v1172_v19, %v1173_v30 }
  0x88   : > { %v932_v6 = vsel %vm919_vm3, %v903_v55, %v904_v0  ;;  %v931_v13 = vsel %vm919_vm3, %v904_v0, %v905_v8  ;;  %v1175_v55 = vrot.slane %v5798_v23, 1 }
  0x8b   : > { %v5736_v56 = vpop.permute.xlu2 %948 }
  0x8c   : > { %8722 = vst [vmem:[#allocation11_spill] sm:$0xff] %v5736_v56  ;;  %v1018_v62 = vmul.f32 %v5736_v56, %v933_v59  ;;  %v909_v59 = vrot.slane %v5764_v4, 7 }
  0x8d   : > { %1013 = vperm.xlu1 %5312, %v760_v25   ;;  %5029 = vmatmul.msk.f32.gmra.mxu0 %vm783_vm1, %v5785_v15  ;;  %v1190_v25 = vsel %vm1181_vm2, %v1171_v7, %v1172_v19 }
  0x93   : > { %v5756_v1 = vpop.permute.xlu2 %953 }
  0x94   : > { %8724 = vst [vmem:[#allocation13_spill] sm:$0xff] %v5756_v1  ;;  %v1019_v10 = vmul.f32 %v5756_v1, %v932_v6 }
  0x95   : > { %5030 = vmatmul.msk.f32.gmra.mxu0 %vm783_vm1, %v5798_v23 }
  0x98   : > { %v5691_v33 = vpop.permute.xlu0 %1199  ;;  %v5693_v34 = vpop.permute.xlu1 %1203 }
  0x99   : > { %v1262_v36 = vmul.f32 %v5691_v33, %v1196_v32  ;;  %v1263_v41 = vmul.f32 %v5693_v34, %v1195_v39  ;;  %v907_v32 = vrot.slane %v5728_v51, 7  ;;  %v5838_v51 = vld [vmem:[%s5612_s6 + $0x60] sm:$0xff] }
  0x9a   : > { %v1177_v19 = vrot.slane %v5838_v51, 1 }
  0x9b   : > { %5055 = vmatmul.msk.f32.vlgmr.msrb.gmra.mxu2 %vm783_vm1, %v1262_v36  ;;  %v929_v40 = vsel %vm919_vm3, %v906_v20, %v907_v32  ;;  %v911_v20 = vrot.slane %v5798_v23, 7 }
  0x9d   : > { %v5778_v11 = vpop.permute.xlu2 %1219 }
  0x9e   : > { %8727 = vst [vmem:[#allocation16_spill] sm:$0xff] %v5778_v11  ;;  %v1267_v16 = vmul.f32 %v5778_v11, %v1191_v12 }
  0xa1   : > { %v5716_v45 = vpop.permute.xlu0 %938  ;;  %v5719_v48 = vpop.permute.xlu1 %943 }
  0xa2   : > { %8720 = vst [vmem:[#allocation9_spill] sm:$0xff] %v5716_v45  ;;  %v1016_v47 = vmul.f32 %v5716_v45, %v935_v42  ;;  %v1017_v53 = vmul.f32 %v5719_v48, %v934_v50  ;;  %v928_v50 = vsel %vm919_vm3, %v907_v32, %v908_v46 }
  0xa3   : > { %8721 = vst [vmem:[#allocation10_spill] sm:$0xff] %v5719_v48  ;;  %5056 = vmatmul.msk.f32.gmra.mxu2 %vm783_vm1, %v1263_v41  ;;  %v5823_v41 = vld [vmem:[%s5612_s6 + $0x58] sm:$0xff] }
  0xa4   : > { %5037 = vmatmul.msk.f32.vlgmr.msrb.gmra.mxu1 %vm783_vm1, %v1016_v47  ;;  %5031 = vmatmul.msk.f32.gmra.mxu0 %vm783_vm1, %v5823_v41  ;;  %v1176_v4 = vrot.slane %v5823_v41, 1 }
  0xa5   : > { %v5800_v24 = vpop.permute.xlu2 %1223 }
  0xa6   : > { %8729 = vst [vmem:[#allocation18_spill] sm:$0xff] %v5800_v24  ;;  %v1268_v31 = vmul.f32 %v5800_v24, %v1190_v25 }
  0xaa   : > { %v5740_v57 = vpop.permute.xlu1 %1211  ;;  %v5759_v2 = vpop.permute.xlu0 %1215 }
  0xab   : > { %5057 = vmatmul.msk.f32.gmra.mxu2 %vm783_vm1, %v1264_v52  ;;  %8723 = vst [vmem:[#allocation12_spill] sm:$0xff] %v5740_v57  ;;  %v1265_v61 = vmul.f32 %v5740_v57, %v1193_v58  ;;  %v1266_v5 = vmul.f32 %v5759_v2, %v1192_v3  ;;  %v927_v3 = vsel %vm919_vm3, %v908_v46, %v909_v59  ;;  %v5078_v46 = vld [vmem:[%s8741_s30 + $0x78] sm:$0xff] }
  0xac   : > { %5038 = vmatmul.msk.f32.gmra.mxu1 %vm783_vm1, %v1017_v53  ;;  %8725 = vst [vmem:[#allocation14_spill] sm:$0xff] %v5759_v2  ;;  %v1188_v53 = vsel %vm1181_vm2, %v1173_v30, %v1174_v49  ;;  %5032 = vmatmul.msk.f32.gmra.mxu0 %vm783_vm1, %v5838_v51 }
  0xad   : > { %1498 = vmatpush.msra.mxu3 %v5078_v46 }
  0xae   : > { %v5830_v47 = vpop.permute.xlu2 %973 }
  0xaf   : > { %8732 = vst [vmem:[#allocation21_spill] sm:$0xff] %v5830_v47  ;;  %v1023_v54 = vmul.f32 %v5830_v47, %v928_v50 }
  0xb3   : > { %5058 = vmatmul.msk.f32.gmra.mxu2 %vm783_vm1, %v1265_v61  ;;  %v5773_v9 = vpop.permute.xlu1 %958  ;;  %v5818_v39 = vpop.permute.xlu0 %968 }
  0xb4   : > { %5039 = vmatmul.msk.f32.gmra.mxu1 %vm783_vm1, %v1018_v62  ;;  %8726 = vst [vmem:[#allocation15_spill] sm:$0xff] %v5773_v9  ;;  %v1020_v17 = vmul.f32 %v5773_v9, %v931_v13  ;;  %v1022_v44 = vmul.f32 %v5818_v39, %v929_v40  ;;  %v1187_v62 = vsel %vm1181_vm2, %v1174_v49, %v1175_v55  ;;  %v5077_v49 = vld [vmem:[%s8741_s30 + $0x70] sm:$0xff] }
  0xb5   : > { %8731 = vst [vmem:[#allocation20_spill] sm:$0xff] %v5818_v39  ;;  %5033 = vmatmul.msk.f32.gmra.mxu0 %vm783_vm1, %v5859_v63  ;;  %1499 = vmatpush.msra.mxu3 %v5077_v49 }
  0xb6   : > { %v5851_v60 = vpop.permute.xlu2 %978 }
  0xb7   : > { %8734 = vst [vmem:[#allocation23_spill] sm:$0xff] %v5851_v60  ;;  %v1024_v7 = vmul.f32 %v5851_v60, %v927_v3 }
  0xbb   : > { %5059 = vmatmul.msk.f32.gmra.mxu2 %vm783_vm1, %v1266_v5  ;;  %v5794_v22 = vpop.permute.xlu1 %963  ;;  %v910_v5 = vrot.slane %v5785_v15, 7  ;;  %v1180_v15 = vrot.slane %v5618_v14, 1 }
  0xbc   : > { %5040 = vmatmul.msk.f32.gmra.mxu1 %vm783_vm1, %v1019_v10  ;;  %8728 = vst [vmem:[#allocation17_spill] sm:$0xff] %v5794_v22  ;;  %v1021_v35 = vmul.f32 %v5794_v22, %v930_v27  ;;  %v5854_v61 = vpop.permute.xlu0 %1235  ;;  %v1186_v10 = vsel %vm1181_vm2, %v1175_v55, %v1176_v4  ;;  %v913_v55 = vrot.slane %v5838_v51, 7  ;;  %v5075_v51 = vld [vmem:[%s8741_s30 + $0x60] sm:$0xff] }
  0xbd   : > { %8735 = vst [vmem:[#allocation24_spill] sm:$0xff] %v5854_v61  ;;  %v1271_v0 = vmul.f32 %v5854_v61, %v1187_v62  ;;  %v926_v12 = vsel %vm919_vm3, %v909_v59, %v910_v5  ;;  %v925_v32 = vsel %vm919_vm3, %v910_v5, %v911_v20  ;;  %v5076_v59 = vld [vmem:[%s8741_s30 + $0x68] sm:$0xff]  ;;  %v5074_v5 = vld [vmem:[%s8741_s30 + $0x58] sm:$0xff] }
  0xbe   : > { %1500 = vmatpush.msra.mxu3 %v5076_v59  ;;  %v6006_v59 = vpop.f32.mrf.mxu2 }
  0xbf   : > { %v5873_v8 = vpop.permute.xlu2 %1239 }
  0xc0   : > { %8737 = vst [vmem:[#allocation26_spill] sm:$0xff] %v5873_v8  ;;  %v1272_v13 = vmul.f32 %v5873_v8, %v1186_v10  ;;  %1501 = vmatpush.msra.mxu3 %v5075_v51  ;;  %v853_v10 = vpop.f32.mrf.mxu0  ;;  %v6010_v51 = vpop.f32.mrf.mxu1 }
  0xc2   : > { %1502 = vmatpush.msra.mxu3 %v5074_v5 }
  0xc3   : > { %5060 = vmatmul.msk.f32.gmra.mxu2 %vm783_vm1, %v1267_v16 }
  0xc4   : > { %5041 = vmatmul.msk.f32.gmra.mxu1 %vm783_vm1, %v1020_v17  ;;  %v5814_v36 = vpop.permute.xlu1 %1227  ;;  %v1179_v17 = vrot.slane %v5652_v21, 1 }
  0xc5   : > { %8730 = vst [vmem:[#allocation19_spill] sm:$0xff] %v5814_v36  ;;  %v1269_v42 = vmul.f32 %v5814_v36, %v1189_v38  ;;  %v912_v38 = vrot.slane %v5823_v41, 7  ;;  %v5915_v41 = vpop.permute.xlu0 %993 }
  0xc6   : > { %v1182_v27 = vsel %vm1181_vm2, %v1179_v17, %v1180_v15  ;;  %8742 = vst [vmem:[#allocation30_spill] sm:$0xff] %v5915_v41 }
  0xc7   : > { %v5893_v30 = vpop.permute.xlu2 %1243  ;;  %v924_v50 = vsel %vm919_vm3, %v911_v20, %v912_v38  ;;  %v923_v62 = vsel %vm919_vm3, %v912_v38, %v913_v55  ;;  %v5118_v20 = vld [vmem:[%s8741_s30 + $0xb8] sm:$0xff]  ;;  %v5116_v38 = vld [vmem:[%s8741_s30 + $0xa8] sm:$0xff] }
  0xc8   : > { %8739 = vst [vmem:[#allocation28_spill] sm:$0xff] %v5893_v30  ;;  %1853 = vmatpush.msra.mxu1 %v5118_v20 }
  0xcb   : > { %5061 = vmatmul.msk.f32.gmra.mxu2 %vm783_vm1, %v1268_v31  ;;  %v1185_v31 = vsel %vm1181_vm2, %v1176_v4, %v1177_v19 }
  0xcc   : > { %5042 = vmatmul.msk.f32.gmra.mxu1 %vm783_vm1, %v1021_v35  ;;  %v5840_v52 = vpop.permute.xlu1 %1231  ;;  %v1178_v35 = vrot.slane %v5859_v63, 1  ;;  %v1273_v23 = vmul.f32 %v5893_v30, %v1185_v31 }
  0xcd   : > { %8733 = vst [vmem:[#allocation22_spill] sm:$0xff] %v5840_v52  ;;  %v1270_v58 = vmul.f32 %v5840_v52, %v1188_v53 }
  0xce   : > { %v1183_v3 = vsel %vm1181_vm2, %v1178_v35, %v1179_v17  ;;  %v5951_v17 = vpop.permute.xlu0 %1255 }
  0xcf   : > { %8746 = vst [vmem:[#allocation34_spill] sm:$0xff] %v5951_v17 }
  0xd3   : > { %5062 = vmatmul.msk.f32.gmra.mxu2 %vm783_vm1, %v1269_v42 }
  0xd4   : > { %5043 = vmatmul.msk.f32.gmra.mxu1 %vm783_vm1, %v1022_v44  ;;  %v1184_v44 = vsel %vm1181_vm2, %v1177_v19, %v1178_v35  ;;  %v5072_v19 = vld [vmem:[%s8741_s30 + $0x48] sm:$0xff]  ;;  %v5117_v35 = vld [vmem:[%s8741_s30 + $0xb0] sm:$0xff] }
  0xd5   : > { %v5868_v6 = vpop.permute.xlu1 %983  ;;  %1854 = vmatpush.msra.mxu1 %v5117_v35 }
  0xd6   : > { %8736 = vst [vmem:[#allocation25_spill] sm:$0xff] %v5868_v6  ;;  %v1025_v16 = vmul.f32 %v5868_v6, %v926_v12  ;;  %v5073_v12 = vld [vmem:[%s8741_s30 + $0x50] sm:$0xff] }
  0xd7   : > { %1503 = vmatpush.msra.mxu3 %v5073_v12  ;;  %1855 = vmatpush.msra.mxu1 %v5116_v38 }
  0xd9   : > { %1504 = vmatpush.msra.mxu3 %v5072_v19 }
  0xdb   : > { %5063 = vmatmul.msk.f32.gmra.mxu2 %vm783_vm1, %v1270_v58  ;;  %v5922_v58 = vpop.permute.xlu2 %998 }
  0xdc   : > { %5044 = vmatmul.msk.f32.gmra.mxu1 %vm783_vm1, %v1023_v54  ;;  %v1027_v54 = vmul.f32 %v5915_v41, %v924_v50  ;;  %8743 = vst [vmem:[#allocation31_spill] sm:$0xff] %v5922_v58  ;;  %v1028_v4 = vmul.f32 %v5922_v58, %v923_v62 }
  0xdd   : > { %v5886_v25 = vpop.permute.xlu1 %988 }
  0xde   : > { %8738 = vst [vmem:[#allocation27_spill] sm:$0xff] %v5886_v25  ;;  %v1026_v40 = vmul.f32 %v5886_v25, %v925_v32  ;;  %v1276_v32 = vmul.f32 %v5951_v17, %v1182_v27  ;;  %v5115_v27 = vld [vmem:[%s8741_s30 + $0xa0] sm:$0xff] }
  0xdf   : > { %1856 = vmatpush.msra.mxu1 %v5115_v27 }
  0xe3   : > { %5064 = vmatmul.msk.f32.gmra.mxu2 %vm783_vm1, %v1271_v0 }
  0xe4   : > { %5045 = vmatmul.msk.f32.gmra.mxu1 %vm783_vm1, %v1024_v7 }
  0xe6   : > { %v5905_v42 = vpop.permute.xlu1 %1247 }
  0xe7   : > { %8740 = vst [vmem:[#allocation29_spill] sm:$0xff] %v5905_v42  ;;  %v1274_v53 = vmul.f32 %v5905_v42, %v1184_v44  ;;  %v856_v44 = vpop.f32.mrf.mxu0 }
  0xeb   : > { %5065 = vmatmul.msk.f32.gmra.mxu2 %vm783_vm1, %v1272_v13  ;;  %v914_v13 = vrot.slane %v5859_v63, 7  ;;  %v5071_v63 = vld [vmem:[%s8741_s30 + $0x40] sm:$0xff] }
  0xec   : > { %5046 = vmatmul.msk.f32.gmra.mxu1 %vm783_vm1, %v1025_v16  ;;  %v5948_v16 = vpop.permute.xlu2 %1003  ;;  %1505 = vmatpush.msra.mxu3 %v5071_v63 }
  0xed   : > { %8745 = vst [vmem:[#allocation33_spill] sm:$0xff] %v5948_v16  ;;  %v922_v31 = vsel %vm919_vm3, %v913_v55, %v914_v13 }
  0xee   : > { %v5931_v0 = vpop.permute.xlu1 %1251 }
  0xef   : > { %8744 = vst [vmem:[#allocation32_spill] sm:$0xff] %v5931_v0  ;;  %v1275_v7 = vmul.f32 %v5931_v0, %v1183_v3  ;;  %v859_v62 = vpop.f32.mrf.mxu0 }
  0xf3   : > { %5066 = vmatmul.msk.f32.gmra.mxu2 %vm783_vm1, %v1273_v23  ;;  %v915_v23 = vrot.slane %v5652_v21, 7  ;;  %v1197_v21 = vsel %vm1181_vm2, %v1180_v15, %v1165_v29  ;;  %v5112_v29 = vld [vmem:[%s8741_s30 + $0x88] sm:$0xff]  ;;  %v5111_v15 = vld [vmem:[%s8741_s30 + $0x80] sm:$0xff] }
  0xf4   : > { %5047 = vmatmul.msk.f32.gmra.mxu1 %vm783_vm1, %v1026_v40  ;;  %v1029_v40 = vmul.f32 %v5948_v16, %v922_v31  ;;  %v5978_v46 = vpop.permute.xlu2 %1259 }
  0xf5   : > { %8747 = vst [vmem:[#allocation35_spill] sm:$0xff] %v5978_v46  ;;  %v921_v50 = vsel %vm919_vm3, %v914_v13, %v915_v23 }
  0xf7   : > { %v5986_v49 = vpop.permute.xlu1 %1008  ;;  %v862_v19 = vpop.f32.mrf.mxu0 }
  0xf8   : > { %8748 = vst [vmem:[#allocation36_spill] sm:$0xff] %v5986_v49  ;;  %v1030_v55 = vmul.f32 %v5986_v49, %v921_v50 }
  0xfb   : > { %5067 = vmatmul.msk.f32.gmra.mxu2 %vm783_vm1, %v1274_v53  ;;  %v5114_v53 = vld [vmem:[%s8741_s30 + $0x98] sm:$0xff] }
  0xfc   : > { %5048 = vmatmul.msk.f32.gmra.mxu1 %vm783_vm1, %v1027_v54  ;;  %v1277_v54 = vmul.f32 %v5978_v46, %v1197_v21 }
  0xfd   : > { %1857 = vmatpush.msra.mxu1 %v5114_v53 }
  0xff   : > { %1858 = vmatpush.msra.mxu1 %v5113_v18  ;;  %v6008_v3 = vpop.permute.xlu1 %1013 }
 0x100   : > { %8749 = vst [vmem:[#allocation37_spill] sm:$0xff] %v6008_v3 }
 0x101   : > { %1859 = vmatpush.msra.mxu1 %v5112_v29 }
 0x103   : > { %5068 = vmatmul.msk.f32.gmra.mxu2 %vm783_vm1, %v1275_v7  ;;  %1860 = vmatpush.msra.mxu1 %v5111_v15  ;;  %v6020_v7 = vld [vmem:[%s8750_s0] ss:$0 sm:$0xff]  ;;  %s8901_s0 = sld [smem:[#allocation64_spill]] }
 0x104   : > { %5049 = vmatmul.msk.f32.gmra.mxu1 %vm783_vm1, %v1028_v4  ;;  %v920_v4 = vsel %vm919_vm3, %v915_v23, %v916_v37  ;;  %v854_v13 = vadd.f32 %v6020_v7, %v853_v10  ;;  %v857_v37 = vadd.f32 %v6020_v7, %v856_v44  ;;  %v865_v23 = vpop.f32.mrf.mxu0  ;;  %v860_v10 = vadd.f32 %v6020_v7, %v859_v62 }
 0x105   : > { %v1031_v5 = vmul.f32 %v6008_v3, %v920_v4 }
 0x10b   : > { %5069 = vmatmul.msk.f32.gmra.mxu2 %vm783_vm1, %v1276_v32 }
 0x10c   : > { %5050 = vmatmul.msk.f32.gmra.mxu1 %vm783_vm1, %v1029_v40  ;;  %v868_v4 = vpop.f32.mrf.mxu0 }
 0x113   : > { %5070 = vmatmul.msk.f32.gmra.mxu2 %vm783_vm1, %v1277_v54 }
 0x114   : > { %5051 = vmatmul.msk.f32.gmra.mxu1 %vm783_vm1, %v1030_v55 }
 0x11c   : > { %5052 = vmatmul.msk.f32.gmra.mxu1 %vm783_vm1, %v1031_v5 }
 0x11e   : > { %v1348_v12 = vpop.f32.mrf.mxu2 }
 0x121   : > { %v1101_v20 = vpop.f32.mrf.mxu1 }
 0x122   : > { %v1149_v63 = vadd.f32 %v1101_v20, %v854_v13  ;;  %v863_v13 = vadd.f32 %v6020_v7, %v862_v19  ;;  %v871_v19 = vpop.f32.mrf.mxu0 }
 0x124   : > { %v1396_v31 = vadd.f32 %v1348_v12, %v1149_v63 }
 0x126   : > { %v1351_v14 = vpop.f32.mrf.mxu2  ;;  %v6025_v32 = vmax.f32 %v1396_v31, 0.0 }
 0x128   : > { %5079 = vmatmul.msk.f32.vlgmr.msra.gmra.mxu3 %vm1441_vm4, %v6025_v32  ;;  %v8608_v50 = vrot.slane %v6025_v32, 7  ;;  %v8607_v53 = vrot.slane %v6025_v32, 1 }
 0x129   : > { %v1104_v35 = vpop.f32.mrf.mxu1 }
 0x12a   : > { %v1150_v38 = vadd.f32 %v1104_v35, %v857_v37 }
 0x12c   : > { %v1397_v40 = vadd.f32 %v1351_v14, %v1150_v38 }
 0x12e   : > { %v1354_v27 = vpop.f32.mrf.mxu2  ;;  %v1413_v21 = vmax.f32 %v1397_v40, 0.0 }
 0x130   : > { %5080 = vmatmul.msk.f32.gmra.mxu3 %vm1441_vm4, %v1413_v21  ;;  %v1556_v44 = vrot.slane %v1413_v21, 7  ;;  %v1741_v54 = vrot.slane %v1413_v21, 1  ;;  %v866_v21 = vadd.f32 %v6020_v7, %v865_v23 }
 0x131   : > { %v1107_v18 = vpop.f32.mrf.mxu1 }
 0x132   : > { %v1151_v55 = vadd.f32 %v1107_v18, %v860_v10  ;;  %v1770_v29 = vsel %vm1181_vm2, %v8607_v53, %v1741_v54  ;;  %v6041_v15 = vsel %vm919_vm3, %v8608_v50, %v1556_v44 }
 0x133   : > { %v1772_v62 = vmul.f32 %v1770_v29, %v5691_v33 }
 0x134   : > { %v1398_v5 = vadd.f32 %v1354_v27, %v1151_v55 }
 0x135   : > { %5119 = vmatmul.msk.f32.vlgmr.msra.gmra.mxu1 %vm1441_vm4, %v1772_v62 }
 0x136   : > { %v1357_v12 = vpop.f32.mrf.mxu2  ;;  %v1414_v20 = vmax.f32 %v1398_v5, 0.0 }
 0x138   : > { %5081 = vmatmul.msk.f32.gmra.mxu3 %vm1441_vm4, %v1414_v20  ;;  %v1557_v63 = vrot.slane %v1414_v20, 7  ;;  %v1742_v31 = vrot.slane %v1414_v20, 1  ;;  %v869_v20 = vadd.f32 %v6020_v7, %v868_v4 }
 0x139   : > { %v1110_v14 = vpop.f32.mrf.mxu1 }
 0x13a   : > { %v1152_v37 = vadd.f32 %v1110_v14, %v863_v13  ;;  %v1769_v35 = vsel %vm1181_vm2, %v1741_v54, %v1742_v31  ;;  %v6051_v38 = vsel %vm919_vm3, %v1556_v44, %v1557_v63 }
 0x13b   : > { %v1773_v40 = vmul.f32 %v1769_v35, %v5693_v34 }
 0x13c   : > { %v1399_v27 = vadd.f32 %v1357_v12, %v1152_v37  ;;  %v874_v37 = vpop.f32.mrf.mxu0 }
 0x13d   : > { %5120 = vmatmul.msk.f32.gmra.mxu1 %vm1441_vm4, %v1773_v40 }
 0x13e   : > { %v1360_v10 = vpop.f32.mrf.mxu2  ;;  %v1415_v18 = vmax.f32 %v1399_v27, 0.0 }
 0x140   : > { %5082 = vmatmul.msk.f32.gmra.mxu3 %vm1441_vm4, %v1415_v18  ;;  %v1558_v55 = vrot.slane %v1415_v18, 7  ;;  %v1743_v29 = vrot.slane %v1415_v18, 1 }
 0x141   : > { %v1113_v62 = vpop.f32.mrf.mxu1 }
 0x142   : > { %v1153_v54 = vadd.f32 %v1113_v62, %v866_v21  ;;  %v1768_v44 = vsel %vm1181_vm2, %v1742_v31, %v1743_v29  ;;  %v6061_v5 = vsel %vm919_vm3, %v1557_v63, %v1558_v55  ;;  %v872_v62 = vadd.f32 %v6020_v7, %v871_v19 }
 0x143   : > { %v1774_v12 = vmul.f32 %v1768_v44, %v5713_v43 }
 0x144   : > { %v1400_v13 = vadd.f32 %v1360_v10, %v1153_v54 }
 0x145   : > { %5121 = vmatmul.msk.f32.gmra.mxu1 %vm1441_vm4, %v1774_v12 }
 0x146   : > { %v1363_v23 = vpop.f32.mrf.mxu2  ;;  %v1416_v14 = vmax.f32 %v1400_v13, 0.0 }
 0x148   : > { %5083 = vmatmul.msk.f32.gmra.mxu3 %vm1441_vm4, %v1416_v14  ;;  %v1559_v35 = vrot.slane %v1416_v14, 7  ;;  %v1744_v40 = vrot.slane %v1416_v14, 1 }
 0x149   : > { %v1116_v27 = vpop.f32.mrf.mxu1 }
 0x14a   : > { %v1154_v31 = vadd.f32 %v1116_v27, %v869_v20  ;;  %v1767_v63 = vsel %vm1181_vm2, %v1743_v29, %v1744_v40  ;;  %v6071_v21 = vsel %vm919_vm3, %v1558_v55, %v1559_v35  ;;  %v877_v20 = vpop.f32.mrf.mxu0 }
 0x14b   : > { %v1775_v10 = vmul.f32 %v1767_v63, %v5740_v57 }
 0x14c   : > { %v1401_v18 = vadd.f32 %v1363_v23, %v1154_v31  ;;  %v875_v31 = vadd.f32 %v6020_v7, %v874_v37 }
 0x14d   : > { %5122 = vmatmul.msk.f32.gmra.mxu1 %vm1441_vm4, %v1775_v10 }
 0x14e   : > { %v1366_v4 = vpop.f32.mrf.mxu2  ;;  %v1417_v54 = vmax.f32 %v1401_v18, 0.0 }
 0x150   : > { %5084 = vmatmul.msk.f32.gmra.mxu3 %vm1441_vm4, %v1417_v54  ;;  %v1560_v44 = vrot.slane %v1417_v54, 7  ;;  %v1745_v12 = vrot.slane %v1417_v54, 1 }
 0x151   : > { %v1119_v13 = vpop.f32.mrf.mxu1 }
 0x152   : > { %v1155_v29 = vadd.f32 %v1119_v13, %v872_v62  ;;  %v1766_v55 = vsel %vm1181_vm2, %v1744_v40, %v1745_v12  ;;  %v6081_v14 = vsel %vm919_vm3, %v1559_v35, %v1560_v44  ;;  %v880_v13 = vpop.f32.mrf.mxu0 }
 0x153   : > { %v1776_v23 = vmul.f32 %v1766_v55, %v5759_v2  ;;  %v878_v55 = vadd.f32 %v6020_v7, %v877_v20 }
 0x154   : > { %v1402_v27 = vadd.f32 %v1366_v4, %v1155_v29 }
 0x155   : > { %5123 = vmatmul.msk.f32.gmra.mxu1 %vm1441_vm4, %v1776_v23 }
 0x156   : > { %v1369_v19 = vpop.f32.mrf.mxu2  ;;  %v1418_v63 = vmax.f32 %v1402_v27, 0.0 }
 0x158   : > { %5085 = vmatmul.msk.f32.gmra.mxu3 %vm1441_vm4, %v1418_v63  ;;  %v1561_v10 = vrot.slane %v1418_v63, 7  ;;  %v1746_v18 = vrot.slane %v1418_v63, 1 }
 0x159   : > { %v1122_v62 = vpop.f32.mrf.mxu1 }
 0x15a   : > { %v1156_v54 = vadd.f32 %v1122_v62, %v875_v31  ;;  %v1765_v40 = vsel %vm1181_vm2, %v1745_v12, %v1746_v18  ;;  %v6091_v35 = vsel %vm919_vm3, %v1560_v44, %v1561_v10  ;;  %v883_v20 = vpop.f32.mrf.mxu0 }
 0x15b   : > { %v1777_v4 = vmul.f32 %v1765_v40, %v5778_v11 }
 0x15c   : > { %v1403_v29 = vadd.f32 %v1369_v19, %v1156_v54 }
 0x15d   : > { %5124 = vmatmul.msk.f32.gmra.mxu1 %vm1441_vm4, %v1777_v4  ;;  %v881_v4 = vadd.f32 %v6020_v7, %v880_v13 }
 0x15e   : > { %v1372_v37 = vpop.f32.mrf.mxu2  ;;  %v1419_v23 = vmax.f32 %v1403_v29, 0.0 }
 0x160   : > { %5086 = vmatmul.msk.f32.gmra.mxu3 %vm1441_vm4, %v1419_v23  ;;  %v1562_v27 = vrot.slane %v1419_v23, 7  ;;  %v1747_v31 = vrot.slane %v1419_v23, 1 }
 0x161   : > { %v1125_v63 = vpop.f32.mrf.mxu1 }
 0x162   : > { %v1157_v12 = vadd.f32 %v1125_v63, %v878_v55  ;;  %v1764_v44 = vsel %vm1181_vm2, %v1746_v18, %v1747_v31  ;;  %v6101_v62 = vsel %vm919_vm3, %v1561_v10, %v1562_v27  ;;  %v886_v26 = vpop.f32.mrf.mxu0 }
 0x163   : > { %v1778_v19 = vmul.f32 %v1764_v44, %v5800_v24 }
 0x164   : > { %v1404_v54 = vadd.f32 %v1372_v37, %v1157_v12 }
 0x165   : > { %5125 = vmatmul.msk.f32.gmra.mxu1 %vm1441_vm4, %v1778_v19  ;;  %v884_v19 = vadd.f32 %v6020_v7, %v883_v20  ;;  %v1610_v20 = vld [vmem:[%s8741_s30 + $0x38] sm:$0xff] }
 0x166   : > { %v1375_v40 = vpop.f32.mrf.mxu2  ;;  %v1420_v29 = vmax.f32 %v1404_v54, 0.0  ;;  %1667 = vmatpush.msrb.mxu0 %v1610_v20  ;;  %v1607_v20 = vld [vmem:[%s8741_s30 + $0x20] sm:$0xff] }
 0x168   : > { %5087 = vmatmul.msk.f32.gmra.mxu3 %vm1441_vm4, %v1420_v29  ;;  %v1563_v55 = vrot.slane %v1420_v29, 7  ;;  %v1748_v23 = vrot.slane %v1420_v29, 1 }
 0x169   : > { %v1128_v63 = vpop.f32.mrf.mxu1 }
 0x16a   : > { %v1158_v18 = vadd.f32 %v1128_v63, %v881_v4  ;;  %v1763_v10 = vsel %vm1181_vm2, %v1747_v31, %v1748_v23  ;;  %v6111_v44 = vsel %vm919_vm3, %v1562_v27, %v1563_v55 }
 0x16b   : > { %v1779_v37 = vmul.f32 %v1763_v10, %v5814_v36 }
 0x16c   : > { %v1405_v12 = vadd.f32 %v1375_v40, %v1158_v18 }
 0x16d   : > { %5126 = vmatmul.msk.f32.gmra.mxu1 %vm1441_vm4, %v1779_v37 }
 0x16e   : > { %v1378_v13 = vpop.f32.mrf.mxu2  ;;  %v1421_v54 = vmax.f32 %v1405_v12, 0.0  ;;  %v887_v12 = vadd.f32 %v6020_v7, %v886_v26 }
 0x170   : > { %5088 = vmatmul.msk.f32.gmra.mxu3 %vm1441_vm4, %v1421_v54  ;;  %v1564_v4 = vrot.slane %v1421_v54, 7  ;;  %v1749_v29 = vrot.slane %v1421_v54, 1 }
 0x171   : > { %v1131_v63 = vpop.f32.mrf.mxu1 }
 0x172   : > { %v1159_v31 = vadd.f32 %v1131_v63, %v884_v19  ;;  %v1762_v27 = vsel %vm1181_vm2, %v1748_v23, %v1749_v29  ;;  %v6121_v10 = vsel %vm919_vm3, %v1563_v55, %v1564_v4  ;;  %v1609_v23 = vld [vmem:[%s8741_s30 + $0x30] sm:$0xff]  ;;  %v889_v63 = vpop.f32.mrf.mxu0 }
 0x173   : > { %v1780_v40 = vmul.f32 %v1762_v27, %v5840_v52  ;;  %1668 = vmatpush.msrb.mxu0 %v1609_v23  ;;  %v890_v23 = vadd.f32 %v6020_v7, %v889_v63  ;;  %v1603_v63 = vld [vmem:[%s8741_s30] sm:$0xff] }
 0x174   : > { %v1406_v18 = vadd.f32 %v1378_v13, %v1159_v31  ;;  %v1608_v31 = vld [vmem:[%s8741_s30 + $0x28] sm:$0xff] }
 0x175   : > { %5127 = vmatmul.msk.f32.gmra.mxu1 %vm1441_vm4, %v1780_v40  ;;  %1669 = vmatpush.msrb.mxu0 %v1608_v31 }
 0x176   : > { %v1381_v37 = vpop.f32.mrf.mxu2  ;;  %v1422_v19 = vmax.f32 %v1406_v18, 0.0 }
 0x177   : > { %1670 = vmatpush.msrb.mxu0 %v1607_v20 }
 0x178   : > { %5089 = vmatmul.msk.f32.gmra.mxu3 %vm1441_vm4, %v1422_v19  ;;  %v1565_v55 = vrot.slane %v1422_v19, 7  ;;  %v1750_v54 = vrot.slane %v1422_v19, 1 }
 0x179   : > { %v1134_v13 = vpop.f32.mrf.mxu1 }
 0x17a   : > { %v1160_v27 = vadd.f32 %v1134_v13, %v887_v12  ;;  %v1761_v26 = vsel %vm1181_vm2, %v1749_v29, %v1750_v54  ;;  %v6140_v40 = vsel %vm919_vm3, %v1564_v4, %v1565_v55  ;;  %v1606_v12 = vld [vmem:[%s8741_s30 + $0x18] sm:$0xff]  ;;  %v1605_v4 = vld [vmem:[%s8741_s30 + $0x10] sm:$0xff] }
 0x17b   : > { %v1781_v18 = vmul.f32 %v1761_v26, %v5854_v61  ;;  %1671 = vmatpush.msrb.mxu0 %v1606_v12 }
 0x17c   : > { %v1407_v19 = vadd.f32 %v1381_v37, %v1160_v27  ;;  %v1604_v27 = vld [vmem:[%s8741_s30 + $0x8] sm:$0xff] }
 0x17d   : > { %5128 = vmatmul.msk.f32.gmra.mxu1 %vm1441_vm4, %v1781_v18  ;;  %1672 = vmatpush.msrb.mxu0 %v1605_v4 }
 0x17e   : > { %v1384_v29 = vpop.f32.mrf.mxu2  ;;  %v1423_v13 = vmax.f32 %v1407_v19, 0.0 }
 0x17f   : > { %1673 = vmatpush.msrb.mxu0 %v1604_v27 }
 0x180   : > { %5090 = vmatmul.msk.f32.gmra.mxu3 %vm1441_vm4, %v1423_v13  ;;  %v1566_v31 = vrot.slane %v1423_v13, 7  ;;  %v1751_v37 = vrot.slane %v1423_v13, 1  ;;  %v892_v13 = vpop.f32.mrf.mxu0 }
 0x181   : > { %v1137_v26 = vpop.f32.mrf.mxu1  ;;  %1674 = vmatpush.msrb.mxu0 %v1603_v63  ;;  %v893_v53 = vadd.f32 %v6020_v7, %v892_v13  ;;  %v896_v13 = vadd.f32 %v6020_v7, %v6010_v51  ;;  %v899_v51 = vadd.f32 %v6020_v7, %v6006_v59 }
 0x182   : > { %v1161_v18 = vadd.f32 %v1137_v26, %v890_v23  ;;  %v1760_v20 = vsel %vm1181_vm2, %v1750_v54, %v1751_v37  ;;  %v6165_v19 = vsel %vm919_vm3, %v1565_v55, %v1566_v31 }
 0x183   : > { %v1782_v12 = vmul.f32 %v1760_v20, %v5873_v8  ;;  %v2413_v8 = vld [vmem:[#allocation2 + $0x258] sm:$0xff] }
 0x184   : > { %v1408_v4 = vadd.f32 %v1384_v29, %v1161_v18 }
 0x185   : > { %5129 = vmatmul.msk.f32.gmra.mxu1 %vm1441_vm4, %v1782_v12 }
 0x186   : > { %v1424_v50 = vmax.f32 %v1408_v4, 0.0  ;;  %v1387_v61 = vpop.f32.mrf.mxu2 }
 0x188   : > { %5091 = vmatmul.msk.f32.gmra.mxu3 %vm1441_vm4, %v1424_v50  ;;  %v1567_v23 = vrot.slane %v1424_v50, 7  ;;  %v1752_v54 = vrot.slane %v1424_v50, 1 }
 0x189   : > { %v1140_v27 = vpop.f32.mrf.mxu1 }
 0x18a   : > { %v1162_v26 = vadd.f32 %v1140_v27, %v893_v53  ;;  %v1759_v55 = vsel %vm1181_vm2, %v1751_v37, %v1752_v54  ;;  %v6175_v20 = vsel %vm919_vm3, %v1566_v31, %v1567_v23 }
 0x18b   : > { %v1783_v29 = vmul.f32 %v1759_v55, %v5893_v30 }
 0x18c   : > { %v1409_v63 = vadd.f32 %v1387_v61, %v1162_v26 }
 0x18d   : > { %5130 = vmatmul.msk.f32.gmra.mxu1 %vm1441_vm4, %v1783_v29 }
 0x18e   : > { %v1425_v18 = vmax.f32 %v1409_v63, 0.0  ;;  %v1390_v12 = vpop.f32.mrf.mxu2 }
 0x190   : > { %5092 = vmatmul.msk.f32.gmra.mxu3 %vm1441_vm4, %v1425_v18  ;;  %v1568_v50 = vrot.slane %v1425_v18, 7  ;;  %v1753_v53 = vrot.slane %v1425_v18, 1 }
 0x191   : > { %v1143_v4 = vpop.f32.mrf.mxu1 }
 0x192   : > { %v1163_v37 = vadd.f32 %v1143_v4, %v896_v13  ;;  %v1758_v31 = vsel %vm1181_vm2, %v1752_v54, %v1753_v53  ;;  %v6186_v27 = vsel %vm919_vm3, %v1567_v23, %v1568_v50 }
 0x193   : > { %v1784_v61 = vmul.f32 %v1758_v31, %v5905_v42  ;;  %v2427_v42 = vld [vmem:[#allocation2 + $0x2c8] sm:$0xff] }
 0x194   : > { %v1410_v26 = vadd.f32 %v1390_v12, %v1163_v37 }
 0x195   : > { %5131 = vmatmul.msk.f32.gmra.mxu1 %vm1441_vm4, %v1784_v61  ;;  %v8751_v61 = vrot.slane %v6025_v32, 7 }
 0x196   : > { %v1426_v55 = vmax.f32 %v1410_v26, 0.0  ;;  %v1393_v13 = vpop.f32.mrf.mxu2 }
 0x198   : > { %v1569_v29 = vrot.slane %v1426_v55, 7  ;;  %v1754_v63 = vrot.slane %v1426_v55, 1  ;;  %5093 = vmatmul.msk.f32.gmra.mxu3 %vm1441_vm4, %v1426_v55 }
 0x199   : > { %v1146_v18 = vpop.f32.mrf.mxu1 }
 0x19a   : > { %v1164_v54 = vadd.f32 %v1146_v18, %v899_v51  ;;  %v1757_v23 = vsel %vm1181_vm2, %v1753_v53, %v1754_v63  ;;  %v6197_v4 = vsel %vm919_vm3, %v1568_v50, %v1569_v29  ;;  %v8752_v18 = vrot.slane %v6025_v32, 1 }
 0x19b   : > { %v1785_v12 = vmul.f32 %v1757_v23, %v5931_v0  ;;  %v1590_v32 = vmul.f32 %v6061_v5, %v5756_v1  ;;  %v1591_v23 = vmul.f32 %v6071_v21, %v5773_v9  ;;  %v1594_v5 = vmul.f32 %v6101_v62, %v5830_v47  ;;  %v1969_v62 = vld [vmem:[#allocation2 + $0x1d0] sm:$0xff] }
 0x19c   : > { %v1411_v37 = vadd.f32 %v1393_v13, %v1164_v54  ;;  %v1595_v21 = vmul.f32 %v6111_v44, %v5851_v60  ;;  %v1968_v44 = vld [vmem:[#allocation2 + $0x1c8] sm:$0xff] }
 0x19d   : > { %5132 = vmatmul.msk.f32.gmra.mxu1 %vm1441_vm4, %v1785_v12  ;;  %v1973_v12 = vld [vmem:[#allocation2 + $0x1f0] sm:$0xff] }
 0x19e   : > { %v1427_v59 = vmax.f32 %v1411_v37, 0.0  ;;  %v1974_v37 = vld [vmem:[#allocation2 + $0x1f8] sm:$0xff]  ;;  %1981 = vmatpush.msra.mxu2 %v1973_v12 }
 0x19f   : > { %2046 = vmatpush.msrb.mxu3 %v1974_v37  ;;  %v1949_v37 = vld [vmem:[#allocation2 + $0x130] sm:$0xff] }
 0x1a0   : > { %v1570_v7 = vrot.slane %v1427_v59, 7  ;;  %v1755_v31 = vrot.slane %v1427_v59, 1  ;;  %5094 = vmatmul.msk.f32.gmra.mxu3 %vm1441_vm4, %v1427_v59  ;;  %v1972_v59 = vld [vmem:[#allocation2 + $0x1e8] sm:$0xff] }
 0x1a1   : > { %2047 = vmatpush.msrb.mxu3 %v1972_v59  ;;  %v1948_v59 = vld [vmem:[#allocation2 + $0x128] sm:$0xff] }
 0x1a2   : > { %v1586_v26 = vsel %vm919_vm3, %v1570_v7, %v8751_v61  ;;  %v1756_v53 = vsel %vm1181_vm2, %v1754_v63, %v1755_v31  ;;  %v6210_v50 = vsel %vm919_vm3, %v1569_v29, %v1570_v7  ;;  %v1771_v13 = vsel %vm1181_vm2, %v1755_v31, %v8752_v18  ;;  %v1970_v7 = vld [vmem:[#allocation2 + $0x1d8] sm:$0xff]  ;;  %v1967_v31 = vld [vmem:[#allocation2 + $0x1c0] sm:$0xff]  ;;  %v1965_v61 = vld [vmem:[#allocation2 + $0x1b0] sm:$0xff] }
 0x1a3   : > { %v1587_v55 = vmul.f32 %v1586_v26, %v5716_v45  ;;  %v1786_v51 = vmul.f32 %v1756_v53, %v5951_v17  ;;  %v1588_v63 = vmul.f32 %v6041_v15, %v5719_v48  ;;  %v1787_v54 = vmul.f32 %v1771_v13, %v5978_v46  ;;  %2048 = vmatpush.msrb.mxu3 %v1970_v7  ;;  %v1966_v26 = vld [vmem:[#allocation2 + $0x1b8] sm:$0xff]  ;;  %v1963_v53 = vld [vmem:[#allocation2 + $0x1a0] sm:$0xff]  ;;  %v2431_v17 = vld [vmem:[#allocation2 + $0x2e8] sm:$0xff] }
 0x1a4   : > { %v1589_v29 = vmul.f32 %v6051_v38, %v5736_v56  ;;  %v1592_v15 = vmul.f32 %v6081_v14, %v5794_v22  ;;  %v1593_v38 = vmul.f32 %v6091_v35, %v5818_v39  ;;  %v1596_v14 = vmul.f32 %v6121_v10, %v5868_v6  ;;  %v1971_v35 = vld [vmem:[#allocation2 + $0x1e0] sm:$0xff]  ;;  %v1962_v18 = vld [vmem:[#allocation2 + $0x198] sm:$0xff] }
 0x1a5   : > { %5095 = vmatmul.msk.f32.vlgmr.msrb.gmra.mxu0 %vm1441_vm4, %v1587_v55  ;;  %5133 = vmatmul.msk.f32.gmra.mxu1 %vm1441_vm4, %v1786_v51  ;;  %v1597_v10 = vmul.f32 %v6140_v40, %v5886_v25  ;;  %v1964_v55 = vld [vmem:[#allocation2 + $0x1a8] sm:$0xff]  ;;  %v1961_v51 = vld [vmem:[#allocation2 + $0x190] sm:$0xff]  ;;  %v1959_v13 = vld [vmem:[#allocation2 + $0x180] sm:$0xff]  ;;  %v1598_v40 = vmul.f32 %v6165_v19, %v5915_v41  ;;  %v1599_v19 = vmul.f32 %v6175_v20, %v5922_v58 }
 0x1a6   : > { %1982 = vmatpush.msra.mxu2 %v1971_v35  ;;  %2049 = vmatpush.msrb.mxu3 %v1968_v44  ;;  %v1947_v35 = vld [vmem:[#allocation2 + $0x120] sm:$0xff]  ;;  %v1946_v7 = vld [vmem:[#allocation2 + $0x118] sm:$0xff] }
 0x1a7   : > { %v1943_v44 = vld [vmem:[#allocation2 + $0x100] sm:$0xff] }
 0x1a8   : > { %1983 = vmatpush.msra.mxu2 %v1969_v62  ;;  %2050 = vmatpush.msrb.mxu3 %v1966_v26  ;;  %v1945_v62 = vld [vmem:[#allocation2 + $0x110] sm:$0xff] }
 0x1aa   : > { %1984 = vmatpush.msra.mxu2 %v1967_v31  ;;  %2051 = vmatpush.msrb.mxu3 %v1964_v55 }
 0x1ab   : > { %v1507_v12 = vpop.f32.mrf.mxu3 }
 0x1ac   : > { %1985 = vmatpush.msra.mxu2 %v1965_v61  ;;  %2052 = vmatpush.msrb.mxu3 %v1962_v18  ;;  %v1944_v61 = vld [vmem:[#allocation2 + $0x108] sm:$0xff]  ;;  %v1602_v18 = vmul.f32 %v6210_v50, %v6008_v3 }
 0x1ad   : > { %5096 = vmatmul.msk.f32.gmra.mxu0 %vm1441_vm4, %v1588_v63  ;;  %5134 = vmatmul.msk.f32.gmra.mxu1 %vm1441_vm4, %v1787_v54  ;;  %v1960_v63 = vld [vmem:[#allocation2 + $0x188] sm:$0xff]  ;;  %v1957_v54 = vld [vmem:[#allocation2 + $0x170] sm:$0xff] }
 0x1ae   : > { %1986 = vmatpush.msra.mxu2 %v1963_v53  ;;  %2053 = vmatpush.msrb.mxu3 %v1960_v63  ;;  %v1601_v53 = vmul.f32 %v6197_v4, %v5986_v49 }
 0x1b0   : > { %1987 = vmatpush.msra.mxu2 %v1961_v51 }
 0x1b2   : > { %1988 = vmatpush.msra.mxu2 %v1959_v13  ;;  %v1862_v31 = vpop.f32.mrf.mxu1  ;;  %v6269_v13 = vld [vmem:[%s8586_s8] ss:$0 sm:$0xff] }
 0x1b3   : > { %v1510_v26 = vpop.f32.mrf.mxu3  ;;  %v1508_v63 = vadd.f32 %v6269_v13, %v1507_v12 }
 0x1b4   : > { %1989 = vmatpush.msra.mxu2 %v1957_v54 }
 0x1b5   : > { %5097 = vmatmul.msk.f32.gmra.mxu0 %vm1441_vm4, %v1589_v29  ;;  %v1958_v29 = vld [vmem:[#allocation2 + $0x178] sm:$0xff] }
 0x1b6   : > { %2054 = vmatpush.msrb.mxu3 %v1958_v29 }
 0x1ba   : > { %v1865_v20 = vpop.f32.mrf.mxu1 }
 0x1bb   : > { %v1513_v55 = vpop.f32.mrf.mxu3 }
 0x1bc   : > { %v1514_v12 = vadd.f32 %v6269_v13, %v1513_v55 }
 0x1bd   : > { %5098 = vmatmul.msk.f32.gmra.mxu0 %vm1441_vm4, %v1590_v32  ;;  %v1955_v32 = vld [vmem:[#allocation2 + $0x160] sm:$0xff] }
 0x1be   : > { %1990 = vmatpush.msra.mxu2 %v1955_v32 }
 0x1c2   : > { %v1868_v51 = vpop.f32.mrf.mxu1 }
 0x1c5   : > { %5099 = vmatmul.msk.f32.gmra.mxu0 %vm1441_vm4, %v1591_v23  ;;  %v1956_v23 = vld [vmem:[#allocation2 + $0x168] sm:$0xff] }
 0x1c6   : > { %2055 = vmatpush.msrb.mxu3 %v1956_v23 }
 0x1ca   : > { %v1871_v4 = vpop.f32.mrf.mxu1 }
 0x1cd   : > { %5100 = vmatmul.msk.f32.gmra.mxu0 %vm1441_vm4, %v1592_v15  ;;  %v1953_v15 = vld [vmem:[#allocation2 + $0x150] sm:$0xff] }
 0x1ce   : > { %1991 = vmatpush.msra.mxu2 %v1953_v15  ;;  %v1511_v15 = vadd.f32 %v6269_v13, %v1510_v26 }
 0x1d5   : > { %5101 = vmatmul.msk.f32.gmra.mxu0 %vm1441_vm4, %v1593_v38  ;;  %v1954_v38 = vld [vmem:[#allocation2 + $0x158] sm:$0xff] }
 0x1d6   : > { %2056 = vmatpush.msrb.mxu3 %v1954_v38 }
 0x1dd   : > { %5102 = vmatmul.msk.f32.gmra.mxu0 %vm1441_vm4, %v1594_v5  ;;  %v1951_v5 = vld [vmem:[#allocation2 + $0x140] sm:$0xff] }
 0x1de   : > { %1992 = vmatpush.msra.mxu2 %v1951_v5 }
 0x1e0   : > { %1993 = vmatpush.msra.mxu2 %v1949_v37 }
 0x1e2   : > { %1994 = vmatpush.msra.mxu2 %v1947_v35 }
 0x1e4   : > { %1995 = vmatpush.msra.mxu2 %v1945_v62 }
 0x1e5   : > { %5103 = vmatmul.msk.f32.gmra.mxu0 %vm1441_vm4, %v1595_v21  ;;  %v1952_v21 = vld [vmem:[#allocation2 + $0x148] sm:$0xff] }
 0x1e6   : > { %2057 = vmatpush.msrb.mxu3 %v1952_v21  ;;  %1996 = vmatpush.msra.mxu2 %v1943_v44  ;;  %v1874_v21 = vpop.f32.mrf.mxu1 }
 0x1ed   : > { %5104 = vmatmul.msk.f32.gmra.mxu0 %vm1441_vm4, %v1596_v14  ;;  %v1950_v14 = vld [vmem:[#allocation2 + $0x138] sm:$0xff] }
 0x1ee   : > { %2058 = vmatpush.msrb.mxu3 %v1950_v14 }
 0x1f0   : > { %2059 = vmatpush.msrb.mxu3 %v1948_v59 }
 0x1f2   : > { %2060 = vmatpush.msrb.mxu3 %v1946_v7 }
 0x1f4   : > { %2061 = vmatpush.msrb.mxu3 %v1944_v61  ;;  %v1877_v61 = vpop.f32.mrf.mxu1 }
 0x1f5   : > { %5105 = vmatmul.msk.f32.gmra.mxu0 %vm1441_vm4, %v1597_v10  ;;  %v1600_v10 = vmul.f32 %v6186_v27, %v5948_v16  ;;  %v1516_v27 = vpop.f32.mrf.mxu3  ;;  %v2182_v16 = vld [vmem:[#allocation2 + $0xb8] sm:$0xff] }
 0x1f6   : > { %v1517_v26 = vadd.f32 %v6269_v13, %v1516_v27 }
 0x1fd   : > { %5106 = vmatmul.msk.f32.gmra.mxu0 %vm1441_vm4, %v1598_v40  ;;  %v1519_v23 = vpop.f32.mrf.mxu3 }
 0x205   : > { %5107 = vmatmul.msk.f32.gmra.mxu0 %vm1441_vm4, %v1599_v19  ;;  %v1522_v35 = vpop.f32.mrf.mxu3 }
 0x20d   : > { %5108 = vmatmul.msk.f32.gmra.mxu0 %vm1441_vm4, %v1600_v10 }
 0x215   : > { %5109 = vmatmul.msk.f32.gmra.mxu0 %vm1441_vm4, %v1601_v53 }
 0x21d   : > { %5110 = vmatmul.msk.f32.gmra.mxu0 %vm1441_vm4, %v1602_v18 }
 0x222   : > { %v1676_v54 = vpop.f32.mrf.mxu0 }
 0x223   : > { %v1724_v29 = vadd.f32 %v1676_v54, %v1508_v63  ;;  %v1525_v54 = vpop.f32.mrf.mxu3 }
 0x225   : > { %v1910_v40 = vadd.f32 %v1862_v31, %v1724_v29 }
 0x227   : > { %v6273_v32 = vmax.f32 %v1910_v40, 0.0  ;;  %v1520_v40 = vadd.f32 %v6269_v13, %v1519_v23  ;;  %v1523_v23 = vadd.f32 %v6269_v13, %v1522_v35  ;;  %v1526_v35 = vadd.f32 %v6269_v13, %v1525_v54 }
 0x229   : > { %1997 = vmatmul.f32.vlgmr.msra.gmra.mxu2 %v6273_v32  ;;  %2062 = vmatmul.f32.vlgmr.msrb.gmra.mxu3 %v6273_v32  ;;  %v8612_v14 = vrot.slane %v6273_v32, 7 }
 0x22a   : > { %v1679_v50 = vpop.f32.mrf.mxu0 }
 0x22b   : > { %v1725_v38 = vadd.f32 %v1679_v50, %v1511_v15 }
 0x22d   : > { %v1911_v5 = vadd.f32 %v1865_v20, %v1725_v38  ;;  %v1880_v38 = vpop.f32.mrf.mxu1 }
 0x22f   : > { %v6278_v37 = vmax.f32 %v1911_v5, 0.0 }
 0x231   : > { %2000 = vmatmul.f32.gmra.mxu2 %v6278_v37  ;;  %2065 = vmatmul.f32.gmra.mxu3 %v6278_v37  ;;  %v2112_v19 = vrot.slane %v6278_v37, 7  ;;  %v8611_v10 = vrot.slane %v6278_v37, 1 }
 0x232   : > { %v1682_v59 = vpop.f32.mrf.mxu0 }
 0x233   : > { %v1726_v62 = vadd.f32 %v1682_v59, %v1514_v12  ;;  %v6289_v7 = vsel %vm919_vm3, %v8612_v14, %v2112_v19 }
 0x235   : > { %v1912_v31 = vadd.f32 %v1868_v51, %v1726_v62 }
 0x237   : > { %v1928_v44 = vmax.f32 %v1912_v31, 0.0 }
 0x239   : > { %2003 = vmatmul.f32.gmra.mxu2 %v1928_v44  ;;  %2068 = vmatmul.f32.gmra.mxu3 %v1928_v44  ;;  %v2355_v20 = vrot.slane %v1928_v44, 1  ;;  %v2113_v53 = vrot.slane %v1928_v44, 7 }
 0x23a   : > { %v1685_v55 = vpop.f32.mrf.mxu0 }
 0x23b   : > { %v1727_v18 = vadd.f32 %v1685_v55, %v1517_v26  ;;  %v6297_v63 = vsel %vm1181_vm2, %v8611_v10, %v2355_v20  ;;  %v6301_v51 = vsel %vm919_vm3, %v2112_v19, %v2113_v53 }
 0x23d   : > { %v1913_v27 = vadd.f32 %v1871_v4, %v1727_v18  ;;  %v1528_v4 = vpop.f32.mrf.mxu3 }
 0x23f   : > { %v1929_v29 = vmax.f32 %v1913_v27, 0.0 }
 0x241   : > { %2006 = vmatmul.f32.gmra.mxu2 %v1929_v29  ;;  %2071 = vmatmul.f32.gmra.mxu3 %v1929_v29  ;;  %v2356_v15 = vrot.slane %v1929_v29, 1  ;;  %v2114_v50 = vrot.slane %v1929_v29, 7 }
 0x242   : > { %v1688_v5 = vpop.f32.mrf.mxu0 }
 0x243   : > { %v1728_v12 = vadd.f32 %v1688_v5, %v1520_v40  ;;  %v6306_v59 = vsel %vm1181_vm2, %v2355_v20, %v2356_v15  ;;  %v6310_v19 = vsel %vm919_vm3, %v2113_v53, %v2114_v50  ;;  %v1883_v53 = vpop.f32.mrf.mxu1 }
 0x245   : > { %v1914_v62 = vadd.f32 %v1874_v21, %v1728_v12  ;;  %v1531_v40 = vpop.f32.mrf.mxu3 }
 0x247   : > { %v1930_v31 = vmax.f32 %v1914_v62, 0.0 }
 0x249   : > { %2009 = vmatmul.f32.gmra.mxu2 %v1930_v31  ;;  %2074 = vmatmul.f32.gmra.mxu3 %v1930_v31  ;;  %v2357_v44 = vrot.slane %v1930_v31, 1  ;;  %v2115_v26 = vrot.slane %v1930_v31, 7 }
 0x24a   : > { %v1691_v55 = vpop.f32.mrf.mxu0 }
 0x24b   : > { %v1729_v18 = vadd.f32 %v1691_v55, %v1523_v23  ;;  %v6315_v27 = vsel %vm1181_vm2, %v2356_v15, %v2357_v44  ;;  %v6319_v20 = vsel %vm919_vm3, %v2114_v50, %v2115_v26 }
 0x24d   : > { %v1915_v21 = vadd.f32 %v1877_v61, %v1729_v18  ;;  %v1886_v61 = vpop.f32.mrf.mxu1  ;;  %v1529_v18 = vadd.f32 %v6269_v13, %v1528_v4  ;;  %v1532_v4 = vadd.f32 %v6269_v13, %v1531_v40  ;;  %v2187_v40 = vld [vmem:[#allocation2 + $0xe0] sm:$0xff] }
 0x24f   : > { %v1931_v29 = vmax.f32 %v1915_v21, 0.0 }
 0x251   : > { %2012 = vmatmul.f32.gmra.mxu2 %v1931_v29  ;;  %2077 = vmatmul.f32.gmra.mxu3 %v1931_v29  ;;  %v2358_v5 = vrot.slane %v1931_v29, 1  ;;  %v2116_v12 = vrot.slane %v1931_v29, 7  ;;  %v1534_v29 = vpop.f32.mrf.mxu3 }
 0x252   : > { %v1694_v62 = vpop.f32.mrf.mxu0 }
 0x253   : > { %v1730_v31 = vadd.f32 %v1694_v62, %v1526_v35  ;;  %v6324_v15 = vsel %vm1181_vm2, %v2357_v44, %v2358_v5  ;;  %v6328_v50 = vsel %vm919_vm3, %v2115_v26, %v2116_v12 }
 0x255   : > { %v1916_v23 = vadd.f32 %v1880_v38, %v1730_v31  ;;  %v1889_v31 = vpop.f32.mrf.mxu1 }
 0x257   : > { %v1932_v55 = vmax.f32 %v1916_v23, 0.0 }
 0x259   : > { %2015 = vmatmul.f32.gmra.mxu2 %v1932_v55  ;;  %2080 = vmatmul.f32.gmra.mxu3 %v1932_v55  ;;  %v2359_v54 = vrot.slane %v1932_v55, 1  ;;  %v2117_v21 = vrot.slane %v1932_v55, 7 }
 0x25a   : > { %v1697_v10 = vpop.f32.mrf.mxu0 }
 0x25b   : > { %v1731_v35 = vadd.f32 %v1697_v10, %v1529_v18  ;;  %v6333_v44 = vsel %vm1181_vm2, %v2358_v5, %v2359_v54  ;;  %v6337_v26 = vsel %vm919_vm3, %v2116_v12, %v2117_v21  ;;  %v1537_v12 = vpop.f32.mrf.mxu3  ;;  %v2189_v18 = vld [vmem:[#allocation2 + $0xf0] sm:$0xff] }
 0x25c   : > { %2191 = vmatpush.msra.mxu0 %v2189_v18  ;;  %v2186_v18 = vld [vmem:[#allocation2 + $0xd8] sm:$0xff] }
 0x25d   : > { %v1917_v38 = vadd.f32 %v1883_v53, %v1731_v35  ;;  %v2190_v35 = vld [vmem:[#allocation2 + $0xf8] sm:$0xff] }
 0x25e   : > { %2256 = vmatpush.msrb.mxu1 %v2190_v35  ;;  %2192 = vmatpush.msra.mxu0 %v2187_v40  ;;  %v2184_v40 = vld [vmem:[#allocation2 + $0xc8] sm:$0xff] }
 0x25f   : > { %v1933_v62 = vmax.f32 %v1917_v38, 0.0 }
 0x261   : > { %2018 = vmatmul.f32.gmra.mxu2 %v1933_v62  ;;  %2083 = vmatmul.f32.gmra.mxu3 %v1933_v62  ;;  %v2360_v23 = vrot.slane %v1933_v62, 1  ;;  %v2118_v55 = vrot.slane %v1933_v62, 7  ;;  %v2188_v62 = vld [vmem:[#allocation2 + $0xe8] sm:$0xff] }
 0x262   : > { %v1700_v14 = vpop.f32.mrf.mxu0  ;;  %2257 = vmatpush.msrb.mxu1 %v2188_v62 }
 0x263   : > { %v1732_v46 = vadd.f32 %v1700_v14, %v1532_v4  ;;  %v6342_v10 = vsel %vm1181_vm2, %v2359_v54, %v2360_v23  ;;  %v6346_v5 = vsel %vm919_vm3, %v2117_v21, %v2118_v55  ;;  %v1535_v14 = vadd.f32 %v6269_v13, %v1534_v29  ;;  %v2432_v54 = vld [vmem:[#allocation2 + $0x2f0] sm:$0xff]  ;;  %v2433_v4 = vld [vmem:[#allocation2 + $0x2f8] sm:$0xff]  ;;  %v2430_v29 = vld [vmem:[#allocation2 + $0x2e0] sm:$0xff] }
 0x264   : > { %2434 = vmatpush.msrb.mxu2 %v2432_v54  ;;  %2499 = vmatpush.msra.mxu3 %v2433_v4  ;;  %v1540_v54 = vpop.f32.mrf.mxu3  ;;  %v2181_v4 = vld [vmem:[#allocation2 + $0xb0] sm:$0xff] }
 0x265   : > { %v1918_v53 = vadd.f32 %v1886_v61, %v1732_v46  ;;  %v1892_v61 = vpop.f32.mrf.mxu1  ;;  %2258 = vmatpush.msrb.mxu1 %v2186_v18  ;;  %v2180_v18 = vld [vmem:[#allocation2 + $0xa8] sm:$0xff]  ;;  %v1541_v41 = vadd.f32 %v6269_v13, %v1540_v54  ;;  %v2170_v54 = vld [vmem:[#allocation2 + $0x58] sm:$0xff] }
 0x266   : > { %2435 = vmatpush.msrb.mxu2 %v2430_v29  ;;  %2500 = vmatpush.msra.mxu3 %v2431_v17  ;;  %v2424_v17 = vld [vmem:[#allocation2 + $0x2b0] sm:$0xff] }
 0x267   : > { %v6348_v38 = vmax.f32 %v1918_v53, 0.0  ;;  %v2185_v53 = vld [vmem:[#allocation2 + $0xd0] sm:$0xff]  ;;  %2259 = vmatpush.msrb.mxu1 %v2184_v40 }
 0x268   : > { %2193 = vmatpush.msra.mxu0 %v2185_v53  ;;  %v2179_v53 = vld [vmem:[#allocation2 + $0xa0] sm:$0xff] }
 0x269   : > { %2021 = vmatmul.f32.gmra.mxu2 %v6348_v38  ;;  %2086 = vmatmul.f32.gmra.mxu3 %v6348_v38  ;;  %v2361_v21 = vrot.slane %v6348_v38, 1  ;;  %v2119_v46 = vrot.slane %v6348_v38, 7  ;;  %v2183_v38 = vld [vmem:[#allocation2 + $0xc0] sm:$0xff] }
 0x26a   : > { %v1703_v3 = vpop.f32.mrf.mxu0  ;;  %2194 = vmatpush.msra.mxu0 %v2183_v38  ;;  %2260 = vmatpush.msrb.mxu1 %v2182_v16 }
 0x26b   : > { %v1733_v35 = vadd.f32 %v1703_v3, %v1535_v14  ;;  %v6357_v49 = vsel %vm1181_vm2, %v2360_v23, %v2361_v21  ;;  %v6361_v0 = vsel %vm919_vm3, %v2118_v55, %v2119_v46  ;;  %v2428_v3 = vld [vmem:[#allocation2 + $0x2d0] sm:$0xff]  ;;  %v2429_v14 = vld [vmem:[#allocation2 + $0x2d8] sm:$0xff]  ;;  %v2426_v55 = vld [vmem:[#allocation2 + $0x2c0] sm:$0xff] }
 0x26c   : > { %2436 = vmatpush.msrb.mxu2 %v2428_v3  ;;  %2501 = vmatpush.msra.mxu3 %v2429_v14  ;;  %v2178_v3 = vld [vmem:[#allocation2 + $0x98] sm:$0xff]  ;;  %v2422_v14 = vld [vmem:[#allocation2 + $0x2a0] sm:$0xff] }
 0x26d   : > { %v1919_v62 = vadd.f32 %v1889_v31, %v1733_v35  ;;  %2195 = vmatpush.msra.mxu0 %v2181_v4  ;;  %v1538_v31 = vadd.f32 %v6269_v13, %v1537_v12  ;;  %v2425_v35 = vld [vmem:[#allocation2 + $0x2b8] sm:$0xff]  ;;  %2261 = vmatpush.msrb.mxu1 %v2180_v18  ;;  %v2423_v12 = vld [vmem:[#allocation2 + $0x2a8] sm:$0xff]  ;;  %v1895_v30 = vpop.f32.mrf.mxu1 }
 0x26e   : > { %2437 = vmatpush.msrb.mxu2 %v2426_v55  ;;  %2502 = vmatpush.msra.mxu3 %v2427_v42  ;;  %v2176_v42 = vld [vmem:[#allocation2 + $0x88] sm:$0xff]  ;;  %v2421_v18 = vld [vmem:[#allocation2 + $0x298] sm:$0xff] }
 0x26f   : > { %v6363_v23 = vmax.f32 %v1919_v62, 0.0  ;;  %v2177_v62 = vld [vmem:[#allocation2 + $0x90] sm:$0xff]  ;;  %2196 = vmatpush.msra.mxu0 %v2179_v53  ;;  %2262 = vmatpush.msrb.mxu1 %v2178_v3 }
 0x270   : > { %2438 = vmatpush.msrb.mxu2 %v2424_v17  ;;  %2503 = vmatpush.msra.mxu3 %v2425_v35  ;;  %v2420_v53 = vld [vmem:[#allocation2 + $0x290] sm:$0xff]  ;;  %v2418_v17 = vld [vmem:[#allocation2 + $0x280] sm:$0xff]  ;;  %v2419_v35 = vld [vmem:[#allocation2 + $0x288] sm:$0xff] }
 0x271   : > { %2024 = vmatmul.f32.gmra.mxu2 %v6363_v23  ;;  %2089 = vmatmul.f32.gmra.mxu3 %v6363_v23  ;;  %v2362_v29 = vrot.slane %v6363_v23, 1  ;;  %v2120_v38 = vrot.slane %v6363_v23, 7  ;;  %v2175_v23 = vld [vmem:[#allocation2 + $0x80] sm:$0xff] }
 0x272   : > { %v1706_v40 = vpop.f32.mrf.mxu0  ;;  %2197 = vmatpush.msra.mxu0 %v2177_v62  ;;  %2439 = vmatpush.msrb.mxu2 %v2422_v14  ;;  %v2172_v62 = vld [vmem:[#allocation2 + $0x68] sm:$0xff] }
 0x273   : > { %v1734_v16 = vadd.f32 %v1706_v40, %v1538_v31  ;;  %v6372_v4 = vsel %vm1181_vm2, %v2361_v21, %v2362_v29  ;;  %v6376_v58 = vsel %vm919_vm3, %v2119_v46, %v2120_v38  ;;  %2504 = vmatpush.msra.mxu3 %v2423_v12  ;;  %2263 = vmatpush.msrb.mxu1 %v2176_v42  ;;  %v2173_v21 = vld [vmem:[#allocation2 + $0x70] sm:$0xff]  ;;  %v2174_v40 = vld [vmem:[#allocation2 + $0x78] sm:$0xff]  ;;  %v1543_v46 = vpop.f32.mrf.mxu3 }
 0x274   : > { %2198 = vmatpush.msra.mxu0 %v2175_v23  ;;  %2440 = vmatpush.msrb.mxu2 %v2420_v53  ;;  %v2416_v12 = vld [vmem:[#allocation2 + $0x270] sm:$0xff]  ;;  %v2417_v23 = vld [vmem:[#allocation2 + $0x278] sm:$0xff] }
 0x275   : > { %v1920_v55 = vadd.f32 %v1892_v61, %v1734_v16  ;;  %2505 = vmatpush.msra.mxu3 %v2421_v18  ;;  %v2171_v61 = vld [vmem:[#allocation2 + $0x60] sm:$0xff]  ;;  %2264 = vmatpush.msrb.mxu1 %v2174_v40 }
 0x276   : > { %2199 = vmatpush.msra.mxu0 %v2173_v21  ;;  %2441 = vmatpush.msrb.mxu2 %v2418_v17  ;;  %v2415_v21 = vld [vmem:[#allocation2 + $0x268] sm:$0xff] }
 0x277   : > { %v6378_v31 = vmax.f32 %v1920_v55, 0.0  ;;  %2506 = vmatpush.msra.mxu3 %v2419_v35  ;;  %v2169_v55 = vld [vmem:[#allocation2 + $0x50] sm:$0xff]  ;;  %2265 = vmatpush.msrb.mxu1 %v2172_v62  ;;  %v2168_v17 = vld [vmem:[#allocation2 + $0x48] sm:$0xff]  ;;  %v1898_v35 = vpop.f32.mrf.mxu1  ;;  %v1544_v62 = vadd.f32 %v6269_v13, %v1543_v46 }
 0x278   : > { %2200 = vmatpush.msra.mxu0 %v2171_v61  ;;  %2442 = vmatpush.msrb.mxu2 %v2416_v12  ;;  %v2166_v61 = vld [vmem:[#allocation2 + $0x38] sm:$0xff]  ;;  %v2411_v12 = vld [vmem:[#allocation2 + $0x248] sm:$0xff]  ;;  %v2408_v46 = vld [vmem:[#allocation2 + $0x230] sm:$0xff] }
 0x279   : > { %2027 = vmatmul.f32.gmra.mxu2 %v6378_v31  ;;  %2092 = vmatmul.f32.gmra.mxu3 %v6378_v31  ;;  %v2363_v3 = vrot.slane %v6378_v31, 1  ;;  %v2121_v16 = vrot.slane %v6378_v31, 7  ;;  %v2414_v31 = vld [vmem:[#allocation2 + $0x260] sm:$0xff] }
 0x27a   : > { %v1709_v14 = vpop.f32.mrf.mxu0  ;;  %2507 = vmatpush.msra.mxu3 %v2417_v23  ;;  %2201 = vmatpush.msra.mxu0 %v2169_v55 }
 0x27b   : > { %v1735_v42 = vadd.f32 %v1709_v14, %v1541_v41  ;;  %v6387_v53 = vsel %vm1181_vm2, %v2362_v29, %v2363_v3  ;;  %v6391_v18 = vsel %vm919_vm3, %v2120_v38, %v2121_v16  ;;  %v2167_v41 = vld [vmem:[#allocation2 + $0x40] sm:$0xff]  ;;  %2266 = vmatpush.msrb.mxu1 %v2170_v54  ;;  %2443 = vmatpush.msrb.mxu2 %v2414_v31  ;;  %v2412_v29 = vld [vmem:[#allocation2 + $0x250] sm:$0xff]  ;;  %v1546_v55 = vpop.f32.mrf.mxu3 }
 0x27c   : > { %8753 = vst [vmem:[#allocation38_spill] sm:$0xff] %v6391_v18  ;;  %2508 = vmatpush.msra.mxu3 %v2415_v21  ;;  %2202 = vmatpush.msra.mxu0 %v2167_v41  ;;  %v2165_v38 = vld [vmem:[#allocation2 + $0x30] sm:$0xff]  ;;  %v2163_v31 = vld [vmem:[#allocation2 + $0x20] sm:$0xff]  ;;  %v2164_v21 = vld [vmem:[#allocation2 + $0x28] sm:$0xff] }
 0x27d   : > { %v1921_v40 = vadd.f32 %v1895_v30, %v1735_v42  ;;  %2267 = vmatpush.msrb.mxu1 %v2168_v17  ;;  %v2410_v30 = vld [vmem:[#allocation2 + $0x240] sm:$0xff]  ;;  %2444 = vmatpush.msrb.mxu2 %v2412_v29  ;;  %v2409_v41 = vld [vmem:[#allocation2 + $0x238] sm:$0xff] }
 0x27e   : > { %2509 = vmatpush.msra.mxu3 %v2413_v8  ;;  %2203 = vmatpush.msra.mxu0 %v2165_v38  ;;  %v2162_v29 = vld [vmem:[#allocation2 + $0x18] sm:$0xff]  ;;  %v2407_v38 = vld [vmem:[#allocation2 + $0x228] sm:$0xff] }
 0x27f   : > { %v6393_v14 = vmax.f32 %v1921_v40, 0.0  ;;  %2268 = vmatpush.msrb.mxu1 %v2166_v61  ;;  %2445 = vmatpush.msrb.mxu2 %v2410_v30  ;;  %v2405_v30 = vld [vmem:[#allocation2 + $0x218] sm:$0xff] }
 0x280   : > { %2510 = vmatpush.msra.mxu3 %v2411_v12  ;;  %2204 = vmatpush.msra.mxu0 %v2163_v31  ;;  %v1547_v12 = vadd.f32 %v6269_v13, %v1546_v55 }
 0x281   : > { %2030 = vmatmul.f32.gmra.mxu2 %v6393_v14  ;;  %2095 = vmatmul.f32.gmra.mxu3 %v6393_v14  ;;  %v2364_v23 = vrot.slane %v6393_v14, 1  ;;  %v2122_v42 = vrot.slane %v6393_v14, 7  ;;  %v2161_v14 = vld [vmem:[#allocation2 + $0x10] sm:$0xff] }
 0x282   : > { %v1712_v54 = vpop.f32.mrf.mxu0  ;;  %2269 = vmatpush.msrb.mxu1 %v2164_v21  ;;  %2446 = vmatpush.msrb.mxu2 %v2408_v46  ;;  %v2403_v46 = vld [vmem:[#allocation2 + $0x208] sm:$0xff] }
 0x283   : > { %v1736_v40 = vadd.f32 %v1712_v54, %v1544_v62  ;;  %v6402_v17 = vsel %vm1181_vm2, %v2363_v3, %v2364_v23  ;;  %v6406_v18 = vsel %vm919_vm3, %v2121_v16, %v2122_v42  ;;  %v2406_v62 = vld [vmem:[#allocation2 + $0x220] sm:$0xff]  ;;  %2511 = vmatpush.msra.mxu3 %v2409_v41  ;;  %2205 = vmatpush.msra.mxu0 %v2161_v14  ;;  %v2160_v54 = vld [vmem:[#allocation2 + $0x8] sm:$0xff]  ;;  %v2404_v16 = vld [vmem:[#allocation2 + $0x210] sm:$0xff]  ;;  %v1549_v55 = vpop.f32.mrf.mxu3 }
 0x284   : > { %8754 = vst [vmem:[#allocation39_spill] sm:$0xff] %v6402_v17  ;;  %2270 = vmatpush.msrb.mxu1 %v2162_v29  ;;  %v2159_v3 = vld [vmem:[#allocation2] sm:$0xff]  ;;  %v1901_v17 = vpop.f32.mrf.mxu1  ;;  %2447 = vmatpush.msrb.mxu2 %v2406_v62 }
 0x285   : > { %v1922_v8 = vadd.f32 %v1898_v35, %v1736_v40  ;;  %2512 = vmatpush.msra.mxu3 %v2407_v38  ;;  %2206 = vmatpush.msra.mxu0 %v2159_v3  ;;  %v2402_v40 = vld [vmem:[#allocation2 + $0x200] sm:$0xff]  ;;  %v1550_v38 = vadd.f32 %v6269_v13, %v1549_v55 }
 0x286   : > { %2271 = vmatpush.msrb.mxu1 %v2160_v54  ;;  %2448 = vmatpush.msrb.mxu2 %v2404_v16 }
 0x287   : > { %v1938_v61 = vmax.f32 %v1922_v8, 0.0  ;;  %2513 = vmatpush.msra.mxu3 %v2405_v30 }
 0x288   : > { %2449 = vmatpush.msrb.mxu2 %v2402_v40 }
 0x289   : > { %2033 = vmatmul.f32.gmra.mxu2 %v1938_v61  ;;  %2098 = vmatmul.f32.gmra.mxu3 %v1938_v61  ;;  %v2365_v35 = vrot.slane %v1938_v61, 1  ;;  %v2123_v31 = vrot.slane %v1938_v61, 7 }
 0x28a   : > { %v1715_v21 = vpop.f32.mrf.mxu0  ;;  %2514 = vmatpush.msra.mxu3 %v2403_v46 }
 0x28b   : > { %v1737_v41 = vadd.f32 %v1715_v21, %v1547_v12  ;;  %v6411_v14 = vsel %vm1181_vm2, %v2364_v23, %v2365_v35  ;;  %v6415_v29 = vsel %vm919_vm3, %v2122_v42, %v2123_v31  ;;  %v1552_v12 = vpop.f32.mrf.mxu3 }
 0x28c   : > { %v1904_v54 = vpop.f32.mrf.mxu1  ;;  %v1553_v40 = vadd.f32 %v6269_v13, %v1552_v12 }
 0x28d   : > { %v1923_v8 = vadd.f32 %v1901_v17, %v1737_v41 }
 0x28f   : > { %v1939_v62 = vmax.f32 %v1923_v8, 0.0 }
 0x291   : > { %2036 = vmatmul.f32.gmra.mxu2 %v1939_v62  ;;  %2101 = vmatmul.f32.gmra.mxu3 %v1939_v62  ;;  %v2366_v61 = vrot.slane %v1939_v62, 1  ;;  %v2124_v3 = vrot.slane %v1939_v62, 7 }
 0x292   : > { %v1718_v16 = vpop.f32.mrf.mxu0 }
 0x293   : > { %v1738_v30 = vadd.f32 %v1718_v16, %v1550_v38  ;;  %v6420_v23 = vsel %vm1181_vm2, %v2365_v35, %v2366_v61  ;;  %v6424_v42 = vsel %vm919_vm3, %v2123_v31, %v2124_v3 }
 0x294   : > { %v1907_v31 = vpop.f32.mrf.mxu1 }
 0x295   : > { %v1924_v17 = vadd.f32 %v1904_v54, %v1738_v30  ;;  %v8636_v30 = vrot.slane %v6273_v32, 1 }
 0x297   : > { %v1940_v21 = vmax.f32 %v1924_v17, 0.0 }
 0x299   : > { %2039 = vmatmul.f32.gmra.mxu2 %v1940_v21  ;;  %2104 = vmatmul.f32.gmra.mxu3 %v1940_v21  ;;  %v2367_v46 = vrot.slane %v1940_v21, 1  ;;  %v2125_v41 = vrot.slane %v1940_v21, 7 }
 0x29a   : > { %v1721_v55 = vpop.f32.mrf.mxu0 }
 0x29b   : > { %v1739_v8 = vadd.f32 %v1721_v55, %v1553_v40  ;;  %v6429_v62 = vsel %vm1181_vm2, %v2366_v61, %v2367_v46  ;;  %v6433_v35 = vsel %vm919_vm3, %v2124_v3, %v2125_v41  ;;  %v8755_v61 = vrot.slane %v6273_v32, 7 }
 0x29c   : > { %v8756_v40 = vrot.slane %v6278_v37, 1  ;;  %v2386_v37 = vmul.f32 %v6297_v63, %v5693_v34  ;;  %v2146_v63 = vmul.f32 %v6310_v19, %v5756_v1 }
 0x29d   : > { %v1925_v38 = vadd.f32 %v1907_v31, %v1739_v8 }
 0x29e   : > { %v2383_v55 = vsel %vm1181_vm2, %v8636_v30, %v8756_v40  ;;  %v2388_v40 = vmul.f32 %v6315_v27, %v5740_v57  ;;  %v2148_v27 = vmul.f32 %v6328_v50, %v5794_v22 }
 0x29f   : > { %v6435_v54 = vmax.f32 %v1925_v38, 0.0  ;;  %v2385_v8 = vmul.f32 %v2383_v55, %v5691_v33 }
 0x2a1   : > { %v2126_v13 = vrot.slane %v6435_v54, 7  ;;  %2042 = vmatmul.f32.gmra.mxu2 %v6435_v54  ;;  %2107 = vmatmul.f32.gmra.mxu3 %v6435_v54  ;;  %v8635_v16 = vrot.slane %v6435_v54, 1 }
 0x2a3   : > { %v2142_v3 = vsel %vm919_vm3, %v2126_v13, %v8755_v61  ;;  %v6450_v17 = vsel %vm1181_vm2, %v2367_v46, %v8635_v16  ;;  %v6454_v12 = vsel %vm919_vm3, %v2125_v41, %v2126_v13  ;;  %v2144_v41 = vmul.f32 %v6289_v7, %v5719_v48  ;;  %v2658_v16 = vld [vmem:[#allocation4 + $0x1e8] sm:$0xff] }
 0x2a4   : > { %v2143_v21 = vmul.f32 %v2142_v3, %v5716_v45  ;;  %v2145_v61 = vmul.f32 %v6301_v51, %v5736_v56  ;;  %v2387_v3 = vmul.f32 %v6306_v59, %v5713_v43  ;;  %v2147_v59 = vmul.f32 %v6319_v20, %v5773_v9 }
 0x2a6   : > { %2207 = vmatmul.f32.vlgmr.msra.gmra.mxu0 %v2143_v21  ;;  %2272 = vmatmul.f32.vlgmr.msrb.gmra.mxu1 %v2143_v21 }
 0x2a9   : > { %2450 = vmatmul.f32.vlgmr.msrb.gmra.mxu2 %v2385_v8  ;;  %2515 = vmatmul.f32.vlgmr.msra.gmra.mxu3 %v2385_v8  ;;  %v2389_v8 = vmul.f32 %v6324_v15, %v5759_v2  ;;  %v2149_v15 = vmul.f32 %v6337_v26, %v5818_v39 }
 0x2ac   : > { %v6464_v46 = vpop.f32.mrf.mxu2  ;;  %v6466_v31 = vpop.f32.mrf.mxu3 }
 0x2ae   : > { %2210 = vmatmul.f32.gmra.mxu0 %v2144_v41  ;;  %2275 = vmatmul.f32.gmra.mxu1 %v2144_v41 }
 0x2b1   : > { %2453 = vmatmul.f32.gmra.mxu2 %v2386_v37  ;;  %2518 = vmatmul.f32.gmra.mxu3 %v2386_v37  ;;  %v2390_v37 = vmul.f32 %v6333_v44, %v5778_v11  ;;  %v2150_v44 = vmul.f32 %v6346_v5, %v5830_v47 }
 0x2b4   : > { %v6472_v38 = vpop.f32.mrf.mxu2  ;;  %v6474_v13 = vpop.f32.mrf.mxu3 }
 0x2b6   : > { %2213 = vmatmul.f32.gmra.mxu0 %v2145_v61  ;;  %2278 = vmatmul.f32.gmra.mxu1 %v2145_v61 }
 0x2b9   : > { %2456 = vmatmul.f32.gmra.mxu2 %v2387_v3  ;;  %2521 = vmatmul.f32.gmra.mxu3 %v2387_v3  ;;  %v2391_v3 = vmul.f32 %v6342_v10, %v5800_v24  ;;  %v2151_v10 = vmul.f32 %v6361_v0, %v5851_v60  ;;  %v2644_v0 = vld [vmem:[#allocation4 + $0x178] sm:$0xff] }
 0x2ba   : > { %2665 = vmatpush.msrb.mxu0 %v2644_v0  ;;  %v2641_v0 = vld [vmem:[#allocation4 + $0x160] sm:$0xff] }
 0x2bc   : > { %v6480_v7 = vpop.f32.mrf.mxu2  ;;  %v6482_v21 = vpop.f32.mrf.mxu3 }
 0x2be   : > { %2216 = vmatmul.f32.gmra.mxu0 %v2146_v63  ;;  %2281 = vmatmul.f32.gmra.mxu1 %v2146_v63 }
 0x2c1   : > { %2459 = vmatmul.f32.gmra.mxu2 %v2388_v40  ;;  %2524 = vmatmul.f32.gmra.mxu3 %v2388_v40  ;;  %v2392_v40 = vmul.f32 %v6357_v49, %v5814_v36  ;;  %v2152_v49 = vmul.f32 %v6376_v58, %v5868_v6  ;;  %v2656_v6 = vld [vmem:[#allocation4 + $0x1d8] sm:$0xff] }
 0x2c4   : > { %v6488_v51 = vpop.f32.mrf.mxu2  ;;  %v6490_v55 = vpop.f32.mrf.mxu3 }
 0x2c6   : > { %2219 = vmatmul.f32.gmra.mxu0 %v2147_v59  ;;  %2284 = vmatmul.f32.gmra.mxu1 %v2147_v59 }
 0x2c9   : > { %2462 = vmatmul.f32.gmra.mxu2 %v2389_v8  ;;  %2527 = vmatmul.f32.gmra.mxu3 %v2389_v8  ;;  %v2393_v8 = vmul.f32 %v6372_v4, %v5840_v52  ;;  %v2643_v4 = vld [vmem:[#allocation4 + $0x170] sm:$0xff] }
 0x2ca   : > { %2666 = vmatpush.msrb.mxu0 %v2643_v4 }
 0x2cc   : > { %v6496_v19 = vpop.f32.mrf.mxu2  ;;  %v6498_v41 = vpop.f32.mrf.mxu3 }
 0x2ce   : > { %2222 = vmatmul.f32.gmra.mxu0 %v2148_v27  ;;  %2287 = vmatmul.f32.gmra.mxu1 %v2148_v27 }
 0x2d1   : > { %2465 = vmatmul.f32.gmra.mxu2 %v2390_v37  ;;  %2530 = vmatmul.f32.gmra.mxu3 %v2390_v37  ;;  %v8757_v37 = vld [vmem:[#allocation24_spill] sm:$0xff] }
 0x2d4   : > { %v6504_v20 = vpop.f32.mrf.mxu2  ;;  %v6506_v61 = vpop.f32.mrf.mxu3 }
 0x2d6   : > { %2225 = vmatmul.f32.gmra.mxu0 %v2149_v15  ;;  %2290 = vmatmul.f32.gmra.mxu1 %v2149_v15  ;;  %v2394_v15 = vmul.f32 %v6387_v53, %v8757_v37  ;;  %v8759_v53 = vld [vmem:[#allocation26_spill] sm:$0xff]  ;;  %v2640_v37 = vld [vmem:[#allocation4 + $0x158] sm:$0xff] }
 0x2d9   : > { %2468 = vmatmul.f32.gmra.mxu2 %v2391_v3  ;;  %2533 = vmatmul.f32.gmra.mxu3 %v2391_v3  ;;  %v2660_v3 = vld [vmem:[#allocation4 + $0x1f8] sm:$0xff] }
 0x2da   : > { %2730 = vmatpush.msra.mxu1 %v2660_v3  ;;  %v2657_v3 = vld [vmem:[#allocation4 + $0x1e0] sm:$0xff] }
 0x2dc   : > { %v6512_v50 = vpop.f32.mrf.mxu2  ;;  %v6514_v63 = vpop.f32.mrf.mxu3 }
 0x2de   : > { %2228 = vmatmul.f32.gmra.mxu0 %v2150_v44  ;;  %2293 = vmatmul.f32.gmra.mxu1 %v2150_v44  ;;  %v2659_v44 = vld [vmem:[#allocation4 + $0x1f0] sm:$0xff] }
 0x2df   : > { %2731 = vmatpush.msra.mxu1 %v2659_v44  ;;  %v8761_v44 = vld [vmem:[#allocation30_spill] sm:$0xff] }
 0x2e1   : > { %2471 = vmatmul.f32.gmra.mxu2 %v2392_v40  ;;  %2536 = vmatmul.f32.gmra.mxu3 %v2392_v40 }
 0x2e2   : > { %2732 = vmatpush.msra.mxu1 %v2658_v16  ;;  %v8762_v16 = vld [vmem:[#allocation28_spill] sm:$0xff] }
 0x2e4   : > { %v6520_v26 = vpop.f32.mrf.mxu2  ;;  %v6522_v59 = vpop.f32.mrf.mxu3  ;;  %2733 = vmatpush.msra.mxu1 %v2657_v3  ;;  %v2654_v3 = vld [vmem:[#allocation4 + $0x1c8] sm:$0xff] }
 0x2e6   : > { %2231 = vmatmul.f32.gmra.mxu0 %v2151_v10  ;;  %2296 = vmatmul.f32.gmra.mxu1 %v2151_v10 }
 0x2e7   : > { %2734 = vmatpush.msra.mxu1 %v2656_v6 }
 0x2e9   : > { %2474 = vmatmul.f32.gmra.mxu2 %v2393_v8  ;;  %2539 = vmatmul.f32.gmra.mxu3 %v2393_v8  ;;  %v8758_v8 = vld [vmem:[#allocation38_spill] sm:$0xff] }
 0x2ea   : > { %v2153_v58 = vmul.f32 %v8758_v8, %v5886_v25  ;;  %v2653_v25 = vld [vmem:[#allocation4 + $0x1c0] sm:$0xff] }
 0x2ec   : > { %v6528_v5 = vpop.f32.mrf.mxu2  ;;  %v6530_v27 = vpop.f32.mrf.mxu3 }
 0x2ee   : > { %2234 = vmatmul.f32.gmra.mxu0 %v2152_v49  ;;  %2299 = vmatmul.f32.gmra.mxu1 %v2152_v49  ;;  %v2642_v49 = vld [vmem:[#allocation4 + $0x168] sm:$0xff] }
 0x2ef   : > { %2667 = vmatpush.msrb.mxu0 %v2642_v49  ;;  %v2655_v49 = vld [vmem:[#allocation4 + $0x1d0] sm:$0xff] }
 0x2f0   : > { %2735 = vmatpush.msra.mxu1 %v2655_v49  ;;  %v8764_v49 = vld [vmem:[#allocation29_spill] sm:$0xff] }
 0x2f1   : > { %2477 = vmatmul.f32.gmra.mxu2 %v2394_v15  ;;  %2542 = vmatmul.f32.gmra.mxu3 %v2394_v15  ;;  %v8760_v15 = vld [vmem:[#allocation39_spill] sm:$0xff] }
 0x2f2   : > { %v2395_v30 = vmul.f32 %v8760_v15, %v8759_v53  ;;  %2668 = vmatpush.msrb.mxu0 %v2641_v0  ;;  %v2639_v15 = vld [vmem:[#allocation4 + $0x150] sm:$0xff]  ;;  %v2638_v0 = vld [vmem:[#allocation4 + $0x148] sm:$0xff]  ;;  %v2637_v53 = vld [vmem:[#allocation4 + $0x140] sm:$0xff]  ;;  %2736 = vmatpush.msra.mxu1 %v2654_v3 }
 0x2f3   : > { %v2651_v3 = vld [vmem:[#allocation4 + $0x1b0] sm:$0xff] }
 0x2f4   : > { %v6536_v40 = vpop.f32.mrf.mxu2  ;;  %v6538_v10 = vpop.f32.mrf.mxu3  ;;  %2669 = vmatpush.msrb.mxu0 %v2640_v37  ;;  %v8763_v37 = vld [vmem:[#allocation31_spill] sm:$0xff]  ;;  %2737 = vmatpush.msra.mxu1 %v2653_v25 }
 0x2f6   : > { %2237 = vmatmul.f32.gmra.mxu0 %v2153_v58  ;;  %2302 = vmatmul.f32.gmra.mxu1 %v2153_v58  ;;  %v2154_v58 = vmul.f32 %v6406_v18, %v8761_v44  ;;  %v2650_v44 = vld [vmem:[#allocation4 + $0x1a8] sm:$0xff] }
 0x2f7   : > { %2670 = vmatpush.msrb.mxu0 %v2639_v15  ;;  %v2652_v15 = vld [vmem:[#allocation4 + $0x1b8] sm:$0xff] }
 0x2f8   : > { %2738 = vmatpush.msra.mxu1 %v2652_v15  ;;  %v8766_v15 = vld [vmem:[#allocation32_spill] sm:$0xff] }
 0x2f9   : > { %2480 = vmatmul.f32.gmra.mxu2 %v2395_v30  ;;  %2545 = vmatmul.f32.gmra.mxu3 %v2395_v30  ;;  %v2396_v30 = vmul.f32 %v6411_v14, %v8762_v16  ;;  %v2636_v14 = vld [vmem:[#allocation4 + $0x138] sm:$0xff]  ;;  %v2634_v16 = vld [vmem:[#allocation4 + $0x128] sm:$0xff] }
 0x2fa   : > { %2671 = vmatpush.msrb.mxu0 %v2638_v0  ;;  %v2635_v0 = vld [vmem:[#allocation4 + $0x130] sm:$0xff]  ;;  %2739 = vmatpush.msra.mxu1 %v2651_v3  ;;  %v2648_v3 = vld [vmem:[#allocation4 + $0x198] sm:$0xff] }
 0x2fc   : > { %v6544_v8 = vpop.f32.mrf.mxu2  ;;  %v6546_v4 = vpop.f32.mrf.mxu3  ;;  %2672 = vmatpush.msrb.mxu0 %v2637_v53  ;;  %v8765_v53 = vld [vmem:[#allocation33_spill] sm:$0xff]  ;;  %2740 = vmatpush.msra.mxu1 %v2650_v44 }
 0x2fe   : > { %2240 = vmatmul.f32.gmra.mxu0 %v2154_v58  ;;  %2305 = vmatmul.f32.gmra.mxu1 %v2154_v58  ;;  %v2155_v58 = vmul.f32 %v6415_v29, %v8763_v37  ;;  %v2647_v37 = vld [vmem:[#allocation4 + $0x190] sm:$0xff] }
 0x2ff   : > { %2673 = vmatpush.msrb.mxu0 %v2636_v14  ;;  %v2649_v14 = vld [vmem:[#allocation4 + $0x1a0] sm:$0xff] }
 0x300   : > { %2741 = vmatpush.msra.mxu1 %v2649_v14  ;;  %v8768_v14 = vld [vmem:[#allocation34_spill] sm:$0xff] }
 0x301   : > { %2483 = vmatmul.f32.gmra.mxu2 %v2396_v30  ;;  %2548 = vmatmul.f32.gmra.mxu3 %v2396_v30  ;;  %v2397_v30 = vmul.f32 %v6420_v23, %v8764_v49  ;;  %v2633_v23 = vld [vmem:[#allocation4 + $0x120] sm:$0xff]  ;;  %v2631_v49 = vld [vmem:[#allocation4 + $0x110] sm:$0xff] }
 0x302   : > { %2674 = vmatpush.msrb.mxu0 %v2635_v0  ;;  %v2632_v0 = vld [vmem:[#allocation4 + $0x118] sm:$0xff]  ;;  %2742 = vmatpush.msra.mxu1 %v2648_v3  ;;  %v2645_v3 = vld [vmem:[#allocation4 + $0x180] sm:$0xff] }
 0x304   : > { %v6552_v18 = vpop.f32.mrf.mxu2  ;;  %v6554_v6 = vpop.f32.mrf.mxu3  ;;  %2675 = vmatpush.msrb.mxu0 %v2634_v16  ;;  %v8767_v16 = vld [vmem:[#allocation36_spill] sm:$0xff]  ;;  %2743 = vmatpush.msra.mxu1 %v2647_v37  ;;  %v8769_v37 = vld [vmem:[#allocation37_spill] sm:$0xff] }
 0x306   : > { %2243 = vmatmul.f32.gmra.mxu0 %v2155_v58  ;;  %2308 = vmatmul.f32.gmra.mxu1 %v2155_v58  ;;  %v2156_v58 = vmul.f32 %v6424_v42, %v8765_v53 }
 0x307   : > { %2676 = vmatpush.msrb.mxu0 %v2633_v23  ;;  %v2646_v23 = vld [vmem:[#allocation4 + $0x188] sm:$0xff] }
 0x308   : > { %2744 = vmatpush.msra.mxu1 %v2646_v23 }
 0x309   : > { %2486 = vmatmul.f32.gmra.mxu2 %v2397_v30  ;;  %2551 = vmatmul.f32.gmra.mxu3 %v2397_v30  ;;  %v2398_v30 = vmul.f32 %v6429_v62, %v8766_v15  ;;  %v2630_v62 = vld [vmem:[#allocation4 + $0x108] sm:$0xff] }
 0x30a   : > { %2677 = vmatpush.msrb.mxu0 %v2632_v0  ;;  %v2629_v0 = vld [vmem:[#allocation4 + $0x100] sm:$0xff]  ;;  %2745 = vmatpush.msra.mxu1 %v2645_v3 }
 0x30c   : > { %v6560_v29 = vpop.f32.mrf.mxu2  ;;  %v6562_v25 = vpop.f32.mrf.mxu3  ;;  %2678 = vmatpush.msrb.mxu0 %v2631_v49  ;;  %v2158_v49 = vmul.f32 %v6454_v12, %v8769_v37 }
 0x30e   : > { %2246 = vmatmul.f32.gmra.mxu0 %v2156_v58  ;;  %2311 = vmatmul.f32.gmra.mxu1 %v2156_v58  ;;  %v2157_v58 = vmul.f32 %v6433_v35, %v8767_v16  ;;  %v8771_v16 = vrot.slane %v6435_v54, 1 }
 0x30f   : > { %2679 = vmatpush.msrb.mxu0 %v2630_v62  ;;  %v8772_v62 = vld [vmem:[#allocation35_spill] sm:$0xff] }
 0x311   : > { %2489 = vmatmul.f32.gmra.mxu2 %v2398_v30  ;;  %2554 = vmatmul.f32.gmra.mxu3 %v2398_v30  ;;  %v2399_v30 = vmul.f32 %v6450_v17, %v8768_v14 }
 0x312   : > { %2680 = vmatpush.msrb.mxu0 %v2629_v0 }
 0x314   : > { %v6568_v42 = vpop.f32.mrf.mxu2  ;;  %v6570_v44 = vpop.f32.mrf.mxu3 }
 0x316   : > { %2249 = vmatmul.f32.gmra.mxu0 %v2157_v58  ;;  %2314 = vmatmul.f32.gmra.mxu1 %v2157_v58  ;;  %v8770_v58 = vrot.slane %v6273_v32, 1 }
 0x318   : > { %v2384_v17 = vsel %vm1181_vm2, %v8771_v16, %v8770_v58 }
 0x319   : > { %2492 = vmatmul.f32.gmra.mxu2 %v2399_v30  ;;  %2557 = vmatmul.f32.gmra.mxu3 %v2399_v30  ;;  %v2400_v23 = vmul.f32 %v2384_v17, %v8772_v62  ;;  %v1975_v30 = vld [vmem:[%s8588_s10] sm:$0x3] }
 0x31a   : > { %v6596_v54 = vperm.slane %v1975_v30, 0  ;;  %v6598_v37 = vperm.slane %v1975_v30, 1 }
 0x31c   : > { %v6576_v15 = vpop.f32.mrf.mxu2  ;;  %v6578_v35 = vpop.f32.mrf.mxu3  ;;  %v1999_v16 = vadd.f32 %v6464_v46, %v6596_v54  ;;  %v2002_v30 = vadd.f32 %v6472_v38, %v6596_v54  ;;  %v2067_v46 = vadd.f32 %v6474_v13, %v6598_v37  ;;  %v2005_v38 = vadd.f32 %v6480_v7, %v6596_v54 }
 0x31d   : > { %v2070_v13 = vadd.f32 %v6482_v21, %v6598_v37 }
 0x31e   : > { %2252 = vmatmul.f32.gmra.mxu0 %v2158_v49  ;;  %2317 = vmatmul.f32.gmra.mxu1 %v2158_v49  ;;  %v2064_v49 = vadd.f32 %v6466_v31, %v6598_v37 }
 0x321   : > { %2495 = vmatmul.f32.gmra.mxu2 %v2400_v23  ;;  %2560 = vmatmul.f32.gmra.mxu3 %v2400_v23 }
 0x323   : > { %v2208_v0 = vpop.f32.mrf.mxu0  ;;  %v2273_v3 = vpop.f32.mrf.mxu1 }
 0x324   : > { %v6592_v12 = vpop.f32.mrf.mxu2  ;;  %v6594_v32 = vpop.f32.mrf.mxu3  ;;  %v2321_v58 = vadd.f32 %v2208_v0, %v1999_v16  ;;  %v2322_v17 = vadd.f32 %v2273_v3, %v2064_v49 }
 0x32b   : > { %v2211_v23 = vpop.f32.mrf.mxu0  ;;  %v2276_v62 = vpop.f32.mrf.mxu1 }
 0x32c   : > { %v2451_v14 = vpop.f32.mrf.mxu2  ;;  %v2516_v53 = vpop.f32.mrf.mxu3  ;;  %v2323_v31 = vadd.f32 %v2211_v23, %v2002_v30  ;;  %v2324_v0 = vadd.f32 %v2276_v62, %v2067_v46 }
 0x32d   : > { %v2564_v52 = vadd.f32 %v2451_v14, %v2321_v58  ;;  %v2565_v60 = vadd.f32 %v2516_v53, %v2322_v17 }
 0x32f   : > { %v6604_v36 = vmax.f32 %v2564_v52, 0.0  ;;  %v6606_v47 = vmax.f32 %v2565_v60, 0.0 }
 0x331   : > { %2681 = vmatmul.f32.vlgmr.msrb.gmra.mxu0 %v6604_v36  ;;  %2746 = vmatmul.f32.vlgmr.msra.gmra.mxu1 %v6606_v47  ;;  %v8651_v17 = vrot.slane %v6604_v36, 7  ;;  %v8658_v62 = vrot.slane %v6606_v47, 7 }
 0x333   : > { %v2214_v3 = vpop.f32.mrf.mxu0  ;;  %v2279_v16 = vpop.f32.mrf.mxu1 }
 0x334   : > { %v2454_v14 = vpop.f32.mrf.mxu2  ;;  %v2519_v53 = vpop.f32.mrf.mxu3  ;;  %v2325_v46 = vadd.f32 %v2214_v3, %v2005_v38  ;;  %v2008_v38 = vadd.f32 %v6488_v51, %v6596_v54 }
 0x335   : > { %v2566_v52 = vadd.f32 %v2454_v14, %v2323_v31  ;;  %v2567_v49 = vadd.f32 %v2519_v53, %v2324_v0  ;;  %v2326_v31 = vadd.f32 %v2279_v16, %v2070_v13  ;;  %v2073_v13 = vadd.f32 %v6490_v55, %v6598_v37 }
 0x337   : > { %v6614_v60 = vmax.f32 %v2566_v52, 0.0  ;;  %v6616_v58 = vmax.f32 %v2567_v49, 0.0 }
 0x339   : > { %v2797_v23 = vrot.slane %v6614_v60, 7  ;;  %v2798_v30 = vrot.slane %v6616_v58, 7  ;;  %2684 = vmatmul.f32.gmra.mxu0 %v6614_v60  ;;  %2749 = vmatmul.f32.gmra.mxu1 %v6616_v58  ;;  %v8662_v39 = vrot.slane %v6616_v58, 1 }
 0x33b   : > { %v2217_v0 = vpop.f32.mrf.mxu0  ;;  %v2282_v14 = vpop.f32.mrf.mxu1  ;;  %v6632_v7 = vsel %vm919_vm3, %v8651_v17, %v2797_v23  ;;  %v6638_v21 = vsel %vm919_vm3, %v8658_v62, %v2798_v30  ;;  %v8661_v17 = vrot.slane %v6614_v60, 1 }
 0x33c   : > { %v2457_v53 = vpop.f32.mrf.mxu2  ;;  %v2522_v52 = vpop.f32.mrf.mxu3 }
 0x33d   : > { %v2568_v49 = vadd.f32 %v2457_v53, %v2325_v46  ;;  %v2569_v24 = vadd.f32 %v2522_v52, %v2326_v31  ;;  %v2327_v46 = vadd.f32 %v2217_v0, %v2008_v38  ;;  %v2328_v31 = vadd.f32 %v2282_v14, %v2073_v13 }
 0x33f   : > { %v2600_v3 = vmax.f32 %v2568_v49, 0.0  ;;  %v2601_v16 = vmax.f32 %v2569_v24, 0.0 }
 0x341   : > { %v2799_v11 = vrot.slane %v2600_v3, 7  ;;  %v3073_v22 = vrot.slane %v2600_v3, 1  ;;  %v2800_v62 = vrot.slane %v2601_v16, 7  ;;  %v3074_v2 = vrot.slane %v2601_v16, 1  ;;  %2687 = vmatmul.f32.gmra.mxu0 %v2600_v3  ;;  %2752 = vmatmul.f32.gmra.mxu1 %v2601_v16 }
 0x343   : > { %v2220_v53 = vpop.f32.mrf.mxu0  ;;  %v2285_v24 = vpop.f32.mrf.mxu1  ;;  %v6650_v51 = vsel %vm1181_vm2, %v8661_v17, %v3073_v22  ;;  %v6656_v55 = vsel %vm1181_vm2, %v8662_v39, %v3074_v2  ;;  %v6660_v52 = vsel %vm919_vm3, %v2797_v23, %v2799_v11  ;;  %v6664_v0 = vsel %vm919_vm3, %v2798_v30, %v2800_v62 }
 0x344   : > { %8773 = vst [vmem:[#allocation38_spill] sm:$0xff] %v6660_v52  ;;  %v2460_v14 = vpop.f32.mrf.mxu2  ;;  %v2525_v49 = vpop.f32.mrf.mxu3  ;;  %v2011_v17 = vadd.f32 %v6496_v19, %v6596_v54  ;;  %v2076_v39 = vadd.f32 %v6498_v41, %v6598_v37 }
 0x345   : > { %8774 = vst [vmem:[#allocation39_spill] sm:$0xff] %v6664_v0  ;;  %v2570_v3 = vadd.f32 %v2460_v14, %v2327_v46  ;;  %v2571_v16 = vadd.f32 %v2525_v49, %v2328_v31 }
 0x346   : > { %v2329_v30 = vadd.f32 %v2220_v53, %v2011_v17  ;;  %v2330_v43 = vadd.f32 %v2285_v24, %v2076_v39 }
 0x347   : > { %v2602_v38 = vmax.f32 %v2570_v3, 0.0  ;;  %v2603_v13 = vmax.f32 %v2571_v16, 0.0 }
 0x349   : > { %v2801_v9 = vrot.slane %v2602_v38, 7  ;;  %v3075_v57 = vrot.slane %v2602_v38, 1  ;;  %v2802_v23 = vrot.slane %v2603_v13, 7  ;;  %v3076_v1 = vrot.slane %v2603_v13, 1  ;;  %2690 = vmatmul.f32.gmra.mxu0 %v2602_v38  ;;  %2755 = vmatmul.f32.gmra.mxu1 %v2603_v13 }
 0x34b   : > { %v2223_v0 = vpop.f32.mrf.mxu0  ;;  %v2288_v52 = vpop.f32.mrf.mxu1  ;;  %v6672_v46 = vsel %vm1181_vm2, %v3073_v22, %v3075_v57  ;;  %v6676_v19 = vsel %vm1181_vm2, %v3074_v2, %v3076_v1  ;;  %v6680_v41 = vsel %vm919_vm3, %v2799_v11, %v2801_v9  ;;  %v6684_v31 = vsel %vm919_vm3, %v2800_v62, %v2802_v23 }
 0x34c   : > { %8775 = vst [vmem:[#allocation40_spill] sm:$0xff] %v6680_v41  ;;  %v2463_v17 = vpop.f32.mrf.mxu2  ;;  %v2528_v39 = vpop.f32.mrf.mxu3  ;;  %v2014_v22 = vadd.f32 %v6504_v20, %v6596_v54  ;;  %v2079_v2 = vadd.f32 %v6506_v61, %v6598_v37 }
 0x34d   : > { %8776 = vst [vmem:[#allocation41_spill] sm:$0xff] %v6684_v31  ;;  %v2572_v53 = vadd.f32 %v2463_v17, %v2329_v30  ;;  %v2573_v24 = vadd.f32 %v2528_v39, %v2330_v43 }
 0x34e   : > { %v2331_v62 = vadd.f32 %v2223_v0, %v2014_v22  ;;  %v2332_v13 = vadd.f32 %v2288_v52, %v2079_v2 }
 0x34f   : > { %v2604_v14 = vmax.f32 %v2572_v53, 0.0  ;;  %v2605_v49 = vmax.f32 %v2573_v24, 0.0 }
 0x351   : > { %v2803_v3 = vrot.slane %v2604_v14, 7  ;;  %v3077_v16 = vrot.slane %v2604_v14, 1  ;;  %v2804_v11 = vrot.slane %v2605_v49, 7  ;;  %v3078_v38 = vrot.slane %v2605_v49, 1  ;;  %2693 = vmatmul.f32.gmra.mxu0 %v2604_v14  ;;  %2758 = vmatmul.f32.gmra.mxu1 %v2605_v49 }
 0x353   : > { %v2226_v31 = vpop.f32.mrf.mxu0  ;;  %v2291_v41 = vpop.f32.mrf.mxu1  ;;  %v6692_v43 = vsel %vm1181_vm2, %v3075_v57, %v3077_v16  ;;  %v6696_v20 = vsel %vm1181_vm2, %v3076_v1, %v3078_v38  ;;  %v6700_v61 = vsel %vm919_vm3, %v2801_v9, %v2803_v3  ;;  %v6704_v30 = vsel %vm919_vm3, %v2802_v23, %v2804_v11 }
 0x354   : > { %8777 = vst [vmem:[#allocation42_spill] sm:$0xff] %v6700_v61  ;;  %v2466_v0 = vpop.f32.mrf.mxu2  ;;  %v2531_v52 = vpop.f32.mrf.mxu3  ;;  %v2017_v57 = vadd.f32 %v6512_v50, %v6596_v54  ;;  %v2082_v1 = vadd.f32 %v6514_v63, %v6598_v37 }
 0x355   : > { %8778 = vst [vmem:[#allocation43_spill] sm:$0xff] %v6704_v30  ;;  %v2574_v17 = vadd.f32 %v2466_v0, %v2331_v62  ;;  %v2575_v39 = vadd.f32 %v2531_v52, %v2332_v13 }
 0x356   : > { %v2333_v23 = vadd.f32 %v2226_v31, %v2017_v57  ;;  %v2334_v2 = vadd.f32 %v2291_v41, %v2082_v1 }
 0x357   : > { %v2606_v53 = vmax.f32 %v2574_v17, 0.0  ;;  %v2607_v24 = vmax.f32 %v2575_v39, 0.0 }
 0x359   : > { %v2805_v14 = vrot.slane %v2606_v53, 7  ;;  %v3079_v49 = vrot.slane %v2606_v53, 1  ;;  %v2806_v9 = vrot.slane %v2607_v24, 7  ;;  %v3080_v22 = vrot.slane %v2607_v24, 1  ;;  %2696 = vmatmul.f32.gmra.mxu0 %v2606_v53  ;;  %2761 = vmatmul.f32.gmra.mxu1 %v2607_v24 }
 0x35b   : > { %v2229_v30 = vpop.f32.mrf.mxu0  ;;  %v2294_v61 = vpop.f32.mrf.mxu1  ;;  %v6712_v62 = vsel %vm1181_vm2, %v3077_v16, %v3079_v49  ;;  %v6716_v50 = vsel %vm1181_vm2, %v3078_v38, %v3080_v22  ;;  %v6720_v63 = vsel %vm919_vm3, %v2803_v3, %v2805_v14  ;;  %v6724_v13 = vsel %vm919_vm3, %v2804_v11, %v2806_v9 }
 0x35c   : > { %8779 = vst [vmem:[#allocation44_spill] sm:$0xff] %v6720_v63  ;;  %v2469_v31 = vpop.f32.mrf.mxu2  ;;  %v2534_v41 = vpop.f32.mrf.mxu3  ;;  %v2020_v16 = vadd.f32 %v6520_v26, %v6596_v54  ;;  %v2085_v38 = vadd.f32 %v6522_v59, %v6598_v37 }
 0x35d   : > { %8780 = vst [vmem:[#allocation45_spill] sm:$0xff] %v6724_v13  ;;  %v2576_v0 = vadd.f32 %v2469_v31, %v2333_v23  ;;  %v2577_v52 = vadd.f32 %v2534_v41, %v2334_v2 }
 0x35e   : > { %v2335_v11 = vadd.f32 %v2229_v30, %v2020_v16  ;;  %v2336_v1 = vadd.f32 %v2294_v61, %v2085_v38 }
 0x35f   : > { %v2608_v17 = vmax.f32 %v2576_v0, 0.0  ;;  %v2609_v39 = vmax.f32 %v2577_v52, 0.0 }
 0x361   : > { %v2807_v53 = vrot.slane %v2608_v17, 7  ;;  %v3081_v24 = vrot.slane %v2608_v17, 1  ;;  %v2808_v3 = vrot.slane %v2609_v39, 7  ;;  %v3082_v57 = vrot.slane %v2609_v39, 1  ;;  %2699 = vmatmul.f32.gmra.mxu0 %v2608_v17  ;;  %2764 = vmatmul.f32.gmra.mxu1 %v2609_v39 }
 0x363   : > { %v2232_v13 = vpop.f32.mrf.mxu0  ;;  %v2297_v63 = vpop.f32.mrf.mxu1  ;;  %v6732_v23 = vsel %vm1181_vm2, %v3079_v49, %v3081_v24  ;;  %v6736_v26 = vsel %vm1181_vm2, %v3080_v22, %v3082_v57  ;;  %v6740_v59 = vsel %vm919_vm3, %v2805_v14, %v2807_v53  ;;  %v6744_v2 = vsel %vm919_vm3, %v2806_v9, %v2808_v3 }
 0x364   : > { %v2472_v30 = vpop.f32.mrf.mxu2  ;;  %v2537_v61 = vpop.f32.mrf.mxu3  ;;  %v2023_v49 = vadd.f32 %v6528_v5, %v6596_v54  ;;  %v2088_v22 = vadd.f32 %v6530_v27, %v6598_v37 }
 0x365   : > { %v2578_v31 = vadd.f32 %v2472_v30, %v2335_v11  ;;  %v2579_v41 = vadd.f32 %v2537_v61, %v2336_v1 }
 0x366   : > { %v2337_v16 = vadd.f32 %v2232_v13, %v2023_v49  ;;  %v2338_v38 = vadd.f32 %v2297_v63, %v2088_v22  ;;  %v2091_v22 = vadd.f32 %v6538_v10, %v6598_v37  ;;  %v2904_v10 = vld [vmem:[#allocation4 + $0x68] sm:$0xff] }
 0x367   : > { %v2610_v0 = vmax.f32 %v2578_v31, 0.0  ;;  %v6746_v52 = vmax.f32 %v2579_v41, 0.0 }
 0x369   : > { %v2809_v17 = vrot.slane %v2610_v0, 7  ;;  %v3083_v14 = vrot.slane %v2610_v0, 1  ;;  %v8671_v39 = vrot.slane %v6746_v52, 7  ;;  %v3084_v9 = vrot.slane %v6746_v52, 1  ;;  %2702 = vmatmul.f32.gmra.mxu0 %v2610_v0  ;;  %2767 = vmatmul.f32.gmra.mxu1 %v6746_v52  ;;  %v2922_v0 = vld [vmem:[#allocation4 + $0xf8] sm:$0xff] }
 0x36a   : > { %2988 = vmatpush.msrb.mxu3 %v2922_v0 }
 0x36b   : > { %v2235_v11 = vpop.f32.mrf.mxu0  ;;  %v2300_v1 = vpop.f32.mrf.mxu1  ;;  %v6757_v30 = vsel %vm1181_vm2, %v3081_v24, %v3083_v14  ;;  %v6761_v5 = vsel %vm1181_vm2, %v3082_v57, %v3084_v9  ;;  %v6765_v27 = vsel %vm919_vm3, %v2807_v53, %v2809_v17  ;;  %v6771_v13 = vsel %vm919_vm3, %v2808_v3, %v8671_v39  ;;  %v2906_v24 = vld [vmem:[#allocation4 + $0x78] sm:$0xff]  ;;  %v2905_v3 = vld [vmem:[#allocation4 + $0x70] sm:$0xff] }
 0x36c   : > { %8781 = vst [vmem:[#allocation46_spill] sm:$0xff] %v6761_v5  ;;  %v2475_v63 = vpop.f32.mrf.mxu2  ;;  %v2540_v61 = vpop.f32.mrf.mxu3  ;;  %2923 = vmatpush.msra.mxu2 %v2906_v24  ;;  %v2026_v53 = vadd.f32 %v6536_v40, %v6596_v54  ;;  %v2921_v39 = vld [vmem:[#allocation4 + $0xf0] sm:$0xff]  ;;  %v2920_v24 = vld [vmem:[#allocation4 + $0xe8] sm:$0xff] }
 0x36d   : > { %8782 = vst [vmem:[#allocation47_spill] sm:$0xff] %v6765_v27  ;;  %v2580_v31 = vadd.f32 %v2475_v63, %v2337_v16  ;;  %v2581_v41 = vadd.f32 %v2540_v61, %v2338_v38  ;;  %v3181_v63 = vld [vmem:[#allocation4 + $0x278] sm:$0xff]  ;;  %2989 = vmatpush.msrb.mxu3 %v2921_v39  ;;  %v3180_v16 = vld [vmem:[#allocation4 + $0x270] sm:$0xff]  ;;  %v3179_v40 = vld [vmem:[#allocation4 + $0x268] sm:$0xff] }
 0x36e   : > { %8783 = vst [vmem:[#allocation48_spill] sm:$0xff] %v6771_v13  ;;  %v3197_v61 = vld [vmem:[#allocation4 + $0x2f8] sm:$0xff]  ;;  %2924 = vmatpush.msra.mxu2 %v2905_v3  ;;  %3198 = vmatpush.msra.mxu0 %v3181_v63  ;;  %v3196_v38 = vld [vmem:[#allocation4 + $0x2f0] sm:$0xff]  ;;  %v2903_v63 = vld [vmem:[#allocation4 + $0x60] sm:$0xff] }
 0x36f   : > { %v6773_v49 = vmax.f32 %v2580_v31, 0.0  ;;  %v6775_v57 = vmax.f32 %v2581_v41, 0.0  ;;  %v2339_v31 = vadd.f32 %v2235_v11, %v2026_v53  ;;  %v2340_v41 = vadd.f32 %v2300_v1, %v2091_v22  ;;  %3263 = vmatpush.msrb.mxu1 %v3197_v61  ;;  %2990 = vmatpush.msrb.mxu3 %v2920_v24  ;;  %v2919_v61 = vld [vmem:[#allocation4 + $0xe0] sm:$0xff] }
 0x370   : > { %2925 = vmatpush.msra.mxu2 %v2904_v10  ;;  %3199 = vmatpush.msra.mxu0 %v3180_v16  ;;  %v3178_v16 = vld [vmem:[#allocation4 + $0x260] sm:$0xff] }
 0x371   : > { %2705 = vmatmul.f32.gmra.mxu0 %v6773_v49  ;;  %2770 = vmatmul.f32.gmra.mxu1 %v6775_v57  ;;  %v8784_v27 = vrot.slane %v6773_v49, 1  ;;  %v8786_v11 = vrot.slane %v6775_v57, 1  ;;  %v8788_v39 = vrot.slane %v6773_v49, 7 }
 0x372   : > { %3264 = vmatpush.msrb.mxu1 %v3196_v38  ;;  %2926 = vmatpush.msra.mxu2 %v2903_v63  ;;  %v3194_v38 = vld [vmem:[#allocation4 + $0x2e0] sm:$0xff]  ;;  %v8792_v63 = vrot.slane %v6773_v49, 1 }
 0x373   : > { %v2238_v0 = vpop.f32.mrf.mxu0  ;;  %v2303_v13 = vpop.f32.mrf.mxu1  ;;  %v6791_v5 = vsel %vm1181_vm2, %v3083_v14, %v8784_v27  ;;  %v6797_v1 = vsel %vm1181_vm2, %v3084_v9, %v8786_v11  ;;  %v6803_v53 = vsel %vm919_vm3, %v2809_v17, %v8788_v39  ;;  %2991 = vmatpush.msrb.mxu3 %v2919_v61  ;;  %v2902_v9 = vld [vmem:[#allocation4 + $0x58] sm:$0xff]  ;;  %v8790_v17 = vrot.slane %v6746_v52, 7  ;;  %3200 = vmatpush.msra.mxu0 %v3179_v40  ;;  %v2901_v52 = vld [vmem:[#allocation4 + $0x50] sm:$0xff] }
 0x374   : > { %8785 = vst [vmem:[#allocation49_spill] sm:$0xff] %v6791_v5  ;;  %v2478_v22 = vpop.f32.mrf.mxu2  ;;  %v2543_v3 = vpop.f32.mrf.mxu3  ;;  %v3195_v5 = vld [vmem:[#allocation4 + $0x2e8] sm:$0xff]  ;;  %v2918_v11 = vld [vmem:[#allocation4 + $0xd8] sm:$0xff]  ;;  %v2094_v39 = vadd.f32 %v6546_v4, %v6598_v37  ;;  %2927 = vmatpush.msra.mxu2 %v2902_v9 }
 0x375   : > { %8787 = vst [vmem:[#allocation50_spill] sm:$0xff] %v6797_v1  ;;  %v2582_v14 = vadd.f32 %v2478_v22, %v2339_v31  ;;  %v2583_v27 = vadd.f32 %v2543_v3, %v2340_v41  ;;  %v8789_v1 = vrot.slane %v6775_v57, 7  ;;  %3265 = vmatpush.msrb.mxu1 %v3195_v5  ;;  %v2029_v41 = vadd.f32 %v6544_v8, %v6596_v54  ;;  %v2917_v22 = vld [vmem:[#allocation4 + $0xd0] sm:$0xff]  ;;  %v3177_v5 = vld [vmem:[#allocation4 + $0x258] sm:$0xff] }
 0x376   : > { %2992 = vmatpush.msrb.mxu3 %v2918_v11  ;;  %v3193_v40 = vld [vmem:[#allocation4 + $0x2d8] sm:$0xff]  ;;  %v2342_v61 = vadd.f32 %v2303_v13, %v2094_v39  ;;  %3201 = vmatpush.msra.mxu0 %v3178_v16  ;;  %v8795_v16 = vrot.slane %v6775_v57, 1  ;;  %v8798_v39 = vrot.slane %v6773_v49, 7 }
 0x377   : > { %v6811_v10 = vsel %vm919_vm3, %v8790_v17, %v8789_v1  ;;  %v6813_v24 = vmax.f32 %v2582_v14, 0.0  ;;  %v6815_v31 = vmax.f32 %v2583_v27, 0.0  ;;  %v2341_v8 = vadd.f32 %v2238_v0, %v2029_v41  ;;  %3266 = vmatpush.msrb.mxu1 %v3194_v38  ;;  %v2900_v14 = vld [vmem:[#allocation4 + $0x48] sm:$0xff]  ;;  %2928 = vmatpush.msra.mxu2 %v2901_v52  ;;  %v3176_v17 = vld [vmem:[#allocation4 + $0x250] sm:$0xff] }
 0x378   : > { %8791 = vst [vmem:[#allocation51_spill] sm:$0xff] %v6811_v10  ;;  %v2916_v27 = vld [vmem:[#allocation4 + $0xc8] sm:$0xff]  ;;  %2993 = vmatpush.msrb.mxu3 %v2917_v22  ;;  %v3192_v1 = vld [vmem:[#allocation4 + $0x2d0] sm:$0xff]  ;;  %3202 = vmatpush.msra.mxu0 %v3177_v5 }
 0x379   : > { %v8672_v3 = vrot.slane %v6813_v24, 1  ;;  %2708 = vmatmul.f32.gmra.mxu0 %v6813_v24  ;;  %2773 = vmatmul.f32.gmra.mxu1 %v6815_v31  ;;  %v8794_v13 = vrot.slane %v6815_v31, 1  ;;  %v8797_v41 = vrot.slane %v6813_v24, 7  ;;  %v8799_v49 = vrot.slane %v6815_v31, 7 }
 0x37a   : > { %3267 = vmatpush.msrb.mxu1 %v3193_v40  ;;  %2929 = vmatpush.msra.mxu2 %v2900_v14  ;;  %v3190_v14 = vld [vmem:[#allocation4 + $0x2c0] sm:$0xff] }
 0x37b   : > { %v2241_v9 = vpop.f32.mrf.mxu0  ;;  %v2306_v11 = vpop.f32.mrf.mxu1  ;;  %v6833_v0 = vsel %vm1181_vm2, %v8792_v63, %v8672_v3  ;;  %v6841_v38 = vsel %vm1181_vm2, %v8795_v16, %v8794_v13  ;;  %v6849_v52 = vsel %vm919_vm3, %v8798_v39, %v8797_v41  ;;  %v2899_v63 = vld [vmem:[#allocation4 + $0x40] sm:$0xff]  ;;  %2994 = vmatpush.msrb.mxu3 %v2916_v27  ;;  %v3175_v13 = vld [vmem:[#allocation4 + $0x248] sm:$0xff]  ;;  %3203 = vmatpush.msra.mxu0 %v3176_v17  ;;  %v3173_v39 = vld [vmem:[#allocation4 + $0x238] sm:$0xff]  ;;  %v8801_v27 = vrot.slane %v6813_v24, 1 }
 0x37c   : > { %8793 = vst [vmem:[#allocation52_spill] sm:$0xff] %v6833_v0  ;;  %v2481_v22 = vpop.f32.mrf.mxu2  ;;  %v2546_v4 = vpop.f32.mrf.mxu3  ;;  %v2915_v3 = vld [vmem:[#allocation4 + $0xc0] sm:$0xff]  ;;  %v3191_v16 = vld [vmem:[#allocation4 + $0x2c8] sm:$0xff]  ;;  %3268 = vmatpush.msrb.mxu1 %v3192_v1  ;;  %2930 = vmatpush.msra.mxu2 %v2899_v63  ;;  %v2097_v1 = vadd.f32 %v6554_v6, %v6598_v37 }
 0x37d   : > { %8796 = vst [vmem:[#allocation53_spill] sm:$0xff] %v6841_v38  ;;  %v2584_v0 = vadd.f32 %v2481_v22, %v2341_v8  ;;  %v2585_v10 = vadd.f32 %v2546_v4, %v2342_v61  ;;  %v8800_v38 = vrot.slane %v6775_v57, 7  ;;  %2995 = vmatpush.msrb.mxu3 %v2915_v3  ;;  %v2898_v8 = vld [vmem:[#allocation4 + $0x38] sm:$0xff]  ;;  %v2032_v4 = vadd.f32 %v6552_v18, %v6596_v54  ;;  %v3174_v57 = vld [vmem:[#allocation4 + $0x240] sm:$0xff]  ;;  %v2897_v3 = vld [vmem:[#allocation4 + $0x30] sm:$0xff] }
 0x37e   : > { %v2914_v61 = vld [vmem:[#allocation4 + $0xb8] sm:$0xff]  ;;  %3204 = vmatpush.msra.mxu0 %v3175_v13  ;;  %3269 = vmatpush.msrb.mxu1 %v3191_v16  ;;  %v2896_v16 = vld [vmem:[#allocation4 + $0x28] sm:$0xff] }
 0x37f   : > { %v6857_v41 = vsel %vm919_vm3, %v8800_v38, %v8799_v49  ;;  %v6859_v5 = vmax.f32 %v2584_v0, 0.0  ;;  %v6861_v40 = vmax.f32 %v2585_v10, 0.0  ;;  %v2913_v0 = vld [vmem:[#allocation4 + $0xb0] sm:$0xff]  ;;  %v2343_v18 = vadd.f32 %v2241_v9, %v2032_v4  ;;  %2931 = vmatpush.msra.mxu2 %v2898_v8  ;;  %2996 = vmatpush.msrb.mxu3 %v2914_v61  ;;  %v3189_v22 = vld [vmem:[#allocation4 + $0x2b8] sm:$0xff]  ;;  %v2912_v49 = vld [vmem:[#allocation4 + $0xa8] sm:$0xff] }
 0x380   : > { %v2344_v38 = vadd.f32 %v2306_v11, %v2097_v1  ;;  %3205 = vmatpush.msra.mxu0 %v3174_v57  ;;  %3270 = vmatpush.msrb.mxu1 %v3190_v14  ;;  %v8803_v11 = vrot.slane %v6815_v31, 1  ;;  %v8806_v4 = vrot.slane %v6813_v24, 7 }
 0x381   : > { %v8673_v17 = vrot.slane %v6859_v5, 1  ;;  %v8674_v10 = vrot.slane %v6861_v40, 1  ;;  %2711 = vmatmul.f32.gmra.mxu0 %v6859_v5  ;;  %2776 = vmatmul.f32.gmra.mxu1 %v6861_v40  ;;  %v8805_v61 = vrot.slane %v6859_v5, 7  ;;  %v8807_v24 = vrot.slane %v6861_v40, 7 }
 0x382   : > { %2932 = vmatpush.msra.mxu2 %v2897_v3  ;;  %2997 = vmatpush.msrb.mxu3 %v2913_v0 }
 0x383   : > { %v2244_v63 = vpop.f32.mrf.mxu0  ;;  %v2309_v13 = vpop.f32.mrf.mxu1  ;;  %v6879_v9 = vsel %vm1181_vm2, %v8801_v27, %v8673_v17  ;;  %v6887_v8 = vsel %vm1181_vm2, %v8803_v11, %v8674_v10  ;;  %v6895_v1 = vsel %vm919_vm3, %v8806_v4, %v8805_v61  ;;  %v3172_v27 = vld [vmem:[#allocation4 + $0x230] sm:$0xff]  ;;  %3206 = vmatpush.msra.mxu0 %v3173_v39  ;;  %3271 = vmatpush.msrb.mxu1 %v3189_v22  ;;  %v2895_v11 = vld [vmem:[#allocation4 + $0x20] sm:$0xff] }
 0x384   : > { %8802 = vst [vmem:[#allocation54_spill] sm:$0xff] %v6879_v9  ;;  %v2484_v57 = vpop.f32.mrf.mxu2  ;;  %v2549_v14 = vpop.f32.mrf.mxu3  ;;  %v3188_v17 = vld [vmem:[#allocation4 + $0x2b0] sm:$0xff]  ;;  %v2911_v10 = vld [vmem:[#allocation4 + $0xa0] sm:$0xff]  ;;  %2933 = vmatpush.msra.mxu2 %v2896_v16  ;;  %2998 = vmatpush.msrb.mxu3 %v2912_v49  ;;  %v2035_v39 = vadd.f32 %v6560_v29, %v6596_v54  ;;  %v2100_v22 = vadd.f32 %v6562_v25, %v6598_v37  ;;  %v2910_v16 = vld [vmem:[#allocation4 + $0x98] sm:$0xff]  ;;  %v8809_v49 = vrot.slane %v6859_v5, 1 }
 0x385   : > { %8804 = vst [vmem:[#allocation55_spill] sm:$0xff] %v6887_v8  ;;  %v2586_v6 = vadd.f32 %v2484_v57, %v2343_v18  ;;  %v2587_v9 = vadd.f32 %v2549_v14, %v2344_v38  ;;  %v8808_v8 = vrot.slane %v6815_v31, 7  ;;  %3207 = vmatpush.msra.mxu0 %v3172_v27  ;;  %3272 = vmatpush.msrb.mxu1 %v3188_v17  ;;  %v3171_v18 = vld [vmem:[#allocation4 + $0x228] sm:$0xff]  ;;  %v2894_v31 = vld [vmem:[#allocation4 + $0x18] sm:$0xff]  ;;  %v3170_v17 = vld [vmem:[#allocation4 + $0x220] sm:$0xff] }
 0x386   : > { %v3187_v38 = vld [vmem:[#allocation4 + $0x2a8] sm:$0xff]  ;;  %2934 = vmatpush.msra.mxu2 %v2895_v11  ;;  %2999 = vmatpush.msrb.mxu3 %v2911_v10  ;;  %v2345_v29 = vadd.f32 %v2244_v63, %v2035_v39  ;;  %v2346_v4 = vadd.f32 %v2309_v13, %v2100_v22  ;;  %v2893_v10 = vld [vmem:[#allocation4 + $0x10] sm:$0xff]  ;;  %v3169_v11 = vld [vmem:[#allocation4 + $0x218] sm:$0xff]  ;;  %v8811_v13 = vrot.slane %v6861_v40, 1  ;;  %v8814_v39 = vrot.slane %v6859_v5, 7 }
 0x387   : > { %v6903_v61 = vsel %vm919_vm3, %v8808_v8, %v8807_v24  ;;  %v6905_v3 = vmax.f32 %v2586_v6, 0.0  ;;  %v6907_v0 = vmax.f32 %v2587_v9, 0.0  ;;  %v3186_v8 = vld [vmem:[#allocation4 + $0x2a0] sm:$0xff]  ;;  %3208 = vmatpush.msra.mxu0 %v3171_v18  ;;  %3273 = vmatpush.msrb.mxu1 %v3187_v38  ;;  %v2909_v57 = vld [vmem:[#allocation4 + $0x90] sm:$0xff]  ;;  %v3185_v24 = vld [vmem:[#allocation4 + $0x298] sm:$0xff] }
 0x388   : > { %2935 = vmatpush.msra.mxu2 %v2894_v31  ;;  %3000 = vmatpush.msrb.mxu3 %v2910_v16 }
 0x389   : > { %v8675_v6 = vrot.slane %v6905_v3, 1  ;;  %v8676_v9 = vrot.slane %v6907_v0, 1  ;;  %2714 = vmatmul.f32.gmra.mxu0 %v6905_v3  ;;  %2779 = vmatmul.f32.gmra.mxu1 %v6907_v0  ;;  %v8813_v38 = vrot.slane %v6905_v3, 7  ;;  %v8815_v5 = vrot.slane %v6907_v0, 7 }
 0x38a   : > { %3209 = vmatpush.msra.mxu0 %v3170_v17  ;;  %3274 = vmatpush.msrb.mxu1 %v3186_v8 }
 0x38b   : > { %v2247_v14 = vpop.f32.mrf.mxu0  ;;  %v2312_v27 = vpop.f32.mrf.mxu1  ;;  %v6925_v63 = vsel %vm1181_vm2, %v8809_v49, %v8675_v6  ;;  %v6933_v18 = vsel %vm1181_vm2, %v8811_v13, %v8676_v9  ;;  %v6941_v22 = vsel %vm919_vm3, %v8814_v39, %v8813_v38  ;;  %v2892_v49 = vld [vmem:[#allocation4 + $0x8] sm:$0xff]  ;;  %2936 = vmatpush.msra.mxu2 %v2893_v10  ;;  %3001 = vmatpush.msrb.mxu3 %v2909_v57  ;;  %v3168_v13 = vld [vmem:[#allocation4 + $0x210] sm:$0xff] }
 0x38c   : > { %8810 = vst [vmem:[#allocation56_spill] sm:$0xff] %v6925_v63  ;;  %v2487_v31 = vpop.f32.mrf.mxu2  ;;  %v2552_v16 = vpop.f32.mrf.mxu3  ;;  %v2908_v6 = vld [vmem:[#allocation4 + $0x88] sm:$0xff]  ;;  %v3184_v9 = vld [vmem:[#allocation4 + $0x290] sm:$0xff]  ;;  %3210 = vmatpush.msra.mxu0 %v3169_v11  ;;  %3275 = vmatpush.msrb.mxu1 %v3185_v24  ;;  %v2038_v10 = vadd.f32 %v6568_v42, %v6596_v54  ;;  %v2103_v57 = vadd.f32 %v6570_v44, %v6598_v37  ;;  %v8817_v42 = vrot.slane %v6905_v3, 1 }
 0x38d   : > { %8812 = vst [vmem:[#allocation57_spill] sm:$0xff] %v6933_v18  ;;  %v2588_v25 = vadd.f32 %v2487_v31, %v2345_v29  ;;  %v2589_v63 = vadd.f32 %v2552_v16, %v2346_v4  ;;  %v8816_v18 = vrot.slane %v6861_v40, 7  ;;  %2937 = vmatpush.msra.mxu2 %v2892_v49  ;;  %3002 = vmatpush.msrb.mxu3 %v2908_v6  ;;  %v2891_v29 = vld [vmem:[#allocation4] sm:$0xff]  ;;  %v3167_v11 = vld [vmem:[#allocation4 + $0x208] sm:$0xff] }
 0x38e   : > { %v2907_v4 = vld [vmem:[#allocation4 + $0x80] sm:$0xff]  ;;  %3211 = vmatpush.msra.mxu0 %v3168_v13  ;;  %3276 = vmatpush.msrb.mxu1 %v3184_v9  ;;  %v3183_v40 = vld [vmem:[#allocation4 + $0x288] sm:$0xff]  ;;  %v8818_v9 = vrot.slane %v6907_v0, 1 }
 0x38f   : > { %v6949_v38 = vsel %vm919_vm3, %v8816_v18, %v8815_v5  ;;  %v2620_v17 = vmax.f32 %v2588_v25, 0.0  ;;  %v2621_v8 = vmax.f32 %v2589_v63, 0.0  ;;  %v2347_v25 = vadd.f32 %v2247_v14, %v2038_v10  ;;  %2938 = vmatpush.msra.mxu2 %v2891_v29  ;;  %3003 = vmatpush.msrb.mxu3 %v2907_v4  ;;  %v3166_v31 = vld [vmem:[#allocation4 + $0x200] sm:$0xff] }
 0x390   : > { %v2348_v63 = vadd.f32 %v2312_v27, %v2103_v57  ;;  %v3182_v16 = vld [vmem:[#allocation4 + $0x280] sm:$0xff]  ;;  %3212 = vmatpush.msra.mxu0 %v3167_v11  ;;  %3277 = vmatpush.msrb.mxu1 %v3183_v40  ;;  %v8819_v14 = vrot.slane %v6905_v3, 7  ;;  %v8820_v10 = vrot.slane %v6907_v0, 7  ;;  %v2041_v40 = vadd.f32 %v6576_v15, %v6596_v54 }
 0x391   : > { %v2819_v24 = vrot.slane %v2620_v17, 7  ;;  %v3093_v39 = vrot.slane %v2620_v17, 1  ;;  %v3094_v18 = vrot.slane %v2621_v8, 1  ;;  %2717 = vmatmul.f32.gmra.mxu0 %v2620_v17  ;;  %2782 = vmatmul.f32.gmra.mxu1 %v2621_v8  ;;  %v2820_v6 = vrot.slane %v2621_v8, 7 }
 0x392   : > { %3213 = vmatpush.msra.mxu0 %v3166_v31  ;;  %3278 = vmatpush.msrb.mxu1 %v3182_v16 }
 0x393   : > { %v6959_v44 = vsel %vm1181_vm2, %v8817_v42, %v3093_v39  ;;  %v6965_v49 = vsel %vm1181_vm2, %v8818_v9, %v3094_v18  ;;  %v6971_v27 = vsel %vm919_vm3, %v8819_v14, %v2819_v24  ;;  %v2250_v17 = vpop.f32.mrf.mxu0  ;;  %v2315_v8 = vpop.f32.mrf.mxu1  ;;  %v6977_v57 = vsel %vm919_vm3, %v8820_v10, %v2820_v6 }
 0x394   : > { %v2490_v13 = vpop.f32.mrf.mxu2  ;;  %v2555_v5 = vpop.f32.mrf.mxu3  ;;  %v2106_v42 = vadd.f32 %v6578_v35, %v6598_v37  ;;  %v2349_v31 = vadd.f32 %v2250_v17, %v2041_v40 }
 0x395   : > { %v2590_v29 = vadd.f32 %v2490_v13, %v2347_v25  ;;  %v2591_v4 = vadd.f32 %v2555_v5, %v2348_v63 }
 0x396   : > { %v2350_v0 = vadd.f32 %v2315_v8, %v2106_v42 }
 0x397   : > { %v2622_v11 = vmax.f32 %v2590_v29, 0.0  ;;  %v2623_v3 = vmax.f32 %v2591_v4, 0.0 }
 0x399   : > { %v2821_v9 = vrot.slane %v2622_v11, 7  ;;  %v3095_v14 = vrot.slane %v2622_v11, 1  ;;  %v2822_v25 = vrot.slane %v2623_v3, 7  ;;  %v3096_v63 = vrot.slane %v2623_v3, 1  ;;  %2720 = vmatmul.f32.gmra.mxu0 %v2622_v11  ;;  %2785 = vmatmul.f32.gmra.mxu1 %v2623_v3 }
 0x39a   : > { %v2109_v3 = vadd.f32 %v6594_v32, %v6598_v37 }
 0x39b   : > { %v6985_v16 = vsel %vm1181_vm2, %v3093_v39, %v3095_v14  ;;  %v6989_v13 = vsel %vm1181_vm2, %v3094_v18, %v3096_v63  ;;  %v6993_v15 = vsel %vm919_vm3, %v2819_v24, %v2821_v9  ;;  %v6997_v35 = vsel %vm919_vm3, %v2820_v6, %v2822_v25  ;;  %v2253_v4 = vpop.f32.mrf.mxu0  ;;  %v2318_v10 = vpop.f32.mrf.mxu1 }
 0x39c   : > { %8821 = vst [vmem:[#allocation58_spill] sm:$0xff] %v6993_v15  ;;  %v2493_v5 = vpop.f32.mrf.mxu2  ;;  %v2558_v29 = vpop.f32.mrf.mxu3  ;;  %v2044_v18 = vadd.f32 %v6592_v12, %v6596_v54 }
 0x39d   : > { %8822 = vst [vmem:[#allocation59_spill] sm:$0xff] %v6997_v35  ;;  %v2592_v17 = vadd.f32 %v2493_v5, %v2349_v31  ;;  %v2593_v8 = vadd.f32 %v2558_v29, %v2350_v0  ;;  %v2352_v35 = vadd.f32 %v2318_v10, %v2109_v3  ;;  %v8823_v10 = vrot.slane %v6604_v36, 7 }
 0x39e   : > { %v2351_v6 = vadd.f32 %v2253_v4, %v2044_v18 }
 0x39f   : > { %v2624_v39 = vmax.f32 %v2592_v17, 0.0  ;;  %v2625_v11 = vmax.f32 %v2593_v8, 0.0 }
 0x3a1   : > { %v2823_v24 = vrot.slane %v2624_v39, 7  ;;  %v3097_v40 = vrot.slane %v2624_v39, 1  ;;  %v2824_v42 = vrot.slane %v2625_v11, 7  ;;  %v3098_v15 = vrot.slane %v2625_v11, 1  ;;  %2723 = vmatmul.f32.gmra.mxu0 %v2624_v39  ;;  %2788 = vmatmul.f32.gmra.mxu1 %v2625_v11 }
 0x3a2   : > { %v8824_v11 = vrot.slane %v6606_v47, 7 }
 0x3a3   : > { %v7005_v31 = vsel %vm1181_vm2, %v3095_v14, %v3097_v40  ;;  %v7009_v0 = vsel %vm1181_vm2, %v3096_v63, %v3098_v15  ;;  %v7013_v12 = vsel %vm919_vm3, %v2821_v9, %v2823_v24  ;;  %v7017_v37 = vsel %vm919_vm3, %v2822_v25, %v2824_v42 }
 0x3a4   : > { %v2496_v32 = vpop.f32.mrf.mxu2  ;;  %v2561_v54 = vpop.f32.mrf.mxu3  ;;  %v8680_v25 = vrot.slane %v6604_v36, 1 }
 0x3a5   : > { %v2594_v5 = vadd.f32 %v2496_v32, %v2351_v6  ;;  %v2595_v29 = vadd.f32 %v2561_v54, %v2352_v35  ;;  %v8678_v35 = vrot.slane %v6606_v47, 1  ;;  %v8825_v32 = vrot.slane %v6614_v60, 1 }
 0x3a7   : > { %v7019_v17 = vmax.f32 %v2594_v5, 0.0  ;;  %v7021_v14 = vmax.f32 %v2595_v29, 0.0  ;;  %v3129_v54 = vsel %vm1181_vm2, %v8680_v25, %v8825_v32  ;;  %v8826_v5 = vrot.slane %v6616_v58, 1 }
 0x3a8   : > { %v3133_v32 = vmul.f32 %v3129_v54, %v5691_v33  ;;  %v3136_v54 = vmul.f32 %v6656_v55, %v5693_v34 }
 0x3a9   : > { %v2825_v8 = vrot.slane %v7019_v17, 7  ;;  %v8679_v63 = vrot.slane %v7019_v17, 1  ;;  %v2826_v4 = vrot.slane %v7021_v14, 7  ;;  %v8677_v9 = vrot.slane %v7021_v14, 1  ;;  %2726 = vmatmul.f32.gmra.mxu0 %v7019_v17  ;;  %2791 = vmatmul.f32.gmra.mxu1 %v7021_v14 }
 0x3ab   : > { %v2857_v39 = vsel %vm919_vm3, %v2825_v8, %v8823_v10  ;;  %v2858_v18 = vsel %vm919_vm3, %v2826_v4, %v8824_v11  ;;  %v7043_v3 = vsel %vm1181_vm2, %v3097_v40, %v8679_v63  ;;  %v7049_v6 = vsel %vm1181_vm2, %v3098_v15, %v8677_v9 }
 0x3ac   : > { %v3130_v40 = vsel %vm1181_vm2, %v8678_v35, %v8826_v5  ;;  %v2859_v29 = vmul.f32 %v2857_v39, %v5716_v45  ;;  %v2860_v10 = vmul.f32 %v2858_v18, %v5716_v45  ;;  %v7067_v15 = vsel %vm919_vm3, %v2823_v24, %v2825_v8  ;;  %v8827_v5 = vld [vmem:[#allocation38_spill] sm:$0xff]  ;;  %v8859_v45 = vld [vmem:[#allocation55_spill] sm:$0xff] }
 0x3ad   : > { %v7071_v60 = vsel %vm919_vm3, %v2824_v42, %v2826_v4  ;;  %v3134_v39 = vmul.f32 %v3130_v40, %v5691_v33  ;;  %v2861_v24 = vmul.f32 %v6632_v7, %v5719_v48  ;;  %v2862_v8 = vmul.f32 %v6638_v21, %v5719_v48  ;;  %v8828_v40 = vld [vmem:[#allocation39_spill] sm:$0xff]  ;;  %v8855_v48 = vld [vmem:[#allocation53_spill] sm:$0xff] }
 0x3ae   : > { %v7073_v11 = vpop.f32.mrf.mxu0  ;;  %v7075_v58 = vpop.f32.mrf.mxu1  ;;  %2939 = vmatmul.f32.vlgmr.msra.gmra.mxu2 %v2859_v29  ;;  %3004 = vmatmul.f32.vlgmr.msrb.gmra.mxu3 %v2860_v10  ;;  %v3135_v18 = vmul.f32 %v6650_v51, %v5693_v34  ;;  %v2863_v7 = vmul.f32 %v8827_v5, %v5736_v56  ;;  %v2864_v21 = vmul.f32 %v8828_v40, %v5736_v56 }
 0x3b1   : > { %3214 = vmatmul.f32.vlgmr.msra.gmra.mxu0 %v3133_v32  ;;  %3279 = vmatmul.f32.vlgmr.msrb.gmra.mxu1 %v3134_v39  ;;  %v8829_v32 = vld [vmem:[#allocation8_spill] sm:$0xff]  ;;  %v8830_v39 = vld [vmem:[#allocation13_spill] sm:$0xff] }
 0x3b2   : > { %v3137_v51 = vmul.f32 %v6672_v46, %v8829_v32  ;;  %v3138_v55 = vmul.f32 %v6676_v19, %v8829_v32 }
 0x3b6   : > { %v7083_v42 = vpop.f32.mrf.mxu0  ;;  %v7085_v4 = vpop.f32.mrf.mxu1  ;;  %2942 = vmatmul.f32.gmra.mxu2 %v2861_v24  ;;  %3007 = vmatmul.f32.gmra.mxu3 %v2862_v8  ;;  %v8831_v24 = vld [vmem:[#allocation40_spill] sm:$0xff] }
 0x3b7   : > { %v2865_v8 = vmul.f32 %v8831_v24, %v8830_v39  ;;  %v8836_v24 = vld [vmem:[#allocation43_spill] sm:$0xff] }
 0x3b9   : > { %3217 = vmatmul.f32.gmra.mxu0 %v3135_v18  ;;  %3282 = vmatmul.f32.gmra.mxu1 %v3136_v54  ;;  %v8832_v18 = vld [vmem:[#allocation41_spill] sm:$0xff] }
 0x3ba   : > { %v2866_v54 = vmul.f32 %v8832_v18, %v8830_v39  ;;  %v8850_v39 = vld [vmem:[#allocation50_spill] sm:$0xff] }
 0x3be   : > { %v7095_v29 = vpop.f32.mrf.mxu0  ;;  %v7097_v10 = vpop.f32.mrf.mxu1  ;;  %2945 = vmatmul.f32.gmra.mxu2 %v2863_v7  ;;  %3010 = vmatmul.f32.gmra.mxu3 %v2864_v21  ;;  %v8833_v7 = vld [vmem:[#allocation12_spill] sm:$0xff]  ;;  %v8834_v21 = vld [vmem:[#allocation15_spill] sm:$0xff] }
 0x3bf   : > { %v3139_v46 = vmul.f32 %v6692_v43, %v8833_v7  ;;  %v3140_v19 = vmul.f32 %v6696_v20, %v8833_v7  ;;  %v2868_v18 = vmul.f32 %v8836_v24, %v8834_v21 }
 0x3c1   : > { %3220 = vmatmul.f32.gmra.mxu0 %v3137_v51  ;;  %3285 = vmatmul.f32.gmra.mxu1 %v3138_v55  ;;  %v8835_v51 = vld [vmem:[#allocation42_spill] sm:$0xff] }
 0x3c2   : > { %v2867_v55 = vmul.f32 %v8835_v51, %v8834_v21  ;;  %v8840_v51 = vld [vmem:[#allocation45_spill] sm:$0xff] }
 0x3c6   : > { %v7107_v5 = vpop.f32.mrf.mxu0  ;;  %v7109_v40 = vpop.f32.mrf.mxu1  ;;  %2948 = vmatmul.f32.gmra.mxu2 %v2865_v8  ;;  %3013 = vmatmul.f32.gmra.mxu3 %v2866_v54  ;;  %v8837_v8 = vld [vmem:[#allocation14_spill] sm:$0xff]  ;;  %v8838_v54 = vld [vmem:[#allocation17_spill] sm:$0xff] }
 0x3c7   : > { %v3141_v43 = vmul.f32 %v6712_v62, %v8837_v8  ;;  %v3142_v20 = vmul.f32 %v6716_v50, %v8837_v8  ;;  %v2870_v24 = vmul.f32 %v8840_v51, %v8838_v54 }
 0x3c9   : > { %3223 = vmatmul.f32.gmra.mxu0 %v3139_v46  ;;  %3288 = vmatmul.f32.gmra.mxu1 %v3140_v19  ;;  %v8839_v46 = vld [vmem:[#allocation44_spill] sm:$0xff] }
 0x3ca   : > { %v2869_v19 = vmul.f32 %v8839_v46, %v8838_v54  ;;  %v8847_v54 = vld [vmem:[#allocation48_spill] sm:$0xff] }
 0x3ce   : > { %v7119_v9 = vpop.f32.mrf.mxu0  ;;  %v7121_v35 = vpop.f32.mrf.mxu1  ;;  %2951 = vmatmul.f32.gmra.mxu2 %v2867_v55  ;;  %3016 = vmatmul.f32.gmra.mxu3 %v2868_v18  ;;  %v8841_v55 = vld [vmem:[#allocation16_spill] sm:$0xff] }
 0x3cf   : > { %v3143_v62 = vmul.f32 %v6732_v23, %v8841_v55  ;;  %v3144_v50 = vmul.f32 %v6736_v26, %v8841_v55  ;;  %v8842_v18 = vld [vmem:[#allocation20_spill] sm:$0xff] }
 0x3d1   : > { %3226 = vmatmul.f32.gmra.mxu0 %v3141_v43  ;;  %3291 = vmatmul.f32.gmra.mxu1 %v3142_v20  ;;  %v2871_v43 = vmul.f32 %v6740_v59, %v8842_v18  ;;  %v2872_v20 = vmul.f32 %v6744_v2, %v8842_v18 }
 0x3d6   : > { %v7131_v63 = vpop.f32.mrf.mxu0  ;;  %v7133_v25 = vpop.f32.mrf.mxu1  ;;  %2954 = vmatmul.f32.gmra.mxu2 %v2869_v19  ;;  %3019 = vmatmul.f32.gmra.mxu3 %v2870_v24  ;;  %v8843_v19 = vld [vmem:[#allocation18_spill] sm:$0xff] }
 0x3d7   : > { %v3145_v23 = vmul.f32 %v6757_v30, %v8843_v19  ;;  %v8844_v24 = vld [vmem:[#allocation46_spill] sm:$0xff] }
 0x3d8   : > { %v3146_v26 = vmul.f32 %v8844_v24, %v8843_v19 }
 0x3d9   : > { %3229 = vmatmul.f32.gmra.mxu0 %v3143_v62  ;;  %3294 = vmatmul.f32.gmra.mxu1 %v3144_v50  ;;  %v8845_v62 = vld [vmem:[#allocation21_spill] sm:$0xff]  ;;  %v8846_v50 = vld [vmem:[#allocation47_spill] sm:$0xff] }
 0x3da   : > { %v2873_v59 = vmul.f32 %v8846_v50, %v8845_v62  ;;  %v2874_v2 = vmul.f32 %v8847_v54, %v8845_v62  ;;  %v8852_v50 = vld [vmem:[#allocation51_spill] sm:$0xff] }
 0x3de   : > { %v7143_v46 = vpop.f32.mrf.mxu0  ;;  %v7145_v51 = vpop.f32.mrf.mxu1  ;;  %2957 = vmatmul.f32.gmra.mxu2 %v2871_v43  ;;  %3022 = vmatmul.f32.gmra.mxu3 %v2872_v20  ;;  %v8848_v43 = vld [vmem:[#allocation19_spill] sm:$0xff]  ;;  %v8849_v20 = vld [vmem:[#allocation49_spill] sm:$0xff] }
 0x3df   : > { %v3147_v30 = vmul.f32 %v8849_v20, %v8848_v43  ;;  %v3148_v24 = vmul.f32 %v8850_v39, %v8848_v43 }
 0x3e1   : > { %3232 = vmatmul.f32.gmra.mxu0 %v3145_v23  ;;  %3297 = vmatmul.f32.gmra.mxu1 %v3146_v26  ;;  %v8851_v23 = vld [vmem:[#allocation23_spill] sm:$0xff] }
 0x3e2   : > { %v2875_v26 = vmul.f32 %v6803_v53, %v8851_v23  ;;  %v2876_v54 = vmul.f32 %v8852_v50, %v8851_v23 }
 0x3e6   : > { %v7155_v18 = vpop.f32.mrf.mxu0  ;;  %v7157_v21 = vpop.f32.mrf.mxu1  ;;  %2960 = vmatmul.f32.gmra.mxu2 %v2873_v59  ;;  %3025 = vmatmul.f32.gmra.mxu3 %v2874_v2  ;;  %v8853_v59 = vld [vmem:[#allocation22_spill] sm:$0xff]  ;;  %v8854_v2 = vld [vmem:[#allocation52_spill] sm:$0xff] }
 0x3e7   : > { %v3149_v20 = vmul.f32 %v8854_v2, %v8853_v59  ;;  %v3150_v39 = vmul.f32 %v8855_v48, %v8853_v59 }
 0x3e9   : > { %3235 = vmatmul.f32.gmra.mxu0 %v3147_v30  ;;  %3300 = vmatmul.f32.gmra.mxu1 %v3148_v24  ;;  %v8856_v30 = vld [vmem:[#allocation25_spill] sm:$0xff] }
 0x3ea   : > { %v2877_v53 = vmul.f32 %v6849_v52, %v8856_v30  ;;  %v2878_v24 = vmul.f32 %v6857_v41, %v8856_v30  ;;  %v5150_v52 = vld [vmem:[%s8591_s13 + $0xf8] sm:$0xff]  ;;  %v5149_v41 = vld [vmem:[%s8591_s13 + $0xf0] sm:$0xff]  ;;  %v8863_v30 = vld [vmem:[#allocation57_spill] sm:$0xff] }
 0x3eb   : > { %3381 = vmatpush.msrb.mxu2 %v5150_v52  ;;  %v8864_v52 = vld [vmem:[#allocation30_spill] sm:$0xff] }
 0x3ed   : > { %3382 = vmatpush.msrb.mxu2 %v5149_v41  ;;  %v2881_v41 = vmul.f32 %v6941_v22, %v8864_v52 }
 0x3ee   : > { %v7167_v62 = vpop.f32.mrf.mxu0  ;;  %v7169_v56 = vpop.f32.mrf.mxu1  ;;  %2963 = vmatmul.f32.gmra.mxu2 %v2875_v26  ;;  %3028 = vmatmul.f32.gmra.mxu3 %v2876_v54  ;;  %v8857_v26 = vld [vmem:[#allocation24_spill] sm:$0xff]  ;;  %v8858_v54 = vld [vmem:[#allocation54_spill] sm:$0xff] }
 0x3ef   : > { %v3151_v2 = vmul.f32 %v8858_v54, %v8857_v26  ;;  %v3152_v48 = vmul.f32 %v8859_v45, %v8857_v26  ;;  %v8861_v54 = vld [vmem:[#allocation26_spill] sm:$0xff] }
 0x3f0   : > { %v3154_v26 = vmul.f32 %v8863_v30, %v8861_v54  ;;  %v5146_v30 = vld [vmem:[%s8591_s13 + $0xd8] sm:$0xff] }
 0x3f1   : > { %3238 = vmatmul.f32.gmra.mxu0 %v3149_v20  ;;  %3303 = vmatmul.f32.gmra.mxu1 %v3150_v39  ;;  %v8860_v20 = vld [vmem:[#allocation27_spill] sm:$0xff] }
 0x3f2   : > { %v2879_v39 = vmul.f32 %v6895_v1, %v8860_v20  ;;  %v5148_v1 = vld [vmem:[%s8591_s13 + $0xe8] sm:$0xff] }
 0x3f3   : > { %3383 = vmatpush.msrb.mxu2 %v5148_v1  ;;  %v5144_v1 = vld [vmem:[%s8591_s13 + $0xc8] sm:$0xff] }
 0x3f6   : > { %v7179_v50 = vpop.f32.mrf.mxu0  ;;  %v7181_v23 = vpop.f32.mrf.mxu1  ;;  %2966 = vmatmul.f32.gmra.mxu2 %v2877_v53  ;;  %3031 = vmatmul.f32.gmra.mxu3 %v2878_v24  ;;  %v2880_v53 = vmul.f32 %v6903_v61, %v8860_v20  ;;  %v5147_v61 = vld [vmem:[%s8591_s13 + $0xe0] sm:$0xff] }
 0x3f7   : > { %3384 = vmatpush.msrb.mxu2 %v5147_v61  ;;  %v5166_v61 = vld [vmem:[%s8591_s13 + $0x178] sm:$0xff] }
 0x3f8   : > { %3656 = vmatpush.msrb.mxu0 %v5166_v61 }
 0x3f9   : > { %3241 = vmatmul.f32.gmra.mxu0 %v3151_v2  ;;  %3306 = vmatmul.f32.gmra.mxu1 %v3152_v48  ;;  %v8862_v2 = vld [vmem:[#allocation56_spill] sm:$0xff] }
 0x3fa   : > { %v3153_v48 = vmul.f32 %v8862_v2, %v8861_v54  ;;  %v8865_v2 = vld [vmem:[#allocation28_spill] sm:$0xff]  ;;  %3385 = vmatpush.msrb.mxu2 %v5146_v30 }
 0x3fb   : > { %v3156_v22 = vmul.f32 %v6965_v49, %v8865_v2  ;;  %v8866_v49 = vld [vmem:[#allocation31_spill] sm:$0xff]  ;;  %v5143_v30 = vld [vmem:[%s8591_s13 + $0xc0] sm:$0xff] }
 0x3fe   : > { %v7197_v24 = vpop.f32.mrf.mxu0  ;;  %v7199_v45 = vpop.f32.mrf.mxu1  ;;  %2969 = vmatmul.f32.gmra.mxu2 %v2879_v39  ;;  %3034 = vmatmul.f32.gmra.mxu3 %v2880_v53  ;;  %v2882_v39 = vmul.f32 %v6949_v38, %v8864_v52  ;;  %v5145_v38 = vld [vmem:[%s8591_s13 + $0xd0] sm:$0xff] }
 0x3ff   : > { %3386 = vmatpush.msrb.mxu2 %v5145_v38 }
 0x401   : > { %3244 = vmatmul.f32.gmra.mxu0 %v3153_v48  ;;  %3309 = vmatmul.f32.gmra.mxu1 %v3154_v26  ;;  %v3155_v48 = vmul.f32 %v6959_v44, %v8865_v2  ;;  %v5165_v44 = vld [vmem:[%s8591_s13 + $0x170] sm:$0xff] }
 0x402   : > { %3387 = vmatpush.msrb.mxu2 %v5144_v1  ;;  %3657 = vmatpush.msrb.mxu0 %v5165_v44  ;;  %v5142_v1 = vld [vmem:[%s8591_s13 + $0xb8] sm:$0xff]  ;;  %v5163_v44 = vld [vmem:[%s8591_s13 + $0x160] sm:$0xff] }
 0x404   : > { %3388 = vmatpush.msrb.mxu2 %v5143_v30 }
 0x406   : > { %v7218_v26 = vpop.f32.mrf.mxu0  ;;  %v7220_v53 = vpop.f32.mrf.mxu1  ;;  %2972 = vmatmul.f32.gmra.mxu2 %v2881_v41  ;;  %3037 = vmatmul.f32.gmra.mxu3 %v2882_v39  ;;  %v2883_v41 = vmul.f32 %v6971_v27, %v8866_v49  ;;  %v2884_v39 = vmul.f32 %v6977_v57, %v8866_v49  ;;  %v8867_v27 = vld [vmem:[#allocation29_spill] sm:$0xff] }
 0x407   : > { %v3157_v61 = vmul.f32 %v6985_v16, %v8867_v27  ;;  %v3158_v57 = vmul.f32 %v6989_v13, %v8867_v27  ;;  %v5162_v16 = vld [vmem:[%s8591_s13 + $0x158] sm:$0xff]  ;;  %3389 = vmatpush.msrb.mxu2 %v5142_v1  ;;  %v8868_v13 = vld [vmem:[#allocation33_spill] sm:$0xff] }
 0x409   : > { %3247 = vmatmul.f32.gmra.mxu0 %v3155_v48  ;;  %3312 = vmatmul.f32.gmra.mxu1 %v3156_v22  ;;  %v5164_v48 = vld [vmem:[%s8591_s13 + $0x168] sm:$0xff] }
 0x40a   : > { %3658 = vmatpush.msrb.mxu0 %v5164_v48  ;;  %v8870_v48 = vld [vmem:[#allocation59_spill] sm:$0xff] }
 0x40b   : > { %v2886_v49 = vmul.f32 %v8870_v48, %v8868_v13  ;;  %v5160_v48 = vld [vmem:[%s8591_s13 + $0x148] sm:$0xff] }
 0x40c   : > { %3659 = vmatpush.msrb.mxu0 %v5163_v44  ;;  %v8871_v44 = vld [vmem:[#allocation32_spill] sm:$0xff] }
 0x40e   : > { %v7248_v22 = vpop.f32.mrf.mxu0  ;;  %v7250_v38 = vpop.f32.mrf.mxu1  ;;  %2975 = vmatmul.f32.gmra.mxu2 %v2883_v41  ;;  %3040 = vmatmul.f32.gmra.mxu3 %v2884_v39  ;;  %v5141_v41 = vld [vmem:[%s8591_s13 + $0xb0] sm:$0xff] }
 0x40f   : > { %v8869_v39 = vld [vmem:[#allocation58_spill] sm:$0xff]  ;;  %3390 = vmatpush.msrb.mxu2 %v5141_v41  ;;  %3660 = vmatpush.msrb.mxu0 %v5162_v16  ;;  %v3160_v41 = vmul.f32 %v7009_v0, %v8871_v44  ;;  %v5139_v16 = vld [vmem:[%s8591_s13 + $0xa0] sm:$0xff] }
 0x410   : > { %v2885_v30 = vmul.f32 %v8869_v39, %v8868_v13  ;;  %v3159_v39 = vmul.f32 %v7005_v31, %v8871_v44  ;;  %v5159_v31 = vld [vmem:[%s8591_s13 + $0x140] sm:$0xff]  ;;  %v8878_v13 = vrot.slane %v7021_v14, 1  ;;  %v5154_v14 = vld [vmem:[%s8591_s13 + $0x118] sm:$0xff] }
 0x411   : > { %3250 = vmatmul.f32.gmra.mxu0 %v3157_v61  ;;  %3315 = vmatmul.f32.gmra.mxu1 %v3158_v57  ;;  %v5140_v61 = vld [vmem:[%s8591_s13 + $0xa8] sm:$0xff]  ;;  %v5161_v57 = vld [vmem:[%s8591_s13 + $0x150] sm:$0xff]  ;;  %v8872_v0 = vld [vmem:[#allocation36_spill] sm:$0xff] }
 0x412   : > { %3391 = vmatpush.msrb.mxu2 %v5140_v61  ;;  %3661 = vmatpush.msrb.mxu0 %v5161_v57  ;;  %v2888_v61 = vmul.f32 %v7017_v37, %v8872_v0  ;;  %v5137_v57 = vld [vmem:[%s8591_s13 + $0x90] sm:$0xff] }
 0x414   : > { %3392 = vmatpush.msrb.mxu2 %v5139_v16  ;;  %3662 = vmatpush.msrb.mxu0 %v5160_v48 }
 0x416   : > { %v7278_v52 = vpop.f32.mrf.mxu0  ;;  %v7280_v1 = vpop.f32.mrf.mxu1  ;;  %2978 = vmatmul.f32.gmra.mxu2 %v2885_v30  ;;  %3043 = vmatmul.f32.gmra.mxu3 %v2886_v49  ;;  %v5138_v49 = vld [vmem:[%s8591_s13 + $0x98] sm:$0xff]  ;;  %v2887_v30 = vmul.f32 %v7013_v12, %v8872_v0  ;;  %v8873_v12 = vld [vmem:[#allocation34_spill] sm:$0xff]  ;;  %v8877_v0 = vrot.slane %v6606_v47, 1 }
 0x417   : > { %3393 = vmatpush.msrb.mxu2 %v5138_v49  ;;  %3663 = vmatpush.msrb.mxu0 %v5159_v31  ;;  %v3161_v48 = vmul.f32 %v7043_v3, %v8873_v12  ;;  %v3162_v37 = vmul.f32 %v7049_v6, %v8873_v12  ;;  %v5136_v49 = vld [vmem:[%s8591_s13 + $0x88] sm:$0xff]  ;;  %v5157_v31 = vld [vmem:[%s8591_s13 + $0x130] sm:$0xff]  ;;  %v8874_v6 = vrot.slane %v6604_v36, 1  ;;  %v5155_v36 = vld [vmem:[%s8591_s13 + $0x120] sm:$0xff] }
 0x418   : > { %v5156_v3 = vld [vmem:[%s8591_s13 + $0x128] sm:$0xff] }
 0x419   : > { %3253 = vmatmul.f32.gmra.mxu0 %v3159_v39  ;;  %3318 = vmatmul.f32.gmra.mxu1 %v3160_v41  ;;  %v5158_v39 = vld [vmem:[%s8591_s13 + $0x138] sm:$0xff] }
 0x41a   : > { %3394 = vmatpush.msrb.mxu2 %v5137_v57  ;;  %3664 = vmatpush.msrb.mxu0 %v5158_v39  ;;  %v8876_v39 = vld [vmem:[#allocation37_spill] sm:$0xff] }
 0x41c   : > { %3395 = vmatpush.msrb.mxu2 %v5136_v49  ;;  %3665 = vmatpush.msrb.mxu0 %v5157_v31  ;;  %v3132_v49 = vsel %vm1181_vm2, %v8878_v13, %v8877_v0  ;;  %v5153_v13 = vld [vmem:[%s8591_s13 + $0x110] sm:$0xff]  ;;  %v7362_v0 = vld [vmem:[%s8590_s12] ss:$0 sm:$0xff] }
 0x41e   : > { %v7308_v41 = vpop.f32.mrf.mxu0  ;;  %v7310_v16 = vpop.f32.mrf.mxu1  ;;  %2981 = vmatmul.f32.gmra.mxu2 %v2887_v30  ;;  %3046 = vmatmul.f32.gmra.mxu3 %v2888_v61  ;;  %v5135_v30 = vld [vmem:[%s8591_s13 + $0x80] sm:$0xff]  ;;  %v8875_v61 = vrot.slane %v7019_v17, 1 }
 0x41f   : > { %3396 = vmatpush.msrb.mxu2 %v5135_v30  ;;  %3666 = vmatpush.msrb.mxu0 %v5156_v3  ;;  %v5152_v30 = vld [vmem:[%s8591_s13 + $0x108] sm:$0xff]  ;;  %v5151_v3 = vld [vmem:[%s8591_s13 + $0x100] sm:$0xff] }
 0x420   : > { %v3131_v57 = vsel %vm1181_vm2, %v8875_v61, %v8874_v6  ;;  %v2683_v6 = vadd.f32 %v7362_v0, %v7073_v11 }
 0x421   : > { %3256 = vmatmul.f32.gmra.mxu0 %v3161_v48  ;;  %3321 = vmatmul.f32.gmra.mxu1 %v3162_v37  ;;  %v2889_v48 = vmul.f32 %v7067_v15, %v8876_v39  ;;  %v2890_v37 = vmul.f32 %v7071_v60, %v8876_v39  ;;  %v8879_v15 = vld [vmem:[#allocation35_spill] sm:$0xff] }
 0x422   : > { %v3163_v60 = vmul.f32 %v3131_v57, %v8879_v15  ;;  %v3164_v47 = vmul.f32 %v3132_v49, %v8879_v15  ;;  %3667 = vmatpush.msrb.mxu0 %v5155_v36  ;;  %v2748_v49 = vadd.f32 %v7075_v58, %v2683_v6  ;;  %v2689_v6 = vadd.f32 %v7362_v0, %v7095_v29 }
 0x424   : > { %3668 = vmatpush.msrb.mxu0 %v5154_v14  ;;  %v2686_v14 = vadd.f32 %v7362_v0, %v7083_v42 }
 0x426   : > { %v7347_v17 = vpop.f32.mrf.mxu0  ;;  %v7349_v31 = vpop.f32.mrf.mxu1  ;;  %2984 = vmatmul.f32.gmra.mxu2 %v2889_v48  ;;  %3049 = vmatmul.f32.gmra.mxu3 %v2890_v37 }
 0x427   : > { %3669 = vmatpush.msrb.mxu0 %v5153_v13 }
 0x429   : > { %3259 = vmatmul.f32.gmra.mxu0 %v3163_v60  ;;  %3324 = vmatmul.f32.gmra.mxu1 %v3164_v47 }
 0x42a   : > { %3670 = vmatpush.msrb.mxu0 %v5152_v30  ;;  %v2751_v30 = vadd.f32 %v7085_v4, %v2686_v14 }
 0x42c   : > { %3671 = vmatpush.msrb.mxu0 %v5151_v3 }
 0x42e   : > { %v3215_v61 = vpop.f32.mrf.mxu0  ;;  %v3280_v57 = vpop.f32.mrf.mxu1 }
 0x42f   : > { %v3281_v60 = vadd.f32 %v3280_v57, %v3215_v61 }
 0x431   : > { %v2940_v48 = vpop.f32.mrf.mxu2  ;;  %v3005_v37 = vpop.f32.mrf.mxu3 }
 0x432   : > { %v3006_v36 = vadd.f32 %v3005_v37, %v2940_v48  ;;  %v2754_v37 = vadd.f32 %v7097_v10, %v2689_v6 }
 0x434   : > { %v3053_v47 = vadd.f32 %v3006_v36, %v2748_v49 }
 0x436   : > { %v3328_v13 = vadd.f32 %v3281_v60, %v3053_v47  ;;  %v3218_v39 = vpop.f32.mrf.mxu0  ;;  %v3283_v20 = vpop.f32.mrf.mxu1 }
 0x437   : > { %v3284_v44 = vadd.f32 %v3283_v20, %v3218_v39 }
 0x438   : > { %v7375_v15 = vmax.f32 %v3328_v13, 0.0  ;;  %v2692_v13 = vadd.f32 %v7362_v0, %v7107_v5 }
 0x439   : > { %v2943_v11 = vpop.f32.mrf.mxu2  ;;  %v3008_v12 = vpop.f32.mrf.mxu3 }
 0x43a   : > { %v3009_v3 = vadd.f32 %v3008_v12, %v2943_v11  ;;  %3397 = vmatmul.f32.vlgmr.msrb.gmra.mxu2 %v7375_v15  ;;  %v3446_v49 = vrot.slane %v7375_v15, 7  ;;  %v3591_v4 = vrot.slane %v7375_v15, 1 }
 0x43c   : > { %v3054_v58 = vadd.f32 %v3009_v3, %v2751_v30 }
 0x43e   : > { %v3221_v61 = vpop.f32.mrf.mxu0  ;;  %v3286_v57 = vpop.f32.mrf.mxu1  ;;  %v3329_v42 = vadd.f32 %v3284_v44, %v3054_v58 }
 0x43f   : > { %v3287_v39 = vadd.f32 %v3286_v57, %v3221_v61  ;;  %v2757_v57 = vadd.f32 %v7109_v40, %v2692_v13 }
 0x440   : > { %v3345_v48 = vmax.f32 %v3329_v42, 0.0 }
 0x441   : > { %v2946_v36 = vpop.f32.mrf.mxu2  ;;  %v3011_v60 = vpop.f32.mrf.mxu3 }
 0x442   : > { %v3012_v12 = vadd.f32 %v3011_v60, %v2946_v36  ;;  %3400 = vmatmul.f32.gmra.mxu2 %v3345_v48  ;;  %v3447_v47 = vrot.slane %v3345_v48, 7  ;;  %v3592_v20 = vrot.slane %v3345_v48, 1 }
 0x444   : > { %v3055_v14 = vadd.f32 %v3012_v12, %v2754_v37  ;;  %v3621_v29 = vsel %vm1181_vm2, %v3591_v4, %v3592_v20  ;;  %v7392_v10 = vsel %vm919_vm3, %v3446_v49, %v3447_v47 }
 0x445   : > { %v3623_v44 = vmul.f32 %v3621_v29, %v5691_v33 }
 0x446   : > { %v3224_v11 = vpop.f32.mrf.mxu0  ;;  %v3289_v30 = vpop.f32.mrf.mxu1  ;;  %v3330_v3 = vadd.f32 %v3287_v39, %v3055_v14  ;;  %v2695_v14 = vadd.f32 %v7362_v0, %v7119_v9 }
 0x447   : > { %3672 = vmatmul.f32.vlgmr.msrb.gmra.mxu0 %v3623_v44  ;;  %v3290_v36 = vadd.f32 %v3289_v30, %v3224_v11 }
 0x448   : > { %v3346_v58 = vmax.f32 %v3330_v3, 0.0  ;;  %v2760_v30 = vadd.f32 %v7121_v35, %v2695_v14 }
 0x449   : > { %v2949_v6 = vpop.f32.mrf.mxu2  ;;  %v3014_v61 = vpop.f32.mrf.mxu3 }
 0x44a   : > { %v3015_v42 = vadd.f32 %v3014_v61, %v2949_v6  ;;  %3403 = vmatmul.f32.gmra.mxu2 %v3346_v58  ;;  %v3448_v48 = vrot.slane %v3346_v58, 7  ;;  %v3593_v37 = vrot.slane %v3346_v58, 1 }
 0x44c   : > { %v3056_v60 = vadd.f32 %v3015_v42, %v2757_v57  ;;  %v3620_v12 = vsel %vm1181_vm2, %v3592_v20, %v3593_v37  ;;  %v7402_v5 = vsel %vm919_vm3, %v3447_v47, %v3448_v48 }
 0x44d   : > { %v3624_v39 = vmul.f32 %v3620_v12, %v5693_v34 }
 0x44e   : > { %v3227_v29 = vpop.f32.mrf.mxu0  ;;  %v3292_v40 = vpop.f32.mrf.mxu1  ;;  %v3331_v44 = vadd.f32 %v3290_v36, %v3056_v60  ;;  %v2698_v36 = vadd.f32 %v7362_v0, %v7131_v63 }
 0x44f   : > { %3675 = vmatmul.f32.gmra.mxu0 %v3624_v39  ;;  %v3293_v47 = vadd.f32 %v3292_v40, %v3227_v29 }
 0x450   : > { %v3347_v13 = vmax.f32 %v3331_v44, 0.0  ;;  %v2763_v40 = vadd.f32 %v7133_v25, %v2698_v36 }
 0x451   : > { %v2952_v3 = vpop.f32.mrf.mxu2  ;;  %v3017_v11 = vpop.f32.mrf.mxu3 }
 0x452   : > { %v3018_v58 = vadd.f32 %v3017_v11, %v2952_v3  ;;  %3406 = vmatmul.f32.gmra.mxu2 %v3347_v13  ;;  %v3449_v20 = vrot.slane %v3347_v13, 7  ;;  %v3594_v6 = vrot.slane %v3347_v13, 1 }
 0x454   : > { %v3057_v61 = vadd.f32 %v3018_v58, %v2760_v30  ;;  %v3619_v57 = vsel %vm1181_vm2, %v3593_v37, %v3594_v6  ;;  %v7412_v9 = vsel %vm919_vm3, %v3448_v48, %v3449_v20  ;;  %v2701_v58 = vadd.f32 %v7362_v0, %v7143_v46 }
 0x455   : > { %v3625_v42 = vmul.f32 %v3619_v57, %v8829_v32 }
 0x456   : > { %v3230_v60 = vpop.f32.mrf.mxu0  ;;  %v3295_v35 = vpop.f32.mrf.mxu1  ;;  %v3332_v12 = vadd.f32 %v3293_v47, %v3057_v61 }
 0x457   : > { %3678 = vmatmul.f32.gmra.mxu0 %v3625_v42  ;;  %v3296_v48 = vadd.f32 %v3295_v35, %v3230_v60  ;;  %v2766_v60 = vadd.f32 %v7145_v51, %v2701_v58 }
 0x458   : > { %v3348_v39 = vmax.f32 %v3332_v12, 0.0 }
 0x459   : > { %v2955_v14 = vpop.f32.mrf.mxu2  ;;  %v3020_v29 = vpop.f32.mrf.mxu3 }
 0x45a   : > { %v3021_v44 = vadd.f32 %v3020_v29, %v2955_v14  ;;  %3409 = vmatmul.f32.gmra.mxu2 %v3348_v39  ;;  %v3450_v37 = vrot.slane %v3348_v39, 7  ;;  %v3595_v13 = vrot.slane %v3348_v39, 1 }
 0x45c   : > { %v3058_v3 = vadd.f32 %v3021_v44, %v2763_v40  ;;  %v3618_v11 = vsel %vm1181_vm2, %v3594_v6, %v3595_v13  ;;  %v7422_v63 = vsel %vm919_vm3, %v3449_v20, %v3450_v37  ;;  %v2704_v40 = vadd.f32 %v7362_v0, %v7155_v18 }
 0x45d   : > { %v3626_v30 = vmul.f32 %v3618_v11, %v8833_v7 }
 0x45e   : > { %v3233_v47 = vpop.f32.mrf.mxu0  ;;  %v3298_v25 = vpop.f32.mrf.mxu1  ;;  %v3333_v61 = vadd.f32 %v3296_v48, %v3058_v3  ;;  %v2769_v58 = vadd.f32 %v7157_v21, %v2704_v40 }
 0x45f   : > { %3681 = vmatmul.f32.gmra.mxu0 %v3626_v30  ;;  %v3299_v20 = vadd.f32 %v3298_v25, %v3233_v47 }
 0x460   : > { %v3349_v57 = vmax.f32 %v3333_v61, 0.0 }
 0x461   : > { %v2958_v42 = vpop.f32.mrf.mxu2  ;;  %v3023_v36 = vpop.f32.mrf.mxu3 }
 0x462   : > { %v3024_v35 = vadd.f32 %v3023_v36, %v2958_v42  ;;  %3412 = vmatmul.f32.gmra.mxu2 %v3349_v57  ;;  %v3451_v6 = vrot.slane %v3349_v57, 7  ;;  %v3596_v12 = vrot.slane %v3349_v57, 1  ;;  %v2707_v36 = vadd.f32 %v7362_v0, %v7167_v62 }
 0x464   : > { %v3059_v39 = vadd.f32 %v3024_v35, %v2766_v60  ;;  %v3617_v14 = vsel %vm1181_vm2, %v3595_v13, %v3596_v12  ;;  %v7432_v46 = vsel %vm919_vm3, %v3450_v37, %v3451_v6 }
 0x465   : > { %v3627_v29 = vmul.f32 %v3617_v14, %v8837_v8 }
 0x466   : > { %v3236_v44 = vpop.f32.mrf.mxu0  ;;  %v3301_v51 = vpop.f32.mrf.mxu1  ;;  %v3334_v48 = vadd.f32 %v3299_v20, %v3059_v39 }
 0x467   : > { %3684 = vmatmul.f32.gmra.mxu0 %v3627_v29  ;;  %v3302_v37 = vadd.f32 %v3301_v51, %v3236_v44  ;;  %v2772_v29 = vadd.f32 %v7169_v56, %v2707_v36 }
 0x468   : > { %v3350_v3 = vmax.f32 %v3334_v48, 0.0 }
 0x469   : > { %v2961_v11 = vpop.f32.mrf.mxu2  ;;  %v3026_v30 = vpop.f32.mrf.mxu3 }
 0x46a   : > { %v3027_v47 = vadd.f32 %v3026_v30, %v2961_v11  ;;  %3415 = vmatmul.f32.gmra.mxu2 %v3350_v3  ;;  %v3452_v13 = vrot.slane %v3350_v3, 7  ;;  %v3597_v25 = vrot.slane %v3350_v3, 1  ;;  %v2710_v11 = vadd.f32 %v7362_v0, %v7179_v50 }
 0x46c   : > { %v3060_v61 = vadd.f32 %v3027_v47, %v2769_v58  ;;  %v3616_v57 = vsel %vm1181_vm2, %v3596_v12, %v3597_v25  ;;  %v7442_v18 = vsel %vm919_vm3, %v3451_v6, %v3452_v13  ;;  %v3509_v47 = vld [vmem:[%s8591_s13 + $0x78] sm:$0xff] }
 0x46d   : > { %v3628_v42 = vmul.f32 %v3616_v57, %v8841_v55  ;;  %3510 = vmatpush.msra.mxu3 %v3509_v47 }
 0x46e   : > { %v3239_v60 = vpop.f32.mrf.mxu0  ;;  %v3304_v21 = vpop.f32.mrf.mxu1  ;;  %v3335_v35 = vadd.f32 %v3302_v37, %v3060_v61 }
 0x46f   : > { %3687 = vmatmul.f32.gmra.mxu0 %v3628_v42  ;;  %v3305_v6 = vadd.f32 %v3304_v21, %v3239_v60 }
 0x470   : > { %v3351_v20 = vmax.f32 %v3335_v35, 0.0  ;;  %v3508_v35 = vld [vmem:[%s8591_s13 + $0x70] sm:$0xff] }
 0x471   : > { %v2964_v39 = vpop.f32.mrf.mxu2  ;;  %v3029_v14 = vpop.f32.mrf.mxu3  ;;  %3511 = vmatpush.msra.mxu3 %v3508_v35 }
 0x472   : > { %v3030_v40 = vadd.f32 %v3029_v14, %v2964_v39  ;;  %3418 = vmatmul.f32.gmra.mxu2 %v3351_v20  ;;  %v3453_v12 = vrot.slane %v3351_v20, 7  ;;  %v3598_v44 = vrot.slane %v3351_v20, 1  ;;  %v3507_v20 = vld [vmem:[%s8591_s13 + $0x68] sm:$0xff]  ;;  %v2713_v14 = vadd.f32 %v7362_v0, %v7197_v24 }
 0x473   : > { %3512 = vmatpush.msra.mxu3 %v3507_v20 }
 0x474   : > { %v3061_v51 = vadd.f32 %v3030_v40, %v2772_v29  ;;  %v3615_v48 = vsel %vm1181_vm2, %v3597_v25, %v3598_v44  ;;  %v7452_v62 = vsel %vm919_vm3, %v3452_v13, %v3453_v12  ;;  %v2775_v13 = vadd.f32 %v7181_v23, %v2710_v11 }
 0x475   : > { %v3629_v3 = vmul.f32 %v3615_v48, %v8843_v19  ;;  %v2778_v11 = vadd.f32 %v7199_v45, %v2713_v14 }
 0x476   : > { %v3242_v30 = vpop.f32.mrf.mxu0  ;;  %v3307_v56 = vpop.f32.mrf.mxu1  ;;  %v3336_v58 = vadd.f32 %v3305_v6, %v3061_v51  ;;  %v3506_v6 = vld [vmem:[%s8591_s13 + $0x60] sm:$0xff] }
 0x477   : > { %3690 = vmatmul.f32.gmra.mxu0 %v3629_v3  ;;  %v3308_v60 = vadd.f32 %v3307_v56, %v3242_v30  ;;  %3513 = vmatpush.msra.mxu3 %v3506_v6 }
 0x478   : > { %v3352_v37 = vmax.f32 %v3336_v58, 0.0 }
 0x479   : > { %v2967_v25 = vpop.f32.mrf.mxu2  ;;  %v3032_v61 = vpop.f32.mrf.mxu3 }
 0x47a   : > { %v3033_v57 = vadd.f32 %v3032_v61, %v2967_v25  ;;  %3421 = vmatmul.f32.gmra.mxu2 %v3352_v37  ;;  %v3454_v42 = vrot.slane %v3352_v37, 7  ;;  %v3599_v36 = vrot.slane %v3352_v37, 1  ;;  %v3504_v25 = vld [vmem:[%s8591_s13 + $0x50] sm:$0xff]  ;;  %v3503_v61 = vld [vmem:[%s8591_s13 + $0x48] sm:$0xff] }
 0x47c   : > { %v3062_v50 = vadd.f32 %v3033_v57, %v2775_v13  ;;  %v3614_v21 = vsel %vm1181_vm2, %v3598_v44, %v3599_v36  ;;  %v7471_v23 = vsel %vm919_vm3, %v3453_v12, %v3454_v42  ;;  %v3505_v12 = vld [vmem:[%s8591_s13 + $0x58] sm:$0xff]  ;;  %v2716_v57 = vadd.f32 %v7362_v0, %v7218_v26 }
 0x47d   : > { %v3630_v39 = vmul.f32 %v3614_v21, %v8848_v43  ;;  %3514 = vmatpush.msra.mxu3 %v3505_v12  ;;  %v3502_v21 = vld [vmem:[%s8591_s13 + $0x40] sm:$0xff]  ;;  %v3500_v12 = vld [vmem:[%s8591_s13 + $0x30] sm:$0xff] }
 0x47e   : > { %v3245_v29 = vpop.f32.mrf.mxu0  ;;  %v3310_v40 = vpop.f32.mrf.mxu1  ;;  %v3337_v44 = vadd.f32 %v3308_v60, %v3062_v50  ;;  %v2781_v14 = vadd.f32 %v7220_v53, %v2716_v57 }
 0x47f   : > { %3693 = vmatmul.f32.gmra.mxu0 %v3630_v39  ;;  %v3311_v58 = vadd.f32 %v3310_v40, %v3245_v29  ;;  %3515 = vmatpush.msra.mxu3 %v3504_v25 }
 0x480   : > { %v3353_v51 = vmax.f32 %v3337_v44, 0.0 }
 0x481   : > { %v2970_v48 = vpop.f32.mrf.mxu2  ;;  %v3035_v3 = vpop.f32.mrf.mxu3  ;;  %3516 = vmatpush.msra.mxu3 %v3503_v61 }
 0x482   : > { %v3036_v24 = vadd.f32 %v3035_v3, %v2970_v48  ;;  %3424 = vmatmul.f32.gmra.mxu2 %v3353_v51  ;;  %v3455_v30 = vrot.slane %v3353_v51, 7  ;;  %v3600_v56 = vrot.slane %v3353_v51, 1  ;;  %v3499_v48 = vld [vmem:[%s8591_s13 + $0x28] sm:$0xff]  ;;  %v8880_v3 = vld [vmem:[#allocation24_spill] sm:$0xff] }
 0x483   : > { %3517 = vmatpush.msra.mxu3 %v3502_v21 }
 0x484   : > { %v3063_v47 = vadd.f32 %v3036_v24, %v2778_v11  ;;  %v3613_v37 = vsel %vm1181_vm2, %v3599_v36, %v3600_v56  ;;  %v7493_v45 = vsel %vm919_vm3, %v3454_v42, %v3455_v30  ;;  %v3501_v42 = vld [vmem:[%s8591_s13 + $0x38] sm:$0xff]  ;;  %v2719_v24 = vadd.f32 %v7362_v0, %v7248_v22 }
 0x485   : > { %v3631_v13 = vmul.f32 %v3613_v37, %v8853_v59  ;;  %3518 = vmatpush.msra.mxu3 %v3501_v42  ;;  %v3498_v37 = vld [vmem:[%s8591_s13 + $0x20] sm:$0xff] }
 0x486   : > { %v3248_v60 = vpop.f32.mrf.mxu0  ;;  %v3313_v36 = vpop.f32.mrf.mxu1  ;;  %v3338_v50 = vadd.f32 %v3311_v58, %v3063_v47  ;;  %v2784_v57 = vadd.f32 %v7250_v38, %v2719_v24 }
 0x487   : > { %3696 = vmatmul.f32.gmra.mxu0 %v3631_v13  ;;  %v3314_v44 = vadd.f32 %v3313_v36, %v3248_v60  ;;  %3519 = vmatpush.msra.mxu3 %v3500_v12 }
 0x488   : > { %v3354_v35 = vmax.f32 %v3338_v50, 0.0  ;;  %v3496_v50 = vld [vmem:[%s8591_s13 + $0x10] sm:$0xff] }
 0x489   : > { %v2973_v20 = vpop.f32.mrf.mxu2  ;;  %v3038_v39 = vpop.f32.mrf.mxu3  ;;  %3520 = vmatpush.msra.mxu3 %v3499_v48 }
 0x48a   : > { %v3039_v26 = vadd.f32 %v3038_v39, %v2973_v20  ;;  %3427 = vmatmul.f32.gmra.mxu2 %v3354_v35  ;;  %v3456_v29 = vrot.slane %v3354_v35, 7  ;;  %v3601_v40 = vrot.slane %v3354_v35, 1  ;;  %v3495_v20 = vld [vmem:[%s8591_s13 + $0x8] sm:$0xff] }
 0x48b   : > { %3521 = vmatpush.msra.mxu3 %v3498_v37 }
 0x48c   : > { %v3064_v6 = vadd.f32 %v3039_v26, %v2781_v14  ;;  %v3612_v51 = vsel %vm1181_vm2, %v3600_v56, %v3601_v40  ;;  %v7515_v53 = vsel %vm919_vm3, %v3455_v30, %v3456_v29  ;;  %v3497_v30 = vld [vmem:[%s8591_s13 + $0x18] sm:$0xff]  ;;  %v2722_v14 = vadd.f32 %v7362_v0, %v7278_v52 }
 0x48d   : > { %v3632_v11 = vmul.f32 %v3612_v51, %v8880_v3  ;;  %3522 = vmatpush.msra.mxu3 %v3497_v30  ;;  %v2725_v30 = vadd.f32 %v7362_v0, %v7308_v41 }
 0x48e   : > { %v3251_v58 = vpop.f32.mrf.mxu0  ;;  %v3316_v56 = vpop.f32.mrf.mxu1  ;;  %v3339_v47 = vadd.f32 %v3314_v44, %v3064_v6 }
 0x48f   : > { %3699 = vmatmul.f32.gmra.mxu0 %v3632_v11  ;;  %v3317_v21 = vadd.f32 %v3316_v56, %v3251_v58  ;;  %3523 = vmatpush.msra.mxu3 %v3496_v50 }
 0x490   : > { %v3355_v25 = vmax.f32 %v3339_v47, 0.0 }
 0x491   : > { %v2976_v61 = vpop.f32.mrf.mxu2  ;;  %v3041_v13 = vpop.f32.mrf.mxu3  ;;  %3524 = vmatpush.msra.mxu3 %v3495_v20 }
 0x492   : > { %v3042_v22 = vadd.f32 %v3041_v13, %v2976_v61  ;;  %3430 = vmatmul.f32.gmra.mxu2 %v3355_v25  ;;  %v3457_v60 = vrot.slane %v3355_v25, 7  ;;  %v3602_v36 = vrot.slane %v3355_v25, 1 }
 0x494   : > { %v3065_v35 = vadd.f32 %v3042_v22, %v2784_v57  ;;  %v3611_v42 = vsel %vm1181_vm2, %v3601_v40, %v3602_v36  ;;  %v7537_v38 = vsel %vm919_vm3, %v3456_v29, %v3457_v60  ;;  %v3494_v40 = vld [vmem:[%s8591_s13] sm:$0xff]  ;;  %v2787_v29 = vadd.f32 %v7280_v1, %v2722_v14 }
 0x495   : > { %v3633_v39 = vmul.f32 %v3611_v42, %v8861_v54  ;;  %3525 = vmatpush.msra.mxu3 %v3494_v40 }
 0x496   : > { %v3254_v26 = vpop.f32.mrf.mxu0  ;;  %v3319_v44 = vpop.f32.mrf.mxu1  ;;  %v3340_v6 = vadd.f32 %v3317_v21, %v3065_v35  ;;  %v2790_v21 = vadd.f32 %v7310_v16, %v2725_v30 }
 0x497   : > { %3702 = vmatmul.f32.gmra.mxu0 %v3633_v39  ;;  %v3320_v52 = vadd.f32 %v3319_v44, %v3254_v26  ;;  %v2728_v26 = vadd.f32 %v7362_v0, %v7347_v17  ;;  %v8881_v0 = vld [vmem:[#allocation32_spill] sm:$0xff] }
 0x498   : > { %v3356_v51 = vmax.f32 %v3340_v6, 0.0 }
 0x499   : > { %v2979_v12 = vpop.f32.mrf.mxu2  ;;  %v3044_v48 = vpop.f32.mrf.mxu3 }
 0x49a   : > { %v3045_v11 = vadd.f32 %v3044_v48, %v2979_v12  ;;  %3433 = vmatmul.f32.gmra.mxu2 %v3356_v51  ;;  %v3458_v24 = vrot.slane %v3356_v51, 7  ;;  %v3603_v58 = vrot.slane %v3356_v51, 1  ;;  %v2793_v48 = vadd.f32 %v7349_v31, %v2728_v26  ;;  %v8887_v26 = vld [vmem:[#allocation13_spill] sm:$0xff] }
 0x49c   : > { %v3066_v56 = vadd.f32 %v3045_v11, %v2787_v29  ;;  %v3610_v47 = vsel %vm1181_vm2, %v3602_v36, %v3603_v58  ;;  %v7550_v37 = vsel %vm919_vm3, %v3457_v60, %v3458_v24 }
 0x49d   : > { %v3634_v25 = vmul.f32 %v3610_v47, %v8865_v2 }
 0x49e   : > { %v3257_v61 = vpop.f32.mrf.mxu0  ;;  %v3322_v1 = vpop.f32.mrf.mxu1  ;;  %v3341_v13 = vadd.f32 %v3320_v52, %v3066_v56 }
 0x49f   : > { %3705 = vmatmul.f32.gmra.mxu0 %v3634_v25  ;;  %v3323_v60 = vadd.f32 %v3322_v1, %v3257_v61 }
 0x4a0   : > { %v3357_v57 = vmax.f32 %v3341_v13, 0.0 }
 0x4a1   : > { %v2982_v22 = vpop.f32.mrf.mxu2  ;;  %v3047_v50 = vpop.f32.mrf.mxu3 }
 0x4a2   : > { %v3048_v35 = vadd.f32 %v3047_v50, %v2982_v22  ;;  %3436 = vmatmul.f32.gmra.mxu2 %v3357_v57  ;;  %v3459_v36 = vrot.slane %v3357_v57, 7  ;;  %v3604_v42 = vrot.slane %v3357_v57, 1  ;;  %v8882_v22 = vld [vmem:[#allocation9_spill] sm:$0xff] }
 0x4a4   : > { %v3067_v20 = vadd.f32 %v3048_v35, %v2790_v21  ;;  %v3609_v39 = vsel %vm1181_vm2, %v3603_v58, %v3604_v42  ;;  %v7560_v41 = vsel %vm919_vm3, %v3458_v24, %v3459_v36  ;;  %v8883_v21 = vld [vmem:[#allocation34_spill] sm:$0xff] }
 0x4a5   : > { %v3635_v14 = vmul.f32 %v3609_v39, %v8867_v27  ;;  %v8886_v39 = vld [vmem:[#allocation11_spill] sm:$0xff] }
 0x4a6   : > { %v3342_v44 = vadd.f32 %v3323_v60, %v3067_v20  ;;  %v3260_v16 = vpop.f32.mrf.mxu0  ;;  %v3325_v6 = vpop.f32.mrf.mxu1  ;;  %v8885_v60 = vld [vmem:[#allocation35_spill] sm:$0xff] }
 0x4a7   : > { %3708 = vmatmul.f32.gmra.mxu0 %v3635_v14  ;;  %v3326_v24 = vadd.f32 %v3325_v6, %v3260_v16  ;;  %v3480_v14 = vmul.f32 %v7402_v5, %v8886_v39  ;;  %v8888_v16 = vld [vmem:[#allocation15_spill] sm:$0xff] }
 0x4a8   : > { %v3358_v40 = vmax.f32 %v3342_v44, 0.0  ;;  %v3481_v44 = vmul.f32 %v7412_v9, %v8887_v26  ;;  %v3482_v15 = vmul.f32 %v7422_v63, %v8888_v16 }
 0x4a9   : > { %v2985_v51 = vpop.f32.mrf.mxu2  ;;  %v3050_v12 = vpop.f32.mrf.mxu3 }
 0x4aa   : > { %v3051_v29 = vadd.f32 %v3050_v12, %v2985_v51  ;;  %3439 = vmatmul.f32.gmra.mxu2 %v3358_v40  ;;  %v3460_v11 = vrot.slane %v3358_v40, 7  ;;  %v3605_v58 = vrot.slane %v3358_v40, 1  ;;  %v8891_v51 = vld [vmem:[#allocation21_spill] sm:$0xff]  ;;  %v8892_v12 = vld [vmem:[#allocation23_spill] sm:$0xff] }
 0x4ab   : > { %v3485_v5 = vmul.f32 %v7452_v62, %v8891_v51  ;;  %v3486_v9 = vmul.f32 %v7471_v23, %v8892_v12  ;;  %v5174_v62 = vld [vmem:[%s8593_s15 + $0x78] sm:$0xff]  ;;  %v5173_v23 = vld [vmem:[%s8593_s15 + $0x70] sm:$0xff] }
 0x4ac   : > { %v3068_v52 = vadd.f32 %v3051_v29, %v2793_v48  ;;  %v3608_v56 = vsel %vm1181_vm2, %v3604_v42, %v3605_v58  ;;  %v7570_v17 = vsel %vm919_vm3, %v3459_v36, %v3460_v11  ;;  %v8884_v42 = vld [vmem:[#allocation10_spill] sm:$0xff]  ;;  %v8893_v48 = vld [vmem:[#allocation25_spill] sm:$0xff]  ;;  %v8894_v29 = vld [vmem:[#allocation27_spill] sm:$0xff]  ;;  %3822 = vmatpush.msra.mxu1 %v5174_v62 }
 0x4ad   : > { %v3636_v47 = vmul.f32 %v3608_v56, %v8881_v0  ;;  %v3487_v63 = vmul.f32 %v7493_v45, %v8893_v48  ;;  %v8897_v56 = vld [vmem:[#allocation33_spill] sm:$0xff] }
 0x4ae   : > { %v3343_v25 = vadd.f32 %v3326_v24, %v3068_v52  ;;  %3823 = vmatpush.msra.mxu1 %v5173_v23  ;;  %v5170_v52 = vld [vmem:[%s8593_s15 + $0x58] sm:$0xff] }
 0x4af   : > { %3711 = vmatmul.f32.gmra.mxu0 %v3636_v47 }
 0x4b0   : > { %v3359_v30 = vmax.f32 %v3343_v25, 0.0  ;;  %v5169_v25 = vld [vmem:[%s8593_s15 + $0x50] sm:$0xff] }
 0x4b2   : > { %3442 = vmatmul.f32.gmra.mxu2 %v3359_v30  ;;  %v3461_v31 = vrot.slane %v3359_v30, 7  ;;  %v3606_v61 = vrot.slane %v3359_v30, 1  ;;  %v5168_v30 = vld [vmem:[%s8593_s15 + $0x48] sm:$0xff] }
 0x4b4   : > { %v3477_v1 = vsel %vm919_vm3, %v3461_v31, %v3446_v49  ;;  %v3607_v13 = vsel %vm1181_vm2, %v3605_v58, %v3606_v61  ;;  %v7581_v57 = vsel %vm919_vm3, %v3460_v11, %v3461_v31  ;;  %v3622_v36 = vsel %vm1181_vm2, %v3606_v61, %v3591_v4  ;;  %v8889_v4 = vld [vmem:[#allocation17_spill] sm:$0xff]  ;;  %v8895_v11 = vld [vmem:[#allocation30_spill] sm:$0xff]  ;;  %v8896_v58 = vld [vmem:[#allocation31_spill] sm:$0xff] }
 0x4b5   : > { %v3478_v50 = vmul.f32 %v3477_v1, %v8882_v22  ;;  %v3637_v35 = vmul.f32 %v3607_v13, %v8883_v21  ;;  %v3479_v49 = vmul.f32 %v7392_v10, %v8884_v42  ;;  %v3638_v20 = vmul.f32 %v3622_v36, %v8885_v60  ;;  %v8890_v10 = vld [vmem:[#allocation20_spill] sm:$0xff]  ;;  %v5214_v31 = vld [vmem:[%s8593_s15 + $0xb8] sm:$0xff]  ;;  %v5213_v61 = vld [vmem:[%s8593_s15 + $0xb0] sm:$0xff] }
 0x4b6   : > { %v3483_v6 = vmul.f32 %v7432_v46, %v8889_v4  ;;  %v3484_v40 = vmul.f32 %v7442_v18, %v8890_v10  ;;  %v3488_v46 = vmul.f32 %v7515_v53, %v8894_v29  ;;  %v3489_v18 = vmul.f32 %v7537_v38, %v8895_v11  ;;  %v5172_v53 = vld [vmem:[%s8593_s15 + $0x68] sm:$0xff]  ;;  %v5171_v38 = vld [vmem:[%s8593_s15 + $0x60] sm:$0xff]  ;;  %4177 = vmatpush.msrb.mxu3 %v5214_v31 }
 0x4b7   : > { %3526 = vmatmul.f32.vlgmr.msra.gmra.mxu3 %v3478_v50  ;;  %3714 = vmatmul.f32.gmra.mxu0 %v3637_v35  ;;  %v3490_v45 = vmul.f32 %v7550_v37, %v8896_v58  ;;  %v3491_v37 = vmul.f32 %v7560_v41, %v8897_v56  ;;  %v5167_v41 = vld [vmem:[%s8593_s15 + $0x40] sm:$0xff]  ;;  %v5212_v35 = vld [vmem:[%s8593_s15 + $0xa8] sm:$0xff] }
 0x4b8   : > { %3824 = vmatpush.msra.mxu1 %v5172_v53  ;;  %4178 = vmatpush.msrb.mxu3 %v5213_v61  ;;  %v8898_v13 = vld [vmem:[#allocation36_spill] sm:$0xff] }
 0x4b9   : > { %v3492_v50 = vmul.f32 %v7570_v17, %v8898_v13  ;;  %v5211_v36 = vld [vmem:[%s8593_s15 + $0xa0] sm:$0xff]  ;;  %v5209_v17 = vld [vmem:[%s8593_s15 + $0x90] sm:$0xff] }
 0x4ba   : > { %3825 = vmatpush.msra.mxu1 %v5171_v38  ;;  %4179 = vmatpush.msrb.mxu3 %v5212_v35 }
 0x4bc   : > { %3826 = vmatpush.msra.mxu1 %v5170_v52  ;;  %4180 = vmatpush.msrb.mxu3 %v5211_v36 }
 0x4bd   : > { %v3398_v24 = vpop.f32.mrf.mxu2 }
 0x4be   : > { %3827 = vmatpush.msra.mxu1 %v5169_v25 }
 0x4bf   : > { %3529 = vmatmul.f32.gmra.mxu3 %v3479_v49  ;;  %3717 = vmatmul.f32.gmra.mxu0 %v3638_v20  ;;  %v5210_v20 = vld [vmem:[%s8593_s15 + $0x98] sm:$0xff] }
 0x4c0   : > { %3828 = vmatpush.msra.mxu1 %v5168_v30  ;;  %4181 = vmatpush.msrb.mxu3 %v5210_v20 }
 0x4c2   : > { %3829 = vmatpush.msra.mxu1 %v5167_v41  ;;  %4182 = vmatpush.msrb.mxu3 %v5209_v17 }
 0x4c4   : > { %v3673_v47 = vpop.f32.mrf.mxu0 }
 0x4c5   : > { %v3401_v1 = vpop.f32.mrf.mxu2 }
 0x4c7   : > { %3532 = vmatmul.f32.gmra.mxu3 %v3480_v14 }
 0x4cc   : > { %v3676_v49 = vpop.f32.mrf.mxu0 }
 0x4cd   : > { %v3404_v14 = vpop.f32.mrf.mxu2 }
 0x4cf   : > { %3535 = vmatmul.f32.gmra.mxu3 %v3481_v44  ;;  %v8899_v44 = vld [vmem:[#allocation37_spill] sm:$0xff] }
 0x4d7   : > { %3538 = vmatmul.f32.gmra.mxu3 %v3482_v15  ;;  %v3493_v15 = vmul.f32 %v7581_v57, %v8899_v44 }
 0x4df   : > { %3541 = vmatmul.f32.gmra.mxu3 %v3483_v6  ;;  %v5208_v6 = vld [vmem:[%s8593_s15 + $0x88] sm:$0xff] }
 0x4e0   : > { %4183 = vmatpush.msrb.mxu3 %v5208_v6 }
 0x4e7   : > { %3544 = vmatmul.f32.gmra.mxu3 %v3484_v40  ;;  %v5207_v40 = vld [vmem:[%s8593_s15 + $0x80] sm:$0xff] }
 0x4e8   : > { %4184 = vmatpush.msrb.mxu3 %v5207_v40 }
 0x4ef   : > { %3547 = vmatmul.f32.gmra.mxu3 %v3485_v5  ;;  %v3679_v5 = vpop.f32.mrf.mxu0 }
 0x4f7   : > { %3550 = vmatmul.f32.gmra.mxu3 %v3486_v9  ;;  %v7671_v9 = vld [vmem:[%s8592_s14] ss:$0 sm:$0xff]  ;;  %v3682_v62 = vpop.f32.mrf.mxu0 }
 0x4f8   : > { %v3399_v57 = vadd.f32 %v7671_v9, %v3398_v24  ;;  %v3402_v38 = vadd.f32 %v7671_v9, %v3401_v1  ;;  %v3405_v41 = vadd.f32 %v7671_v9, %v3404_v14 }
 0x4ff   : > { %3553 = vmatmul.f32.gmra.mxu3 %v3487_v63  ;;  %v3407_v63 = vpop.f32.mrf.mxu2  ;;  %v3685_v30 = vpop.f32.mrf.mxu0 }
 0x500   : > { %v3408_v40 = vadd.f32 %v7671_v9, %v3407_v63 }
 0x507   : > { %3556 = vmatmul.f32.gmra.mxu3 %v3488_v46  ;;  %v3410_v53 = vpop.f32.mrf.mxu2  ;;  %v3688_v6 = vpop.f32.mrf.mxu0 }
 0x50f   : > { %3559 = vmatmul.f32.gmra.mxu3 %v3489_v18  ;;  %v3413_v35 = vpop.f32.mrf.mxu2 }
 0x517   : > { %3562 = vmatmul.f32.gmra.mxu3 %v3490_v45 }
 0x51f   : > { %3565 = vmatmul.f32.gmra.mxu3 %v3491_v37 }
 0x527   : > { %3568 = vmatmul.f32.gmra.mxu3 %v3492_v50 }
 0x52f   : > { %3571 = vmatmul.f32.gmra.mxu3 %v3493_v15 }
 0x53a   : > { %v3527_v46 = vpop.f32.mrf.mxu3 }
 0x53b   : > { %v3575_v18 = vadd.f32 %v3527_v46, %v3399_v57 }
 0x53d   : > { %v3721_v23 = vadd.f32 %v3673_v47, %v3575_v18 }
 0x53f   : > { %v7674_v45 = vmax.f32 %v3721_v23, 0.0 }
 0x541   : > { %5175 = vmatmul.msk.f32.vlgmr.msra.gmra.mxu1 %vm1441_vm4, %v7674_v45  ;;  %v3879_v24 = vrot.slane %v7674_v45, 7  ;;  %v4064_v61 = vrot.slane %v7674_v45, 1 }
 0x542   : > { %v3530_v52 = vpop.f32.mrf.mxu3 }
 0x543   : > { %v3576_v37 = vadd.f32 %v3530_v52, %v3402_v38 }
 0x545   : > { %v3722_v25 = vadd.f32 %v3676_v49, %v3576_v37 }
 0x547   : > { %v3738_v31 = vmax.f32 %v3722_v25, 0.0  ;;  %v3411_v25 = vadd.f32 %v7671_v9, %v3410_v53 }
 0x549   : > { %v3880_v47 = vrot.slane %v3738_v31, 7  ;;  %v4065_v50 = vrot.slane %v3738_v31, 1  ;;  %5176 = vmatmul.msk.f32.gmra.mxu1 %vm1441_vm4, %v3738_v31 }
 0x54a   : > { %v3533_v1 = vpop.f32.mrf.mxu3 }
 0x54b   : > { %v4094_v36 = vsel %vm1181_vm2, %v4064_v61, %v4065_v50  ;;  %v3577_v49 = vadd.f32 %v3533_v1, %v3405_v41  ;;  %v7691_v20 = vsel %vm919_vm3, %v3879_v24, %v3880_v47  ;;  %v3691_v1 = vpop.f32.mrf.mxu0 }
 0x54c   : > { %v4096_v17 = vmul.f32 %v4094_v36, %v5691_v33  ;;  %v3416_v33 = vpop.f32.mrf.mxu2 }
 0x54d   : > { %v3723_v14 = vadd.f32 %v3679_v5, %v3577_v49 }
 0x54e   : > { %5215 = vmatmul.msk.f32.vlgmr.msrb.gmra.mxu3 %vm1441_vm4, %v4096_v17 }
 0x54f   : > { %v3739_v15 = vmax.f32 %v3723_v14, 0.0  ;;  %v3414_v14 = vadd.f32 %v7671_v9, %v3413_v35 }
 0x551   : > { %v3881_v57 = vrot.slane %v3739_v15, 7  ;;  %v4066_v46 = vrot.slane %v3739_v15, 1  ;;  %5177 = vmatmul.msk.f32.gmra.mxu1 %vm1441_vm4, %v3739_v15 }
 0x552   : > { %v3536_v18 = vpop.f32.mrf.mxu3 }
 0x553   : > { %v3578_v23 = vadd.f32 %v3536_v18, %v3408_v40  ;;  %v4093_v38 = vsel %vm1181_vm2, %v4065_v50, %v4066_v46  ;;  %v7701_v52 = vsel %vm919_vm3, %v3880_v47, %v3881_v57 }
 0x554   : > { %v4097_v5 = vmul.f32 %v4093_v38, %v5693_v34  ;;  %v3419_v17 = vpop.f32.mrf.mxu2 }
 0x555   : > { %v3724_v37 = vadd.f32 %v3682_v62, %v3578_v23 }
 0x556   : > { %5216 = vmatmul.msk.f32.gmra.mxu3 %vm1441_vm4, %v4097_v5 }
 0x557   : > { %v3740_v63 = vmax.f32 %v3724_v37, 0.0  ;;  %v3417_v37 = vadd.f32 %v7671_v9, %v3416_v33 }
 0x559   : > { %v3882_v31 = vrot.slane %v3740_v63, 7  ;;  %v4067_v41 = vrot.slane %v3740_v63, 1  ;;  %5178 = vmatmul.msk.f32.gmra.mxu1 %vm1441_vm4, %v3740_v63 }
 0x55a   : > { %v3539_v36 = vpop.f32.mrf.mxu3 }
 0x55b   : > { %v3579_v50 = vadd.f32 %v3539_v36, %v3411_v25  ;;  %v4092_v47 = vsel %vm1181_vm2, %v4066_v46, %v4067_v41  ;;  %v7711_v49 = vsel %vm919_vm3, %v3881_v57, %v3882_v31 }
 0x55c   : > { %v4098_v34 = vmul.f32 %v4092_v47, %v8829_v32  ;;  %v3694_v32 = vpop.f32.mrf.mxu0  ;;  %v3422_v5 = vpop.f32.mrf.mxu2 }
 0x55d   : > { %v3725_v62 = vadd.f32 %v3685_v30, %v3579_v50 }
 0x55e   : > { %5217 = vmatmul.msk.f32.gmra.mxu3 %vm1441_vm4, %v4098_v34  ;;  %v3420_v34 = vadd.f32 %v7671_v9, %v3419_v17 }
 0x55f   : > { %v3741_v53 = vmax.f32 %v3725_v62, 0.0 }
 0x561   : > { %v3883_v15 = vrot.slane %v3741_v53, 7  ;;  %v4068_v40 = vrot.slane %v3741_v53, 1  ;;  %5179 = vmatmul.msk.f32.gmra.mxu1 %vm1441_vm4, %v3741_v53 }
 0x562   : > { %v3542_v18 = vpop.f32.mrf.mxu3 }
 0x563   : > { %v3580_v23 = vadd.f32 %v3542_v18, %v3414_v14  ;;  %v4091_v46 = vsel %vm1181_vm2, %v4067_v41, %v4068_v40  ;;  %v7721_v57 = vsel %vm919_vm3, %v3882_v31, %v3883_v15 }
 0x564   : > { %v4099_v30 = vmul.f32 %v4091_v46, %v8833_v7  ;;  %v3697_v47 = vpop.f32.mrf.mxu0  ;;  %v3425_v14 = vpop.f32.mrf.mxu2  ;;  %v3915_v28 = vmul.f32 %v7721_v57, %v8888_v16  ;;  %v7913_v57 = vld [vmem:[%s8594_s16] ss:$0 sm:$0xff] }
 0x565   : > { %v3726_v38 = vadd.f32 %v3688_v6, %v3580_v23 }
 0x566   : > { %5218 = vmatmul.msk.f32.gmra.mxu3 %vm1441_vm4, %v4099_v30  ;;  %v3423_v30 = vadd.f32 %v7671_v9, %v3422_v5 }
 0x567   : > { %v3742_v35 = vmax.f32 %v3726_v38, 0.0 }
 0x569   : > { %v3884_v63 = vrot.slane %v3742_v35, 7  ;;  %v4069_v25 = vrot.slane %v3742_v35, 1  ;;  %5180 = vmatmul.msk.f32.gmra.mxu1 %vm1441_vm4, %v3742_v35 }
 0x56a   : > { %v3545_v36 = vpop.f32.mrf.mxu3 }
 0x56b   : > { %v3581_v41 = vadd.f32 %v3545_v36, %v3417_v37  ;;  %v4090_v31 = vsel %vm1181_vm2, %v4068_v40, %v4069_v25  ;;  %v7731_v50 = vsel %vm919_vm3, %v3883_v15, %v3884_v63 }
 0x56c   : > { %v4100_v7 = vmul.f32 %v4090_v31, %v8837_v8  ;;  %v3700_v46 = vpop.f32.mrf.mxu0  ;;  %v3426_v31 = vadd.f32 %v7671_v9, %v3425_v14 }
 0x56d   : > { %v3727_v6 = vadd.f32 %v3691_v1, %v3581_v41 }
 0x56e   : > { %5219 = vmatmul.msk.f32.gmra.mxu3 %vm1441_vm4, %v4100_v7 }
 0x56f   : > { %v3743_v33 = vmax.f32 %v3727_v6, 0.0 }
 0x571   : > { %v3885_v62 = vrot.slane %v3743_v33, 7  ;;  %v4070_v53 = vrot.slane %v3743_v33, 1  ;;  %5181 = vmatmul.msk.f32.gmra.mxu1 %vm1441_vm4, %v3743_v33  ;;  %v3934_v33 = vld [vmem:[%s8593_s15 + $0x38] sm:$0xff] }
 0x572   : > { %v3548_v18 = vpop.f32.mrf.mxu3  ;;  %3991 = vmatpush.msra.mxu2 %v3934_v33 }
 0x573   : > { %v3582_v40 = vadd.f32 %v3548_v18, %v3420_v34  ;;  %v4089_v15 = vsel %vm1181_vm2, %v4069_v25, %v4070_v53  ;;  %v7741_v8 = vsel %vm919_vm3, %v3884_v63, %v3885_v62 }
 0x574   : > { %v4101_v1 = vmul.f32 %v4089_v15, %v8841_v55  ;;  %v3428_v55 = vpop.f32.mrf.mxu2  ;;  %v3703_v34 = vpop.f32.mrf.mxu0 }
 0x575   : > { %v3728_v23 = vadd.f32 %v3694_v32, %v3582_v40 }
 0x576   : > { %5220 = vmatmul.msk.f32.gmra.mxu3 %vm1441_vm4, %v4101_v1  ;;  %v3429_v1 = vadd.f32 %v7671_v9, %v3428_v55 }
 0x577   : > { %v3744_v17 = vmax.f32 %v3728_v23, 0.0 }
 0x579   : > { %v3886_v38 = vrot.slane %v3744_v17, 7  ;;  %v4071_v35 = vrot.slane %v3744_v17, 1  ;;  %5182 = vmatmul.msk.f32.gmra.mxu1 %vm1441_vm4, %v3744_v17 }
 0x57a   : > { %v3551_v37 = vpop.f32.mrf.mxu3 }
 0x57b   : > { %v3583_v36 = vadd.f32 %v3551_v37, %v3423_v30  ;;  %v4088_v25 = vsel %vm1181_vm2, %v4070_v53, %v4071_v35  ;;  %v7751_v63 = vsel %vm919_vm3, %v3885_v62, %v3886_v38 }
 0x57c   : > { %v4102_v32 = vmul.f32 %v4088_v25, %v8843_v19  ;;  %v3431_v40 = vpop.f32.mrf.mxu2 }
 0x57d   : > { %v3729_v41 = vadd.f32 %v3697_v47, %v3583_v36 }
 0x57e   : > { %5221 = vmatmul.msk.f32.gmra.mxu3 %vm1441_vm4, %v4102_v32  ;;  %v3432_v32 = vadd.f32 %v7671_v9, %v3431_v40 }
 0x57f   : > { %v3745_v5 = vmax.f32 %v3729_v41, 0.0 }
 0x581   : > { %v3887_v7 = vrot.slane %v3745_v5, 7  ;;  %v4072_v6 = vrot.slane %v3745_v5, 1  ;;  %5183 = vmatmul.msk.f32.gmra.mxu1 %vm1441_vm4, %v3745_v5 }
 0x582   : > { %v3554_v62 = vpop.f32.mrf.mxu3 }
 0x583   : > { %v3584_v53 = vadd.f32 %v3554_v62, %v3426_v31  ;;  %v4087_v19 = vsel %vm1181_vm2, %v4071_v35, %v4072_v6  ;;  %v7764_v47 = vsel %vm919_vm3, %v3886_v38, %v3887_v7  ;;  %v3933_v31 = vld [vmem:[%s8593_s15 + $0x30] sm:$0xff] }
 0x584   : > { %v4103_v14 = vmul.f32 %v4087_v19, %v8848_v43  ;;  %v3706_v43 = vpop.f32.mrf.mxu0  ;;  %v3434_v55 = vpop.f32.mrf.mxu2  ;;  %3992 = vmatpush.msra.mxu2 %v3933_v31 }
 0x585   : > { %v3730_v18 = vadd.f32 %v3700_v46, %v3584_v53  ;;  %v3932_v53 = vld [vmem:[%s8593_s15 + $0x28] sm:$0xff]  ;;  %v3435_v40 = vadd.f32 %v7671_v9, %v3434_v55  ;;  %v3927_v55 = vld [vmem:[%s8593_s15] sm:$0xff] }
 0x586   : > { %5222 = vmatmul.msk.f32.gmra.mxu3 %vm1441_vm4, %v4103_v14  ;;  %3993 = vmatpush.msra.mxu2 %v3932_v53 }
 0x587   : > { %v3746_v15 = vmax.f32 %v3730_v18, 0.0  ;;  %v3931_v18 = vld [vmem:[%s8593_s15 + $0x20] sm:$0xff] }
 0x588   : > { %3994 = vmatpush.msra.mxu2 %v3931_v18 }
 0x589   : > { %v3888_v23 = vrot.slane %v3746_v15, 7  ;;  %v4073_v17 = vrot.slane %v3746_v15, 1  ;;  %5184 = vmatmul.msk.f32.gmra.mxu1 %vm1441_vm4, %v3746_v15 }
 0x58a   : > { %v3557_v30 = vpop.f32.mrf.mxu3 }
 0x58b   : > { %v3585_v37 = vadd.f32 %v3557_v30, %v3429_v1  ;;  %v4086_v35 = vsel %vm1181_vm2, %v4072_v6, %v4073_v17  ;;  %v7774_v38 = vsel %vm919_vm3, %v3887_v7, %v3888_v23 }
 0x58c   : > { %v4104_v46 = vmul.f32 %v4086_v35, %v8853_v59  ;;  %v3709_v19 = vpop.f32.mrf.mxu0  ;;  %v3929_v35 = vld [vmem:[%s8593_s15 + $0x10] sm:$0xff]  ;;  %v3920_v16 = vmul.f32 %v7774_v38, %v8893_v48 }
 0x58d   : > { %v3731_v36 = vadd.f32 %v3703_v34, %v3585_v37 }
 0x58e   : > { %5223 = vmatmul.msk.f32.gmra.mxu3 %vm1441_vm4, %v4104_v46 }
 0x58f   : > { %v3747_v25 = vmax.f32 %v3731_v36, 0.0  ;;  %v3928_v36 = vld [vmem:[%s8593_s15 + $0x8] sm:$0xff] }
 0x591   : > { %v3889_v41 = vrot.slane %v3747_v25, 7  ;;  %v4074_v5 = vrot.slane %v3747_v25, 1  ;;  %5185 = vmatmul.msk.f32.gmra.mxu1 %vm1441_vm4, %v3747_v25 }
 0x592   : > { %v3560_v7 = vpop.f32.mrf.mxu3 }
 0x593   : > { %v3586_v6 = vadd.f32 %v3560_v7, %v3432_v32  ;;  %v4085_v59 = vsel %vm1181_vm2, %v4073_v17, %v4074_v5  ;;  %v7787_v33 = vsel %vm919_vm3, %v3888_v23, %v3889_v41  ;;  %v3437_v23 = vpop.f32.mrf.mxu2 }
 0x594   : > { %v4105_v34 = vmul.f32 %v4085_v59, %v8880_v3  ;;  %v3930_v3 = vld [vmem:[%s8593_s15 + $0x18] sm:$0xff] }
 0x595   : > { %v3732_v62 = vadd.f32 %v3706_v43, %v3586_v6  ;;  %3995 = vmatpush.msra.mxu2 %v3930_v3 }
 0x596   : > { %5224 = vmatmul.msk.f32.gmra.mxu3 %vm1441_vm4, %v4105_v34 }
 0x597   : > { %v3748_v14 = vmax.f32 %v3732_v62, 0.0  ;;  %3996 = vmatpush.msra.mxu2 %v3929_v35 }
 0x599   : > { %v3890_v15 = vrot.slane %v3748_v14, 7  ;;  %v4075_v1 = vrot.slane %v3748_v14, 1  ;;  %5186 = vmatmul.msk.f32.gmra.mxu1 %vm1441_vm4, %v3748_v14  ;;  %3997 = vmatpush.msra.mxu2 %v3928_v36 }
 0x59a   : > { %v3563_v17 = vpop.f32.mrf.mxu3 }
 0x59b   : > { %v3587_v30 = vadd.f32 %v3563_v17, %v3435_v40  ;;  %v4084_v37 = vsel %vm1181_vm2, %v4074_v5, %v4075_v1  ;;  %v7809_v43 = vsel %vm919_vm3, %v3889_v41, %v3890_v15  ;;  %v3712_v5 = vpop.f32.mrf.mxu0  ;;  %3998 = vmatpush.msra.mxu2 %v3927_v55  ;;  %v3438_v41 = vadd.f32 %v7671_v9, %v3437_v23  ;;  %v3440_v62 = vpop.f32.mrf.mxu2 }
 0x59c   : > { %v4106_v46 = vmul.f32 %v4084_v37, %v8861_v54  ;;  %v3441_v18 = vadd.f32 %v7671_v9, %v3440_v62 }
 0x59d   : > { %v3733_v25 = vadd.f32 %v3709_v19, %v3587_v30 }
 0x59e   : > { %5225 = vmatmul.msk.f32.gmra.mxu3 %vm1441_vm4, %v4106_v46 }
 0x59f   : > { %v3749_v32 = vmax.f32 %v3733_v25, 0.0 }
 0x5a1   : > { %v3891_v31 = vrot.slane %v3749_v32, 7  ;;  %v4076_v54 = vrot.slane %v3749_v32, 1  ;;  %5187 = vmatmul.msk.f32.gmra.mxu1 %vm1441_vm4, %v3749_v32 }
 0x5a2   : > { %v3566_v7 = vpop.f32.mrf.mxu3 }
 0x5a3   : > { %v3588_v6 = vadd.f32 %v3566_v7, %v3438_v41  ;;  %v4083_v59 = vsel %vm1181_vm2, %v4075_v1, %v4076_v54  ;;  %v7825_v34 = vsel %vm919_vm3, %v3890_v15, %v3891_v31  ;;  %v3715_v23 = vpop.f32.mrf.mxu0  ;;  %v3443_v35 = vpop.f32.mrf.mxu2 }
 0x5a4   : > { %v4107_v53 = vmul.f32 %v4083_v59, %v8865_v2  ;;  %v3444_v36 = vadd.f32 %v7671_v9, %v3443_v35 }
 0x5a5   : > { %v3734_v19 = vadd.f32 %v3712_v5, %v3588_v6 }
 0x5a6   : > { %5226 = vmatmul.msk.f32.gmra.mxu3 %vm1441_vm4, %v4107_v53 }
 0x5a7   : > { %v3750_v14 = vmax.f32 %v3734_v19, 0.0 }
 0x5a9   : > { %v3892_v40 = vrot.slane %v3750_v14, 7  ;;  %v4077_v3 = vrot.slane %v3750_v14, 1  ;;  %5188 = vmatmul.msk.f32.gmra.mxu1 %vm1441_vm4, %v3750_v14 }
 0x5aa   : > { %v3569_v17 = vpop.f32.mrf.mxu3 }
 0x5ab   : > { %v3589_v1 = vadd.f32 %v3569_v17, %v3441_v18  ;;  %v4082_v15 = vsel %vm1181_vm2, %v4076_v54, %v4077_v3  ;;  %v3897_v30 = vsel %vm919_vm3, %v3891_v31, %v3892_v40 }
 0x5ac   : > { %v4108_v2 = vmul.f32 %v4082_v15, %v8867_v27  ;;  %v3718_v27 = vpop.f32.mrf.mxu0  ;;  %v3924_v45 = vmul.f32 %v3897_v30, %v8897_v56 }
 0x5ad   : > { %v3735_v37 = vadd.f32 %v3715_v23, %v3589_v1 }
 0x5ae   : > { %5227 = vmatmul.msk.f32.gmra.mxu3 %vm1441_vm4, %v4108_v2 }
 0x5af   : > { %v3751_v46 = vmax.f32 %v3735_v37, 0.0 }
 0x5b1   : > { %v3893_v25 = vrot.slane %v3751_v46, 7  ;;  %v4078_v55 = vrot.slane %v3751_v46, 1  ;;  %5189 = vmatmul.msk.f32.gmra.mxu1 %vm1441_vm4, %v3751_v46 }
 0x5b2   : > { %v3572_v32 = vpop.f32.mrf.mxu3 }
 0x5b3   : > { %v3590_v5 = vadd.f32 %v3572_v32, %v3444_v36  ;;  %v4081_v41 = vsel %vm1181_vm2, %v4077_v3, %v4078_v55  ;;  %v3896_v31 = vsel %vm919_vm3, %v3892_v40, %v3893_v25 }
 0x5b4   : > { %v4109_v54 = vmul.f32 %v4081_v41, %v8881_v0 }
 0x5b5   : > { %v3736_v7 = vadd.f32 %v3718_v27, %v3590_v5 }
 0x5b6   : > { %5228 = vmatmul.msk.f32.gmra.mxu3 %vm1441_vm4, %v4109_v54 }
 0x5b7   : > { %v3752_v6 = vmax.f32 %v3736_v7, 0.0 }
 0x5b9   : > { %v3894_v9 = vrot.slane %v3752_v6, 7  ;;  %v4079_v59 = vrot.slane %v3752_v6, 1  ;;  %5190 = vmatmul.msk.f32.gmra.mxu1 %vm1441_vm4, %v3752_v6 }
 0x5bb   : > { %v3910_v62 = vsel %vm919_vm3, %v3894_v9, %v3879_v24  ;;  %v4080_v53 = vsel %vm1181_vm2, %v4078_v55, %v4079_v59  ;;  %v3895_v19 = vsel %vm919_vm3, %v3893_v25, %v3894_v9  ;;  %v4095_v18 = vsel %vm1181_vm2, %v4079_v59, %v4064_v61 }
 0x5bc   : > { %v3911_v0 = vmul.f32 %v3910_v62, %v8882_v22  ;;  %v4110_v14 = vmul.f32 %v4080_v53, %v8883_v21  ;;  %v3912_v24 = vmul.f32 %v7691_v20, %v8884_v42  ;;  %v4111_v40 = vmul.f32 %v4095_v18, %v8885_v60 }
 0x5bd   : > { %v3913_v22 = vmul.f32 %v7701_v52, %v8886_v39  ;;  %v3914_v21 = vmul.f32 %v7711_v49, %v8887_v26  ;;  %v3916_v42 = vmul.f32 %v7731_v50, %v8889_v4  ;;  %v3917_v60 = vmul.f32 %v7741_v8, %v8890_v10  ;;  %v4266_v4 = vld [vmem:[%s8900_s28] sm:$0x3] }
 0x5be   : > { %5191 = vmatmul.msk.f32.vlgmr.msra.gmra.mxu2 %vm1441_vm4, %v3911_v0  ;;  %5229 = vmatmul.msk.f32.gmra.mxu3 %vm1441_vm4, %v4110_v14  ;;  %v3918_v39 = vmul.f32 %v7751_v63, %v8891_v51  ;;  %v3919_v26 = vmul.f32 %v7764_v47, %v8892_v12  ;;  %v3921_v10 = vmul.f32 %v7787_v33, %v8894_v29  ;;  %v3831_v48 = vpop.f32.mrf.mxu1 }
 0x5bf   : > { %5231 = vmatpush.msk.msra.mxu0 %vm832_vm0, %v4266_v4  ;;  %v3922_v51 = vmul.f32 %v7809_v43, %v8895_v11  ;;  %v3923_v12 = vmul.f32 %v7825_v34, %v8896_v58  ;;  %v3925_v29 = vmul.f32 %v3896_v31, %v8898_v13  ;;  %v3926_v49 = vmul.f32 %v3895_v19, %v8899_v44 }
 0x5c0   : > { %v3832_v50 = vadd.f32 %v7913_v57, %v3831_v48 }
 0x5c6   : > { %5192 = vmatmul.msk.f32.gmra.mxu2 %vm1441_vm4, %v3912_v24  ;;  %5230 = vmatmul.msk.f32.gmra.mxu3 %vm1441_vm4, %v4111_v40  ;;  %v3834_v20 = vpop.f32.mrf.mxu1 }
 0x5c7   : > { %v3835_v43 = vadd.f32 %v7913_v57, %v3834_v20 }
 0x5ce   : > { %5193 = vmatmul.msk.f32.gmra.mxu2 %vm1441_vm4, %v3913_v22  ;;  %v3837_v11 = vpop.f32.mrf.mxu1 }
 0x5cf   : > { %v3838_v1 = vadd.f32 %v7913_v57, %v3837_v11 }
 0x5d1   : > { %v4186_v61 = vpop.f32.mrf.mxu3 }
 0x5d6   : > { %5194 = vmatmul.msk.f32.gmra.mxu2 %vm1441_vm4, %v3914_v21  ;;  %v3840_v56 = vpop.f32.mrf.mxu1 }
 0x5d7   : > { %v3841_v36 = vadd.f32 %v7913_v57, %v3840_v56 }
 0x5d9   : > { %v4189_v52 = vpop.f32.mrf.mxu3 }
 0x5de   : > { %5195 = vmatmul.msk.f32.gmra.mxu2 %vm1441_vm4, %v3915_v28  ;;  %v3843_v33 = vpop.f32.mrf.mxu1 }
 0x5df   : > { %v3844_v31 = vadd.f32 %v7913_v57, %v3843_v33 }
 0x5e1   : > { %v4192_v58 = vpop.f32.mrf.mxu3 }
 0x5e6   : > { %5196 = vmatmul.msk.f32.gmra.mxu2 %vm1441_vm4, %v3916_v42  ;;  %v3846_v15 = vpop.f32.mrf.mxu1 }
 0x5e7   : > { %v3847_v62 = vadd.f32 %v7913_v57, %v3846_v15 }
 0x5e9   : > { %v4195_v13 = vpop.f32.mrf.mxu3 }
 0x5ee   : > { %5197 = vmatmul.msk.f32.gmra.mxu2 %vm1441_vm4, %v3917_v60  ;;  %v3849_v32 = vpop.f32.mrf.mxu1 }
 0x5ef   : > { %v3850_v40 = vadd.f32 %v7913_v57, %v3849_v32 }
 0x5f1   : > { %v4198_v23 = vpop.f32.mrf.mxu3 }
 0x5f6   : > { %5198 = vmatmul.msk.f32.gmra.mxu2 %vm1441_vm4, %v3918_v39  ;;  %v3852_v9 = vpop.f32.mrf.mxu1 }
 0x5f7   : > { %v3853_v39 = vadd.f32 %v7913_v57, %v3852_v9 }
 0x5f9   : > { %v4201_v46 = vpop.f32.mrf.mxu3 }
 0x5fe   : > { %5199 = vmatmul.msk.f32.gmra.mxu2 %vm1441_vm4, %v3919_v26  ;;  %v3855_v24 = vpop.f32.mrf.mxu1 }
 0x5ff   : > { %v3856_v48 = vadd.f32 %v7913_v57, %v3855_v24 }
 0x601   : > { %v4204_v27 = vpop.f32.mrf.mxu3 }
 0x606   : > { %5200 = vmatmul.msk.f32.gmra.mxu2 %vm1441_vm4, %v3920_v16  ;;  %v3858_v26 = vpop.f32.mrf.mxu1 }
 0x607   : > { %v3859_v11 = vadd.f32 %v7913_v57, %v3858_v26 }
 0x609   : > { %v4207_v0 = vpop.f32.mrf.mxu3 }
 0x60e   : > { %5201 = vmatmul.msk.f32.gmra.mxu2 %vm1441_vm4, %v3921_v10  ;;  %v3861_v20 = vpop.f32.mrf.mxu1 }
 0x611   : > { %v4210_v42 = vpop.f32.mrf.mxu3 }
 0x616   : > { %5202 = vmatmul.msk.f32.gmra.mxu2 %vm1441_vm4, %v3922_v51 }
 0x61e   : > { %5203 = vmatmul.msk.f32.gmra.mxu2 %vm1441_vm4, %v3923_v12  ;;  %v4213_v12 = vpop.f32.mrf.mxu3 }
 0x626   : > { %5204 = vmatmul.msk.f32.gmra.mxu2 %vm1441_vm4, %v3924_v45 }
 0x62e   : > { %5205 = vmatmul.msk.f32.gmra.mxu2 %vm1441_vm4, %v3925_v29 }
 0x636   : > { %5206 = vmatmul.msk.f32.gmra.mxu2 %vm1441_vm4, %v3926_v49  ;;  %v4216_v49 = vpop.f32.mrf.mxu3 }
 0x63e   : > { %v4219_v33 = vpop.f32.mrf.mxu3 }
 0x641   : > { %v4000_v8 = vpop.f32.mrf.mxu2 }
 0x642   : > { %v4048_v63 = vadd.f32 %v4000_v8, %v3832_v50  ;;  %v3864_v8 = vpop.f32.mrf.mxu1 }
 0x644   : > { %v4234_v47 = vadd.f32 %v4186_v61, %v4048_v63 }
 0x646   : > { %v4250_v38 = vmax.f32 %v4234_v47, 0.0  ;;  %v4222_v15 = vpop.f32.mrf.mxu3 }
 0x648   : > { %5232 = vmatmul.msk.f32.vlgmr.msra.gmra.mxu0 %vm783_vm1, %v4250_v38 }
 0x649   : > { %v4003_v44 = vpop.f32.mrf.mxu2 }
 0x64a   : > { %v4049_v34 = vadd.f32 %v4003_v44, %v3835_v43 }
 0x64c   : > { %v4235_v3 = vadd.f32 %v4189_v52, %v4049_v34  ;;  %v3867_v34 = vpop.f32.mrf.mxu1 }
 0x64e   : > { %v4251_v17 = vmax.f32 %v4235_v3, 0.0  ;;  %v3865_v3 = vadd.f32 %v7913_v57, %v3864_v8 }
 0x650   : > { %5233 = vmatmul.msk.f32.gmra.mxu0 %vm783_vm1, %v4251_v17 }
 0x651   : > { %v4006_v30 = vpop.f32.mrf.mxu2 }
 0x652   : > { %v4050_v2 = vadd.f32 %v4006_v30, %v3838_v1 }
 0x654   : > { %v4236_v37 = vadd.f32 %v4192_v58, %v4050_v2  ;;  %v3868_v2 = vadd.f32 %v7913_v57, %v3867_v34  ;;  %v4393_v34 = vld [vmem:[%s8901_s0 + $0x50] sm:$0xff] }
 0x656   : > { %v4252_v35 = vmax.f32 %v4236_v37, 0.0  ;;  %v3870_v37 = vpop.f32.mrf.mxu1 }
 0x657   : > { %v3871_v32 = vadd.f32 %v7913_v57, %v3870_v37  ;;  %v4389_v37 = vld [vmem:[%s8901_s0 + $0x30] sm:$0xff] }
 0x658   : > { %5234 = vmatmul.msk.f32.gmra.mxu0 %vm783_vm1, %v4252_v35 }
 0x659   : > { %v4009_v25 = vpop.f32.mrf.mxu2 }
 0x65a   : > { %v4051_v55 = vadd.f32 %v4009_v25, %v3841_v36 }
 0x65c   : > { %v4237_v5 = vadd.f32 %v4195_v13, %v4051_v55  ;;  %v3862_v13 = vadd.f32 %v7913_v57, %v3861_v20  ;;  %v4225_v55 = vpop.f32.mrf.mxu3  ;;  %v4398_v20 = vld [vmem:[%s8901_s0 + $0x78] sm:$0xff] }
 0x65e   : > { %v4253_v41 = vmax.f32 %v4237_v5, 0.0 }
 0x660   : > { %5235 = vmatmul.msk.f32.gmra.mxu0 %vm783_vm1, %v4253_v41 }
 0x661   : > { %v4012_v54 = vpop.f32.mrf.mxu2 }
 0x662   : > { %v4052_v7 = vadd.f32 %v4012_v54, %v3844_v31  ;;  %v3873_v31 = vpop.f32.mrf.mxu1 }
 0x664   : > { %v4238_v6 = vadd.f32 %v4198_v23, %v4052_v7  ;;  %v3874_v7 = vadd.f32 %v7913_v57, %v3873_v31 }
 0x666   : > { %v4254_v59 = vmax.f32 %v4238_v6, 0.0  ;;  %v4228_v6 = vpop.f32.mrf.mxu3 }
 0x668   : > { %5236 = vmatmul.msk.f32.gmra.mxu0 %vm783_vm1, %v4254_v59 }
 0x669   : > { %v4015_v53 = vpop.f32.mrf.mxu2 }
 0x66a   : > { %v4053_v19 = vadd.f32 %v4015_v53, %v3847_v62  ;;  %v3876_v53 = vpop.f32.mrf.mxu1 }
 0x66c   : > { %v4239_v14 = vadd.f32 %v4201_v46, %v4053_v19 }
 0x66e   : > { %v4255_v18 = vmax.f32 %v4239_v14, 0.0  ;;  %v4231_v24 = vpop.f32.mrf.mxu3 }
 0x670   : > { %5237 = vmatmul.msk.f32.gmra.mxu0 %vm783_vm1, %v4255_v18 }
 0x671   : > { %v4018_v22 = vpop.f32.mrf.mxu2 }
 0x672   : > { %v4054_v21 = vadd.f32 %v4018_v22, %v3850_v40 }
 0x674   : > { %v4240_v28 = vadd.f32 %v4204_v27, %v4054_v21 }
 0x676   : > { %v4256_v60 = vmax.f32 %v4240_v28, 0.0 }
 0x678   : > { %5238 = vmatmul.msk.f32.gmra.mxu0 %vm783_vm1, %v4256_v60 }
 0x679   : > { %v4021_v16 = vpop.f32.mrf.mxu2 }
 0x67a   : > { %v4055_v4 = vadd.f32 %v4021_v16, %v3853_v39 }
 0x67c   : > { %v4241_v10 = vadd.f32 %v4207_v0, %v4055_v4  ;;  %v3877_v0 = vadd.f32 %v7913_v57, %v3876_v53  ;;  %v4445_v53 = vld [vmem:[%s8595_s17 + $0x48] sm:$0xff] }
 0x67e   : > { %v4257_v51 = vmax.f32 %v4241_v10, 0.0 }
 0x680   : > { %5239 = vmatmul.msk.f32.gmra.mxu0 %vm783_vm1, %v4257_v51 }
 0x681   : > { %v4024_v45 = vpop.f32.mrf.mxu2 }
 0x682   : > { %v4056_v61 = vadd.f32 %v4024_v45, %v3856_v48 }
 0x684   : > { %v4242_v29 = vadd.f32 %v4210_v42, %v4056_v61 }
 0x686   : > { %v4258_v52 = vmax.f32 %v4242_v29, 0.0  ;;  %v4397_v29 = vld [vmem:[%s8901_s0 + $0x70] sm:$0xff] }
 0x688   : > { %5240 = vmatmul.msk.f32.gmra.mxu0 %vm783_vm1, %v4258_v52 }
 0x689   : > { %v4027_v58 = vpop.f32.mrf.mxu2 }
 0x68a   : > { %v4057_v56 = vadd.f32 %v4027_v58, %v3859_v11  ;;  %v4396_v11 = vld [vmem:[%s8901_s0 + $0x68] sm:$0xff]  ;;  %v4448_v58 = vld [vmem:[%s8595_s17 + $0x60] sm:$0xff] }
 0x68b   : > { %4478 = vmatpush.msrb.mxu2 %v4448_v58  ;;  %v4554_v58 = vld [vmem:[%s8597_s19 + $0x20] sm:$0xff] }
 0x68c   : > { %v4243_v50 = vadd.f32 %v4213_v12, %v4057_v56  ;;  %v4451_v56 = vld [vmem:[%s8595_s17 + $0x78] sm:$0xff] }
 0x68d   : > { %4538 = vmatpush.msra.mxu3 %v4451_v56  ;;  %v4638_v56 = vld [vmem:[%s8597_s19 + $0x2c0] sm:$0xff] }
 0x68e   : > { %v4259_v63 = vmax.f32 %v4243_v50, 0.0  ;;  %v4444_v50 = vld [vmem:[%s8595_s17 + $0x40] sm:$0xff] }
 0x68f   : > { %4479 = vmatpush.msrb.mxu2 %v4444_v50  ;;  %v4608_v50 = vld [vmem:[%s8597_s19 + $0x1d0] sm:$0xff] }
 0x690   : > { %5241 = vmatmul.msk.f32.gmra.mxu0 %vm783_vm1, %v4259_v63  ;;  %v4447_v63 = vld [vmem:[%s8595_s17 + $0x58] sm:$0xff] }
 0x691   : > { %v4030_v47 = vpop.f32.mrf.mxu2  ;;  %4539 = vmatpush.msra.mxu3 %v4447_v63  ;;  %v4636_v63 = vld [vmem:[%s8597_s19 + $0x2b0] sm:$0xff] }
 0x692   : > { %v4058_v38 = vadd.f32 %v4030_v47, %v3862_v13  ;;  %v4395_v13 = vld [vmem:[%s8901_s0 + $0x60] sm:$0xff] }
 0x693   : > { %v4440_v47 = vld [vmem:[%s8595_s17 + $0x20] sm:$0xff] }
 0x694   : > { %v4244_v43 = vadd.f32 %v4216_v49, %v4058_v38  ;;  %4480 = vmatpush.msrb.mxu2 %v4440_v47  ;;  %v4550_v47 = vld [vmem:[%s8597_s19] sm:$0xff] }
 0x696   : > { %v4260_v44 = vmax.f32 %v4244_v43, 0.0  ;;  %v4394_v43 = vld [vmem:[%s8901_s0 + $0x58] sm:$0xff] }
 0x698   : > { %5242 = vmatmul.msk.f32.gmra.mxu0 %vm783_vm1, %v4260_v44 }
 0x699   : > { %v4033_v23 = vpop.f32.mrf.mxu2 }
 0x69a   : > { %v4059_v17 = vadd.f32 %v4033_v23, %v3865_v3  ;;  %v4392_v23 = vld [vmem:[%s8901_s0 + $0x48] sm:$0xff] }
 0x69c   : > { %v4245_v1 = vadd.f32 %v4219_v33, %v4059_v17  ;;  %v4443_v33 = vld [vmem:[%s8595_s17 + $0x38] sm:$0xff] }
 0x69d   : > { %4540 = vmatpush.msra.mxu3 %v4443_v33  ;;  %v4676_v33 = vld [vmem:[%s8597_s19 + $0x3f0] sm:$0xff] }
 0x69e   : > { %v4261_v30 = vmax.f32 %v4245_v1, 0.0  ;;  %v4391_v1 = vld [vmem:[%s8901_s0 + $0x40] sm:$0xff] }
 0x6a0   : > { %5243 = vmatmul.msk.f32.gmra.mxu0 %vm783_vm1, %v4261_v30  ;;  %v4390_v30 = vld [vmem:[%s8901_s0 + $0x38] sm:$0xff] }
 0x6a1   : > { %v4036_v35 = vpop.f32.mrf.mxu2 }
 0x6a2   : > { %v4060_v46 = vadd.f32 %v4036_v35, %v3868_v2 }
 0x6a4   : > { %v4246_v36 = vadd.f32 %v4222_v15, %v4060_v46  ;;  %v4388_v46 = vld [vmem:[%s8901_s0 + $0x28] sm:$0xff] }
 0x6a6   : > { %v4262_v25 = vmax.f32 %v4246_v36, 0.0 }
 0x6a8   : > { %5244 = vmatmul.msk.f32.gmra.mxu0 %vm783_vm1, %v4262_v25  ;;  %v4387_v25 = vld [vmem:[%s8901_s0 + $0x20] sm:$0xff] }
 0x6a9   : > { %v4039_v5 = vpop.f32.mrf.mxu2 }
 0x6aa   : > { %v4061_v41 = vadd.f32 %v4039_v5, %v3871_v32  ;;  %v4386_v32 = vld [vmem:[%s8901_s0 + $0x18] sm:$0xff] }
 0x6ac   : > { %v4247_v27 = vadd.f32 %v4225_v55, %v4061_v41  ;;  %v4385_v41 = vld [vmem:[%s8901_s0 + $0x10] sm:$0xff] }
 0x6ae   : > { %v4263_v54 = vmax.f32 %v4247_v27, 0.0  ;;  %v4384_v27 = vld [vmem:[%s8901_s0 + $0x8] sm:$0xff] }
 0x6b0   : > { %5245 = vmatmul.msk.f32.gmra.mxu0 %vm783_vm1, %v4263_v54 }
 0x6b1   : > { %v4042_v9 = vpop.f32.mrf.mxu2 }
 0x6b2   : > { %v4062_v59 = vadd.f32 %v4042_v9, %v3874_v7  ;;  %v4383_v7 = vld [vmem:[%s8901_s0] sm:$0xff]  ;;  %s5017_s0 = sshll.u32 %s8907_s5, 3 }
 0x6b3   : > { %s744_s1 = scalar_lea.vmem %s8601_s23, %s5017_s0 }
 0x6b4   : > { %v4248_v62 = vadd.f32 %v4228_v6, %v4062_v59  ;;  %v4415_v59 = vld [vmem:[%s8902_s7] sm:$0xff] }
 0x6b6   : > { %v4264_v19 = vmax.f32 %v4248_v62, 0.0  ;;  %v4449_v62 = vld [vmem:[%s8595_s17 + $0x68] sm:$0xff] }
 0x6b8   : > { %5246 = vmatmul.msk.f32.gmra.mxu0 %vm783_vm1, %v4264_v19  ;;  %v4436_v19 = vld [vmem:[%s8595_s17] sm:$0xff] }
 0x6b9   : > { %v4045_v14 = vpop.f32.mrf.mxu2  ;;  %4481 = vmatpush.msrb.mxu2 %v4436_v19  ;;  %v4584_v19 = vld [vmem:[%s8597_s19 + $0x110] sm:$0xff] }
 0x6ba   : > { %v4063_v18 = vadd.f32 %v4045_v14, %v3877_v0  ;;  %v4441_v0 = vld [vmem:[%s8595_s17 + $0x28] sm:$0xff] }
 0x6bb   : > { %v4437_v14 = vld [vmem:[%s8595_s17 + $0x8] sm:$0xff] }
 0x6bc   : > { %v4249_v40 = vadd.f32 %v4231_v24, %v4063_v18  ;;  %v4450_v18 = vld [vmem:[%s8595_s17 + $0x70] sm:$0xff] }
 0x6bd   : > { %v4446_v24 = vld [vmem:[%s8595_s17 + $0x50] sm:$0xff]  ;;  %4518 = vmatpush.msra.mxu2 %v4450_v18  ;;  %v4581_v18 = vld [vmem:[%s8597_s19 + $0xf8] sm:$0xff] }
 0x6be   : > { %v4265_v22 = vmax.f32 %v4249_v40, 0.0  ;;  %v4439_v40 = vld [vmem:[%s8595_s17 + $0x18] sm:$0xff] }
 0x6bf   : > { %4541 = vmatpush.msra.mxu3 %v4439_v40  ;;  %4519 = vmatpush.msra.mxu2 %v4446_v24  ;;  %v4579_v24 = vld [vmem:[%s8597_s19 + $0xe8] sm:$0xff]  ;;  %v4577_v40 = vld [vmem:[%s8597_s19 + $0xd8] sm:$0xff] }
 0x6c0   : > { %5247 = vmatmul.msk.f32.gmra.mxu0 %vm783_vm1, %v4265_v22  ;;  %v4442_v22 = vld [vmem:[%s8595_s17 + $0x30] sm:$0xff] }
 0x6c1   : > { %4520 = vmatpush.msra.mxu2 %v4442_v22  ;;  %v4575_v22 = vld [vmem:[%s8597_s19 + $0xc8] sm:$0xff] }
 0x6c5   : > { %v7947_v21 = vpop.f32.mrf.mxu0 }
 0x6c6   : > { %v4399_v9 = vmul.f32 %v4383_v7, %v7947_v21  ;;  %v4438_v21 = vld [vmem:[%s8595_s17 + $0x10] sm:$0xff] }
 0x6c7   : > { %4521 = vmatpush.msra.mxu2 %v4438_v21  ;;  %v4588_v7 = vld [vmem:[%s8597_s19 + $0x130] sm:$0xff]  ;;  %v4573_v21 = vld [vmem:[%s8597_s19 + $0xb8] sm:$0xff] }
 0x6cd   : > { %v7949_v28 = vpop.f32.mrf.mxu0 }
 0x6ce   : > { %v4400_v6 = vmul.f32 %v4384_v27, %v7949_v28  ;;  %v4580_v28 = vld [vmem:[%s8597_s19 + $0xf0] sm:$0xff]  ;;  %v4662_v27 = vld [vmem:[%s8597_s19 + $0x380] sm:$0xff] }
 0x6d5   : > { %v7951_v42 = vpop.f32.mrf.mxu0 }
 0x6d6   : > { %v4401_v54 = vmul.f32 %v4385_v41, %v7951_v42  ;;  %v4578_v42 = vld [vmem:[%s8597_s19 + $0xe0] sm:$0xff] }
 0x6d7   : > { %v4622_v41 = vld [vmem:[%s8597_s19 + $0x240] sm:$0xff] }
 0x6dd   : > { %v4344_v60 = vpop.f32.mrf.mxu0 }
 0x6de   : > { %v4402_v31 = vmul.f32 %v4386_v32, %v4344_v60  ;;  %v4576_v60 = vld [vmem:[%s8597_s19 + $0xd0] sm:$0xff] }
 0x6df   : > { %v4592_v32 = vld [vmem:[%s8597_s19 + $0x150] sm:$0xff] }
 0x6e5   : > { %v4347_v39 = vpop.f32.mrf.mxu0 }
 0x6e6   : > { %v4403_v5 = vmul.f32 %v4387_v25, %v4347_v39  ;;  %v4574_v39 = vld [vmem:[%s8597_s19 + $0xc0] sm:$0xff] }
 0x6e7   : > { %v4666_v25 = vld [vmem:[%s8597_s19 + $0x3a0] sm:$0xff] }
 0x6ed   : > { %v4350_v26 = vpop.f32.mrf.mxu0 }
 0x6ee   : > { %v4404_v55 = vmul.f32 %v4388_v46, %v4350_v26  ;;  %v4572_v26 = vld [vmem:[%s8597_s19 + $0xb0] sm:$0xff]  ;;  %v4626_v46 = vld [vmem:[%s8597_s19 + $0x260] sm:$0xff] }
 0x6f5   : > { %v4353_v16 = vpop.f32.mrf.mxu0 }
 0x6f6   : > { %v4405_v36 = vmul.f32 %v4389_v37, %v4353_v16  ;;  %v4570_v16 = vld [vmem:[%s8597_s19 + $0xa0] sm:$0xff]  ;;  %v4596_v37 = vld [vmem:[%s8597_s19 + $0x170] sm:$0xff] }
 0x6fd   : > { %v4356_v57 = vpop.f32.mrf.mxu0 }
 0x6fe   : > { %v4406_v35 = vmul.f32 %v4390_v30, %v4356_v57  ;;  %v4568_v57 = vld [vmem:[%s8597_s19 + $0x90] sm:$0xff]  ;;  %v4670_v30 = vld [vmem:[%s8597_s19 + $0x3c0] sm:$0xff] }
 0x705   : > { %v4359_v4 = vpop.f32.mrf.mxu0 }
 0x706   : > { %v4407_v2 = vmul.f32 %v4391_v1, %v4359_v4  ;;  %v4566_v4 = vld [vmem:[%s8597_s19 + $0x80] sm:$0xff] }
 0x707   : > { %v4630_v1 = vld [vmem:[%s8597_s19 + $0x280] sm:$0xff] }
 0x70d   : > { %v4362_v10 = vpop.f32.mrf.mxu0 }
 0x70e   : > { %v4408_v15 = vmul.f32 %v4392_v23, %v4362_v10  ;;  %v4564_v10 = vld [vmem:[%s8597_s19 + $0x70] sm:$0xff] }
 0x70f   : > { %v4600_v23 = vld [vmem:[%s8597_s19 + $0x190] sm:$0xff] }
 0x715   : > { %v4365_v51 = vpop.f32.mrf.mxu0 }
 0x716   : > { %v4409_v17 = vmul.f32 %v4393_v34, %v4365_v51  ;;  %v4562_v51 = vld [vmem:[%s8597_s19 + $0x60] sm:$0xff] }
 0x717   : > { %v4674_v34 = vld [vmem:[%s8597_s19 + $0x3e0] sm:$0xff] }
 0x71d   : > { %v4368_v12 = vpop.f32.mrf.mxu0 }
 0x71e   : > { %v4410_v3 = vmul.f32 %v4394_v43, %v4368_v12  ;;  %v4560_v12 = vld [vmem:[%s8597_s19 + $0x50] sm:$0xff]  ;;  %v4634_v43 = vld [vmem:[%s8597_s19 + $0x2a0] sm:$0xff] }
 0x725   : > { %v4371_v48 = vpop.f32.mrf.mxu0 }
 0x726   : > { %v4411_v44 = vmul.f32 %v4395_v13, %v4371_v48  ;;  %v4644_v48 = vld [vmem:[%s8597_s19 + $0x2f0] sm:$0xff]  ;;  %v4606_v13 = vld [vmem:[%s8597_s19 + $0x1c0] sm:$0xff] }
 0x727   : > { %4724 = vmatpush.msrb.mxu3 %v4644_v48  ;;  %v4555_v48 = vld [vmem:[%s8597_s19 + $0x28] sm:$0xff] }
 0x72d   : > { %v4374_v45 = vpop.f32.mrf.mxu0 }
 0x72e   : > { %v4412_v38 = vmul.f32 %v4396_v11, %v4374_v45  ;;  %v4558_v45 = vld [vmem:[%s8597_s19 + $0x40] sm:$0xff]  ;;  %v4640_v11 = vld [vmem:[%s8597_s19 + $0x2d0] sm:$0xff] }
 0x735   : > { %v4377_v61 = vpop.f32.mrf.mxu0 }
 0x736   : > { %v4413_v8 = vmul.f32 %v4397_v29, %v4377_v61  ;;  %v4642_v61 = vld [vmem:[%s8597_s19 + $0x2e0] sm:$0xff] }
 0x737   : > { %4725 = vmatpush.msrb.mxu3 %v4642_v61  ;;  %v4654_v61 = vld [vmem:[%s8597_s19 + $0x340] sm:$0xff] }
 0x739   : > { %4726 = vmatpush.msrb.mxu3 %v4640_v11  ;;  %v4551_v11 = vld [vmem:[%s8597_s19 + $0x8] sm:$0xff] }
 0x73b   : > { %4727 = vmatpush.msrb.mxu3 %v4638_v56  ;;  %v4603_v56 = vld [vmem:[%s8597_s19 + $0x1a8] sm:$0xff] }
 0x73d   : > { %v4380_v52 = vpop.f32.mrf.mxu0  ;;  %4728 = vmatpush.msrb.mxu3 %v4636_v63  ;;  %v4601_v63 = vld [vmem:[%s8597_s19 + $0x198] sm:$0xff] }
 0x73e   : > { %v4414_v49 = vmul.f32 %v4398_v20, %v4380_v52  ;;  %v4612_v20 = vld [vmem:[%s8597_s19 + $0x1f0] sm:$0xff] }
 0x73f   : > { %v4556_v52 = vld [vmem:[%s8597_s19 + $0x30] sm:$0xff]  ;;  %4729 = vmatpush.msrb.mxu3 %v4634_v43  ;;  %v4591_v43 = vld [vmem:[%s8597_s19 + $0x148] sm:$0xff] }
 0x740   : > { %4416 = vmatpush.msrb.mxu1 %v4414_v49  ;;  %v4610_v49 = vld [vmem:[%s8597_s19 + $0x1e0] sm:$0xff] }
 0x742   : > { %4417 = vmatpush.msrb.mxu1 %v4413_v8  ;;  %v4552_v8 = vld [vmem:[%s8597_s19 + $0x10] sm:$0xff] }
 0x744   : > { %4418 = vmatpush.msrb.mxu1 %v4412_v38  ;;  %v4604_v38 = vld [vmem:[%s8597_s19 + $0x1b0] sm:$0xff] }
 0x746   : > { %4419 = vmatpush.msrb.mxu1 %v4411_v44  ;;  %v4602_v44 = vld [vmem:[%s8597_s19 + $0x1a0] sm:$0xff] }
 0x748   : > { %4420 = vmatpush.msrb.mxu1 %v4410_v3  ;;  %v4632_v3 = vld [vmem:[%s8597_s19 + $0x290] sm:$0xff] }
 0x749   : > { %4730 = vmatpush.msrb.mxu3 %v4632_v3  ;;  %v4452_v3 = vld [vmem:[%s8596_s18] sm:$0xf] }
 0x74a   : > { %4421 = vmatpush.msrb.mxu1 %v4409_v17  ;;  %v4672_v17 = vld [vmem:[%s8597_s19 + $0x3d0] sm:$0xff] }
 0x74b   : > { %4731 = vmatpush.msrb.mxu3 %v4630_v1  ;;  %v4455_v1 = vperm.slane %v4452_v3, 1 }
 0x74c   : > { %4422 = vmatpush.msrb.mxu1 %v4408_v15  ;;  %v4598_v15 = vld [vmem:[%s8597_s19 + $0x180] sm:$0xff] }
 0x74e   : > { %4423 = vmatpush.msrb.mxu1 %v4407_v2  ;;  %v4628_v2 = vld [vmem:[%s8597_s19 + $0x270] sm:$0xff] }
 0x74f   : > { %4732 = vmatpush.msrb.mxu3 %v4628_v2 }
 0x750   : > { %4424 = vmatpush.msrb.mxu1 %v4406_v35  ;;  %v4668_v35 = vld [vmem:[%s8597_s19 + $0x3b0] sm:$0xff] }
 0x751   : > { %4733 = vmatpush.msrb.mxu3 %v4626_v46  ;;  %v4675_v46 = vld [vmem:[%s8597_s19 + $0x3e8] sm:$0xff] }
 0x752   : > { %4425 = vmatpush.msrb.mxu1 %v4405_v36  ;;  %v4594_v36 = vld [vmem:[%s8597_s19 + $0x160] sm:$0xff] }
 0x754   : > { %4426 = vmatpush.msrb.mxu1 %v4404_v55  ;;  %v4624_v55 = vld [vmem:[%s8597_s19 + $0x250] sm:$0xff] }
 0x755   : > { %4734 = vmatpush.msrb.mxu3 %v4624_v55  ;;  %v4673_v55 = vld [vmem:[%s8597_s19 + $0x3d8] sm:$0xff] }
 0x756   : > { %4427 = vmatpush.msrb.mxu1 %v4403_v5  ;;  %v4664_v5 = vld [vmem:[%s8597_s19 + $0x390] sm:$0xff] }
 0x757   : > { %4735 = vmatpush.msrb.mxu3 %v4622_v41  ;;  %v4671_v41 = vld [vmem:[%s8597_s19 + $0x3c8] sm:$0xff] }
 0x758   : > { %4428 = vmatpush.msrb.mxu1 %v4402_v31  ;;  %v4590_v31 = vld [vmem:[%s8597_s19 + $0x140] sm:$0xff] }
 0x75a   : > { %4429 = vmatpush.msrb.mxu1 %v4401_v54  ;;  %v4620_v54 = vld [vmem:[%s8597_s19 + $0x230] sm:$0xff] }
 0x75b   : > { %4736 = vmatpush.msrb.mxu3 %v4620_v54  ;;  %v4643_v54 = vld [vmem:[%s8597_s19 + $0x2e8] sm:$0xff] }
 0x75c   : > { %4430 = vmatpush.msrb.mxu1 %v4400_v6  ;;  %v4660_v6 = vld [vmem:[%s8597_s19 + $0x370] sm:$0xff] }
 0x75e   : > { %4431 = vmatpush.msrb.mxu1 %v4399_v9  ;;  %v4618_v9 = vld [vmem:[%s8597_s19 + $0x220] sm:$0xff] }
 0x75f   : > { %4432 = vmatmul.f32.vlgmr.msrb.gmra.mxu1 %v4415_v59  ;;  %v4586_v59 = vld [vmem:[%s8597_s19 + $0x120] sm:$0xff]  ;;  %4737 = vmatpush.msrb.mxu3 %v4618_v9  ;;  %v4877_v9 = vld [vmem:[%s8599_s21 + $0xf8] sm:$0xff] }
 0x760   : > { %4498 = vmatpush.msra.mxu1 %v4449_v62  ;;  %v4658_v62 = vld [vmem:[%s8597_s19 + $0x360] sm:$0xff]  ;;  %4902 = vmatpush.msrb.mxu0 %v4877_v9 }
 0x762   : > { %4499 = vmatpush.msra.mxu1 %v4445_v53  ;;  %v4616_v53 = vld [vmem:[%s8597_s19 + $0x210] sm:$0xff] }
 0x763   : > { %4738 = vmatpush.msrb.mxu3 %v4616_v53  ;;  %v4667_v53 = vld [vmem:[%s8597_s19 + $0x3a8] sm:$0xff] }
 0x764   : > { %4500 = vmatpush.msra.mxu1 %v4441_v0  ;;  %v4656_v0 = vld [vmem:[%s8597_s19 + $0x350] sm:$0xff] }
 0x766   : > { %4501 = vmatpush.msra.mxu1 %v4437_v14  ;;  %v4582_v14 = vld [vmem:[%s8597_s19 + $0x100] sm:$0xff] }
 0x768   : > { %4684 = vmatpush.msrb.mxu1 %v4580_v28  ;;  %v4571_v28 = vld [vmem:[%s8597_s19 + $0xa8] sm:$0xff] }
 0x76a   : > { %4685 = vmatpush.msrb.mxu1 %v4578_v42  ;;  %v4569_v42 = vld [vmem:[%s8597_s19 + $0x98] sm:$0xff] }
 0x76c   : > { %4686 = vmatpush.msrb.mxu1 %v4576_v60  ;;  %v4567_v60 = vld [vmem:[%s8597_s19 + $0x88] sm:$0xff] }
 0x76e   : > { %4687 = vmatpush.msrb.mxu1 %v4574_v39  ;;  %v4565_v39 = vld [vmem:[%s8597_s19 + $0x78] sm:$0xff] }
 0x770   : > { %4688 = vmatpush.msrb.mxu1 %v4572_v26  ;;  %v4563_v26 = vld [vmem:[%s8597_s19 + $0x68] sm:$0xff] }
 0x772   : > { %4689 = vmatpush.msrb.mxu1 %v4570_v16  ;;  %v4561_v16 = vld [vmem:[%s8597_s19 + $0x58] sm:$0xff] }
 0x774   : > { %4690 = vmatpush.msrb.mxu1 %v4568_v57  ;;  %v4559_v57 = vld [vmem:[%s8597_s19 + $0x48] sm:$0xff] }
 0x776   : > { %4691 = vmatpush.msrb.mxu1 %v4566_v4  ;;  %v4557_v4 = vld [vmem:[%s8597_s19 + $0x38] sm:$0xff] }
 0x778   : > { %4692 = vmatpush.msrb.mxu1 %v4564_v10  ;;  %v4614_v10 = vld [vmem:[%s8597_s19 + $0x200] sm:$0xff] }
 0x779   : > { %4739 = vmatpush.msrb.mxu3 %v4614_v10  ;;  %v4633_v10 = vld [vmem:[%s8597_s19 + $0x298] sm:$0xff] }
 0x77a   : > { %4693 = vmatpush.msrb.mxu1 %v4562_v51  ;;  %v4613_v51 = vld [vmem:[%s8597_s19 + $0x1f8] sm:$0xff] }
 0x77c   : > { %4694 = vmatpush.msrb.mxu1 %v4560_v12  ;;  %v4611_v12 = vld [vmem:[%s8597_s19 + $0x1e8] sm:$0xff] }
 0x77e   : > { %4695 = vmatpush.msrb.mxu1 %v4558_v45  ;;  %v4609_v45 = vld [vmem:[%s8597_s19 + $0x1d8] sm:$0xff] }
 0x780   : > { %4696 = vmatpush.msrb.mxu1 %v4556_v52  ;;  %v4607_v52 = vld [vmem:[%s8597_s19 + $0x1c8] sm:$0xff] }
 0x782   : > { %4697 = vmatpush.msrb.mxu1 %v4554_v58  ;;  %v4650_v58 = vld [vmem:[%s8597_s19 + $0x320] sm:$0xff] }
 0x784   : > { %4698 = vmatpush.msrb.mxu1 %v4552_v8  ;;  %v4646_v8 = vld [vmem:[%s8597_s19 + $0x300] sm:$0xff] }
 0x786   : > { %4699 = vmatpush.msrb.mxu1 %v4550_v47  ;;  %v4597_v47 = vld [vmem:[%s8597_s19 + $0x178] sm:$0xff] }
 0x7dc   : > { %v4433_v29 = vpop.f32.mrf.mxu1 }
 0x7dd   : > { %5248 = vmatmul.msk.f32.vlgmr.msrb.gmra.mxu2 %vm4462_vm5, %v4433_v29  ;;  %5249 = vmatmul.msk.f32.vlgmr.msra.gmra.mxu1 %vm4462_vm5, %v4433_v29 }
 0x7de   : > { %5251 = vmatmul.msk.f32.vlgmr.msra.gmra.mxu3 %vm4462_vm5, %v4433_v29  ;;  %4704 = vmatpush.msrb.mxu2 %v4612_v20  ;;  %v4652_v20 = vld [vmem:[%s8597_s19 + $0x330] sm:$0xff] }
 0x7df   : > { %4744 = vmatpush.msra.mxu1 %v4676_v33  ;;  %4784 = vmatpush.msra.mxu3 %v4613_v51  ;;  %v4593_v33 = vld [vmem:[%s8597_s19 + $0x158] sm:$0xff]  ;;  %v4659_v51 = vld [vmem:[%s8597_s19 + $0x368] sm:$0xff] }
 0x7e0   : > { %4705 = vmatpush.msrb.mxu2 %v4610_v49  ;;  %v4605_v49 = vld [vmem:[%s8597_s19 + $0x1b8] sm:$0xff] }
 0x7e1   : > { %4745 = vmatpush.msra.mxu1 %v4674_v34  ;;  %4785 = vmatpush.msra.mxu3 %v4611_v12  ;;  %v4587_v34 = vld [vmem:[%s8597_s19 + $0x128] sm:$0xff]  ;;  %v4872_v12 = vld [vmem:[%s8599_s21 + $0xd0] sm:$0xff] }
 0x7e2   : > { %4706 = vmatpush.msrb.mxu2 %v4608_v50  ;;  %v4648_v50 = vld [vmem:[%s8597_s19 + $0x310] sm:$0xff] }
 0x7e3   : > { %4746 = vmatpush.msra.mxu1 %v4672_v17  ;;  %4786 = vmatpush.msra.mxu3 %v4609_v45  ;;  %v4583_v17 = vld [vmem:[%s8597_s19 + $0x108] sm:$0xff] }
 0x7e4   : > { %4707 = vmatpush.msrb.mxu2 %v4606_v13  ;;  %v4599_v13 = vld [vmem:[%s8597_s19 + $0x188] sm:$0xff] }
 0x7e5   : > { %5250 = vmatmul.msk.f32.vlgmr.msra.gmra.mxu2 %vm4462_vm5, %v4433_v29  ;;  %4747 = vmatpush.msra.mxu1 %v4670_v30  ;;  %v4553_v29 = vld [vmem:[%s8597_s19 + $0x18] sm:$0xff]  ;;  %v4631_v45 = vld [vmem:[%s8597_s19 + $0x288] sm:$0xff] }
 0x7e6   : > { %4708 = vmatpush.msrb.mxu2 %v4604_v38  ;;  %4787 = vmatpush.msra.mxu3 %v4607_v52  ;;  %v4595_v38 = vld [vmem:[%s8597_s19 + $0x168] sm:$0xff] }
 0x7e7   : > { %4748 = vmatpush.msra.mxu1 %v4668_v35  ;;  %v4677_v35 = vld [vmem:[%s8597_s19 + $0x3f8] sm:$0xff]  ;;  %v4655_v52 = vld [vmem:[%s8597_s19 + $0x348] sm:$0xff] }
 0x7e8   : > { %4709 = vmatpush.msrb.mxu2 %v4602_v44  ;;  %4788 = vmatpush.msra.mxu3 %v4605_v49  ;;  %v4589_v44 = vld [vmem:[%s8597_s19 + $0x138] sm:$0xff]  ;;  %v4858_v49 = vld [vmem:[%s8599_s21 + $0x60] sm:$0xff] }
 0x7e9   : > { %4749 = vmatpush.msra.mxu1 %v4666_v25 }
 0x7ea   : > { %4710 = vmatpush.msrb.mxu2 %v4600_v23  ;;  %4789 = vmatpush.msra.mxu3 %v4603_v56  ;;  %v4585_v23 = vld [vmem:[%s8597_s19 + $0x118] sm:$0xff] }
 0x7eb   : > { %4750 = vmatpush.msra.mxu1 %v4664_v5  ;;  %v4645_v5 = vld [vmem:[%s8597_s19 + $0x2f8] sm:$0xff] }
 0x7ec   : > { %4711 = vmatpush.msrb.mxu2 %v4598_v15  ;;  %4790 = vmatpush.msra.mxu3 %v4601_v63  ;;  %v4653_v56 = vld [vmem:[%s8597_s19 + $0x338] sm:$0xff] }
 0x7ed   : > { %4751 = vmatpush.msra.mxu1 %v4662_v27  ;;  %v4625_v63 = vld [vmem:[%s8597_s19 + $0x258] sm:$0xff] }
 0x7ee   : > { %4712 = vmatpush.msrb.mxu2 %v4596_v37  ;;  %4791 = vmatpush.msra.mxu3 %v4599_v13  ;;  %v4454_v37 = vperm.slane %v4452_v3, 0  ;;  %v4651_v13 = vld [vmem:[%s8597_s19 + $0x328] sm:$0xff] }
 0x7ef   : > { %4752 = vmatpush.msra.mxu1 %v4660_v6  ;;  %v4456_v6 = vperm.slane %v4452_v3, 2 }
 0x7f0   : > { %4713 = vmatpush.msrb.mxu2 %v4594_v36  ;;  %4792 = vmatpush.msra.mxu3 %v4597_v47  ;;  %v4856_v47 = vld [vmem:[%s8599_s21 + $0x50] sm:$0xff] }
 0x7f1   : > { %4753 = vmatpush.msra.mxu1 %v4658_v62  ;;  %v4641_v62 = vld [vmem:[%s8597_s19 + $0x2d8] sm:$0xff] }
 0x7f2   : > { %4714 = vmatpush.msrb.mxu2 %v4592_v32  ;;  %4793 = vmatpush.msra.mxu3 %v4595_v38  ;;  %v4868_v38 = vld [vmem:[%s8599_s21 + $0xb0] sm:$0xff] }
 0x7f3   : > { %4754 = vmatpush.msra.mxu1 %v4656_v0 }
 0x7f4   : > { %4715 = vmatpush.msrb.mxu2 %v4590_v31  ;;  %4794 = vmatpush.msra.mxu3 %v4593_v33  ;;  %v4457_v31 = vperm.slane %v4452_v3, 3  ;;  %v4623_v33 = vld [vmem:[%s8597_s19 + $0x248] sm:$0xff] }
 0x7f5   : > { %4755 = vmatpush.msra.mxu1 %v4654_v61  ;;  %v4657_v61 = vld [vmem:[%s8597_s19 + $0x358] sm:$0xff]  ;;  %v4647_v3 = vld [vmem:[%s8597_s19 + $0x308] sm:$0xff] }
 0x7f6   : > { %4716 = vmatpush.msrb.mxu2 %v4588_v7  ;;  %4795 = vmatpush.msra.mxu3 %v4591_v43  ;;  %v4669_v7 = vld [vmem:[%s8597_s19 + $0x3b8] sm:$0xff] }
 0x7f7   : > { %4756 = vmatpush.msra.mxu1 %v4652_v20  ;;  %v4871_v20 = vld [vmem:[%s8599_s21 + $0xc8] sm:$0xff]  ;;  %v4649_v43 = vld [vmem:[%s8597_s19 + $0x318] sm:$0xff] }
 0x7f8   : > { %4717 = vmatpush.msrb.mxu2 %v4586_v59  ;;  %4796 = vmatpush.msra.mxu3 %v4589_v44  ;;  %v4876_v59 = vld [vmem:[%s8599_s21 + $0xf0] sm:$0xff]  ;;  %v4855_v44 = vld [vmem:[%s8599_s21 + $0x48] sm:$0xff] }
 0x7f9   : > { %4757 = vmatpush.msra.mxu1 %v4650_v58  ;;  %4903 = vmatpush.msrb.mxu0 %v4876_v59  ;;  %v4627_v58 = vld [vmem:[%s8597_s19 + $0x268] sm:$0xff] }
 0x7fa   : > { %4718 = vmatpush.msrb.mxu2 %v4584_v19  ;;  %4797 = vmatpush.msra.mxu3 %v4587_v34  ;;  %v4621_v34 = vld [vmem:[%s8597_s19 + $0x238] sm:$0xff] }
 0x7fb   : > { %4758 = vmatpush.msra.mxu1 %v4648_v50  ;;  %v4869_v50 = vld [vmem:[%s8599_s21 + $0xb8] sm:$0xff] }
 0x7fc   : > { %4719 = vmatpush.msrb.mxu2 %v4582_v14  ;;  %4798 = vmatpush.msra.mxu3 %v4585_v23  ;;  %v4875_v14 = vld [vmem:[%s8599_s21 + $0xe8] sm:$0xff]  ;;  %v4854_v23 = vld [vmem:[%s8599_s21 + $0x40] sm:$0xff] }
 0x7fd   : > { %4759 = vmatpush.msra.mxu1 %v4646_v8  ;;  %4904 = vmatpush.msrb.mxu0 %v4875_v14  ;;  %v4857_v8 = vld [vmem:[%s8599_s21 + $0x58] sm:$0xff] }
 0x7fe   : > { %4764 = vmatpush.msra.mxu2 %v4581_v18  ;;  %4799 = vmatpush.msra.mxu3 %v4583_v17  ;;  %v4639_v18 = vld [vmem:[%s8597_s19 + $0x2c8] sm:$0xff] }
 0x7ff   : > { %v4619_v17 = vld [vmem:[%s8597_s19 + $0x228] sm:$0xff] }
 0x800   : > { %4765 = vmatpush.msra.mxu2 %v4579_v24  ;;  %v4665_v24 = vld [vmem:[%s8597_s19 + $0x398] sm:$0xff] }
 0x802   : > { %4766 = vmatpush.msra.mxu2 %v4577_v40 }
 0x804   : > { %4767 = vmatpush.msra.mxu2 %v4575_v22  ;;  %v4637_v22 = vld [vmem:[%s8597_s19 + $0x2b8] sm:$0xff] }
 0x806   : > { %4768 = vmatpush.msra.mxu2 %v4573_v21 }
 0x808   : > { %4769 = vmatpush.msra.mxu2 %v4571_v28  ;;  %v4663_v28 = vld [vmem:[%s8597_s19 + $0x388] sm:$0xff] }
 0x80a   : > { %4770 = vmatpush.msra.mxu2 %v4569_v42 }
 0x80c   : > { %4771 = vmatpush.msra.mxu2 %v4567_v60  ;;  %v4874_v60 = vld [vmem:[%s8599_s21 + $0xe0] sm:$0xff] }
 0x80d   : > { %4905 = vmatpush.msrb.mxu0 %v4874_v60 }
 0x80e   : > { %4772 = vmatpush.msra.mxu2 %v4565_v39  ;;  %v4861_v39 = vld [vmem:[%s8599_s21 + $0x78] sm:$0xff] }
 0x810   : > { %4773 = vmatpush.msra.mxu2 %v4563_v26  ;;  %v4635_v26 = vld [vmem:[%s8597_s19 + $0x2a8] sm:$0xff] }
 0x812   : > { %4774 = vmatpush.msra.mxu2 %v4561_v16  ;;  %v4661_v16 = vld [vmem:[%s8597_s19 + $0x378] sm:$0xff] }
 0x814   : > { %4775 = vmatpush.msra.mxu2 %v4559_v57  ;;  %v4873_v57 = vld [vmem:[%s8599_s21 + $0xd8] sm:$0xff] }
 0x815   : > { %4906 = vmatpush.msrb.mxu0 %v4873_v57 }
 0x816   : > { %4776 = vmatpush.msra.mxu2 %v4557_v4  ;;  %v4860_v4 = vld [vmem:[%s8599_s21 + $0x70] sm:$0xff] }
 0x817   : > { %4907 = vmatpush.msrb.mxu0 %v4872_v12 }
 0x818   : > { %4777 = vmatpush.msra.mxu2 %v4555_v48  ;;  %v4859_v48 = vld [vmem:[%s8599_s21 + $0x68] sm:$0xff] }
 0x819   : > { %4908 = vmatpush.msrb.mxu0 %v4871_v20 }
 0x81a   : > { %4778 = vmatpush.msra.mxu2 %v4553_v29  ;;  %v4629_v29 = vld [vmem:[%s8597_s19 + $0x278] sm:$0xff] }
 0x81c   : > { %4779 = vmatpush.msra.mxu2 %v4551_v11  ;;  %v4870_v11 = vld [vmem:[%s8599_s21 + $0xc0] sm:$0xff] }
 0x81d   : > { %4909 = vmatpush.msrb.mxu0 %v4870_v11 }
 0x81f   : > { %4910 = vmatpush.msrb.mxu0 %v4869_v50 }
 0x821   : > { %4911 = vmatpush.msrb.mxu0 %v4868_v38 }
 0x85a   : > { %v4503_v15 = vpop.f32.mrf.mxu1 }
 0x85b   : > { %v8350_v30 = vadd.f32 %v4503_v15, %v4455_v1  ;;  %v4617_v1 = vld [vmem:[%s8597_s19 + $0x218] sm:$0xff]  ;;  %v4615_v15 = vld [vmem:[%s8597_s19 + $0x208] sm:$0xff] }
 0x85d   : > { %v4547_v2 = vmax.f32 %v8350_v30, 0.0  ;;  %v4853_v30 = vld [vmem:[%s8599_s21 + $0x38] sm:$0xff] }
 0x85f   : > { %4720 = vmatmul.f32.vlgmr.msrb.gmra.mxu2 %v4547_v2 }
 0x860   : > { %v4483_v36 = vpop.f32.mrf.mxu2  ;;  %4824 = vmatpush.msrb.mxu2 %v4677_v35  ;;  %v4850_v35 = vld [vmem:[%s8599_s21 + $0x20] sm:$0xff] }
 0x861   : > { %v4484_v25 = vadd.f32 %v4483_v36, %v4454_v37  ;;  %v4543_v27 = vpop.f32.mrf.mxu3  ;;  %v4851_v37 = vld [vmem:[%s8599_s21 + $0x28] sm:$0xff]  ;;  %v4849_v36 = vld [vmem:[%s8599_s21 + $0x18] sm:$0xff] }
 0x862   : > { %4825 = vmatpush.msrb.mxu2 %v4675_v46  ;;  %v8388_v19 = vadd.f32 %v4543_v27, %v4457_v31  ;;  %v4867_v46 = vld [vmem:[%s8599_s21 + $0xa8] sm:$0xff]  ;;  %v4678_v31 = vld [vmem:[%s8598_s20] sm:$0x3]  ;;  %v4864_v27 = vld [vmem:[%s8599_s21 + $0x90] sm:$0xff] }
 0x863   : > { %v4546_v32 = vmax.f32 %v4484_v25, 0.0  ;;  %4912 = vmatpush.msrb.mxu0 %v4867_v46  ;;  %v4848_v25 = vld [vmem:[%s8599_s21 + $0x10] sm:$0xff] }
 0x864   : > { %4826 = vmatpush.msrb.mxu2 %v4673_v55  ;;  %v4549_v42 = vmax.f32 %v8388_v19, 0.0  ;;  %v4847_v55 = vld [vmem:[%s8599_s21 + $0x8] sm:$0xff] }
 0x865   : > { %4700 = vmatmul.f32.vlgmr.msrb.gmra.mxu1 %v4546_v32 }
 0x866   : > { %4804 = vmatpush.msrb.mxu1 %v4645_v5  ;;  %4827 = vmatpush.msrb.mxu2 %v4671_v41  ;;  %v4866_v5 = vld [vmem:[%s8599_s21 + $0xa0] sm:$0xff]  ;;  %v4865_v41 = vld [vmem:[%s8599_s21 + $0x98] sm:$0xff] }
 0x867   : > { %4780 = vmatmul.f32.vlgmr.msra.gmra.mxu2 %v4546_v32  ;;  %v4846_v32 = vld [vmem:[%s8599_s21] sm:$0xff]  ;;  %4913 = vmatpush.msrb.mxu0 %v4866_v5 }
 0x868   : > { %4805 = vmatpush.msrb.mxu1 %v4643_v54  ;;  %4828 = vmatpush.msrb.mxu2 %v4669_v7  ;;  %v4523_v0 = vpop.f32.mrf.mxu2  ;;  %v4680_v54 = vperm.slane %v4678_v31, 0  ;;  %v4863_v7 = vld [vmem:[%s8599_s21 + $0x88] sm:$0xff] }
 0x869   : > { %v8399_v40 = vadd.f32 %v4523_v0, %v4456_v6  ;;  %4914 = vmatpush.msrb.mxu0 %v4865_v41  ;;  %v4862_v6 = vld [vmem:[%s8599_s21 + $0x80] sm:$0xff] }
 0x86a   : > { %4806 = vmatpush.msrb.mxu1 %v4641_v62  ;;  %4829 = vmatpush.msrb.mxu2 %v4667_v53 }
 0x86b   : > { %v4548_v21 = vmax.f32 %v8399_v40, 0.0  ;;  %4915 = vmatpush.msrb.mxu0 %v4864_v27  ;;  %v4681_v40 = vperm.slane %v4678_v31, 1 }
 0x86c   : > { %4807 = vmatpush.msrb.mxu1 %v4639_v18  ;;  %4830 = vmatpush.msrb.mxu2 %v4665_v24 }
 0x86d   : > { %4740 = vmatmul.f32.vlgmr.msrb.gmra.mxu3 %v4548_v21  ;;  %4760 = vmatmul.f32.vlgmr.msra.gmra.mxu1 %v4549_v42 }
 0x86e   : > { %4808 = vmatpush.msrb.mxu1 %v4637_v22  ;;  %4831 = vmatpush.msrb.mxu2 %v4663_v28 }
 0x86f   : > { %4882 = vmatpush.msrb.mxu3 %v4861_v39  ;;  %4916 = vmatpush.msrb.mxu0 %v4863_v7 }
 0x870   : > { %4809 = vmatpush.msrb.mxu1 %v4635_v26  ;;  %4832 = vmatpush.msrb.mxu2 %v4661_v16 }
 0x871   : > { %4883 = vmatpush.msrb.mxu3 %v4860_v4  ;;  %4917 = vmatpush.msrb.mxu0 %v4862_v6  ;;  %v8903_v4 = vlaneseq }
 0x872   : > { %4810 = vmatpush.msrb.mxu1 %v4633_v10  ;;  %4833 = vmatpush.msrb.mxu2 %v4659_v51  ;;  %v5319_v51 = vld [vmem:[%s8600_s22] ss:$0 sm:$0xff] }
 0x873   : > { %4884 = vmatpush.msrb.mxu3 %v4859_v48  ;;  %v4923_v10 = vand.u32 127, %v8903_v4 }
 0x874   : > { %4811 = vmatpush.msrb.mxu1 %v4631_v45  ;;  %4834 = vmatpush.msrb.mxu2 %v4657_v61  ;;  %v5404_v61 = vmov 0.0  }
 0x875   : > { %4800 = vmatmul.f32.vlgmr.msra.gmra.mxu3 %v4547_v2  ;;  %v4852_v2 = vld [vmem:[%s8599_s21 + $0x30] sm:$0xff]  ;;  %vm4924_vm6 = vcmp.eq.s32.totalorder %v4923_v10, 0  ;;  %vm4925_vm7 = vcmp.eq.s32.totalorder %v4923_v10, 3 }
 0x876   : > { %4812 = vmatpush.msrb.mxu1 %v4629_v29  ;;  %4835 = vmatpush.msrb.mxu2 %v4655_v52  ;;  %vm4926_vm8 = vmor %vm4924_vm6, %vm4925_vm7 }
 0x877   : > { %4885 = vmatpush.msrb.mxu3 %v4858_v49  ;;  %v4927_v20 = vsel %vm4926_vm8, 1.0, %v5404_v61 }
 0x878   : > { %4813 = vmatpush.msrb.mxu1 %v4627_v58  ;;  %4836 = vmatpush.msrb.mxu2 %v4653_v56 }
 0x879   : > { %4886 = vmatpush.msrb.mxu3 %v4857_v8 }
 0x87a   : > { %4814 = vmatpush.msrb.mxu1 %v4625_v63  ;;  %4837 = vmatpush.msrb.mxu2 %v4651_v13 }
 0x87b   : > { %4887 = vmatpush.msrb.mxu3 %v4856_v47 }
 0x87c   : > { %4815 = vmatpush.msrb.mxu1 %v4623_v33  ;;  %4838 = vmatpush.msrb.mxu2 %v4649_v43 }
 0x87d   : > { %4888 = vmatpush.msrb.mxu3 %v4855_v44 }
 0x87e   : > { %4816 = vmatpush.msrb.mxu1 %v4621_v34  ;;  %4839 = vmatpush.msrb.mxu2 %v4647_v3 }
 0x87f   : > { %4840 = vmatmul.f32.vlgmr.msrb.gmra.mxu2 %v4549_v42  ;;  %4889 = vmatpush.msrb.mxu3 %v4854_v23 }
 0x880   : > { %4817 = vmatpush.msrb.mxu1 %v4619_v17 }
 0x881   : > { %4890 = vmatpush.msrb.mxu3 %v4853_v30 }
 0x882   : > { %4818 = vmatpush.msrb.mxu1 %v4617_v1 }
 0x883   : > { %4891 = vmatpush.msrb.mxu3 %v4852_v2 }
 0x884   : > { %4819 = vmatpush.msrb.mxu1 %v4615_v15 }
 0x885   : > { %4820 = vmatmul.f32.vlgmr.msrb.gmra.mxu1 %v4548_v21  ;;  %4892 = vmatpush.msrb.mxu3 %v4851_v37 }
 0x887   : > { %4893 = vmatpush.msrb.mxu3 %v4850_v35 }
 0x889   : > { %4894 = vmatpush.msrb.mxu3 %v4849_v36 }
 0x88b   : > { %4895 = vmatpush.msrb.mxu3 %v4848_v25 }
 0x88d   : > { %4896 = vmatpush.msrb.mxu3 %v4847_v55 }
 0x88f   : > { %4897 = vmatpush.msrb.mxu3 %v4846_v32 }
 0x8e2   : > { %v4701_v9 = vpop.f32.mrf.mxu1  ;;  %v4721_v62 = vpop.f32.mrf.mxu2 }
 0x8e3   : > { %v4702_v59 = vadd.f32 %v4701_v9, %v4680_v54 }
 0x8e5   : > { %v4722_v53 = vadd.f32 %v4721_v62, %v4702_v59 }
 0x8ea   : > { %v4761_v14 = vpop.f32.mrf.mxu1  ;;  %v4781_v22 = vpop.f32.mrf.mxu2 }
 0x8eb   : > { %v4782_v28 = vadd.f32 %v4781_v22, %v4681_v40 }
 0x8f0   : > { %v4741_v19 = vpop.f32.mrf.mxu3 }
 0x8f1   : > { %v4742_v0 = vadd.f32 %v4741_v19, %v4722_v53 }
 0x8f3   : > { %v4762_v18 = vadd.f32 %v4761_v14, %v4742_v0 }
 0x8f5   : > { %v4844_v24 = vmax.f32 %v4762_v18, 0.0 }
 0x8f7   : > { %4898 = vmatmul.f32.vlgmr.msrb.gmra.mxu3 %v4844_v24 }
 0x8f8   : > { %v4801_v21 = vpop.f32.mrf.mxu3 }
 0x8f9   : > { %v4802_v42 = vadd.f32 %v4801_v21, %v4782_v28 }
 0x902   : > { %v4821_v60 = vpop.f32.mrf.mxu1  ;;  %v4841_v26 = vpop.f32.mrf.mxu2 }
 0x903   : > { %v4822_v39 = vadd.f32 %v4821_v60, %v4802_v42 }
 0x905   : > { %v4842_v16 = vadd.f32 %v4841_v26, %v4822_v39 }
 0x907   : > { %v4845_v57 = vmax.f32 %v4842_v16, 0.0 }
 0x909   : > { %4918 = vmatmul.f32.vlgmr.msrb.gmra.mxu0 %v4845_v57 }
 0x97a   : > { %v4899_v12 = vpop.f32.mrf.mxu3 }
 0x97b   : > { %v4900_v48 = vadd.f32 %v5319_v51, %v4899_v12 }
 0x986   : > { %v4919_v45 = vpop.f32.mrf.mxu0 }
 0x987   : > { %v4920_v29 = vadd.f32 %v4919_v45, %v4900_v48 }
 0x989   : > { %v4928_v52 = vadd.f32 %v4927_v20, %v4920_v29 }
 0x98b   : > { %4930 = vst.msk [vmem:[%s744_s1] sm:$0xff] %vm4929_vm9, %v4928_v52 }
 0x98c PF: > { %s35_s4 = sadd.s32 1, %s5394_s4  }
 0x98d   : > { %p32_p8 = scmp.ge.s32.totalorder %s35_s4, 4  }
 0x98f   :  { %34 = sbr.rel (!%p32_p8) target bundleno = 12 (0xc), region = 163 }
 0x994   :  { %4950 = vsyncpa [#allocation3], 1 }
 0x995   :  { %4952 = vsyncpa [#allocation3 + $0x1], 1 }
 0x996   :  { %4953 = vsyncpa [#allocation5], 1 }

</bundles_post_ra>
